<compile_context>
chip_gen: v6e
topology: v6e:2x2x1
jax: 0.10.0
libtpu: 0.0.40
codegen_flags: <defaults>
</compile_context>

<pallas_src>
import random
from functools import partial

import jax
import jax.numpy as jnp
from jax.experimental import pallas as pl
from jax.experimental.pallas import tpu as pltpu


# ----------------------------------------------------------------------------
# helpers
# ----------------------------------------------------------------------------
def get_paddings(size, num_levels):
    paddings = []
    for i in range(num_levels - 1):
        if size % 4 == 2:
            paddings.append(1)
            size = size // 2 + 1
        else:
            paddings.append(0)
            size //= 2
    if num_levels > 0:
        paddings.append(0)
        size //= 2
    return (size, paddings)


_VMEM_LIMIT_CACHE = None


def _vmem_limit():
    """Generation-aware scoped-VMEM budget (review: gate on get_tpu_info)."""
    global _VMEM_LIMIT_CACHE
    if _VMEM_LIMIT_CACHE is None:
        limit = 48 * 1024 * 1024
        try:
            cap = int(getattr(pltpu.get_tpu_info(), "vmem_capacity_bytes", 0) or 0)
            if cap > 0:
                # 3/4 of physical, capped at 96 MiB (v5e/v6e), floored at 32 MiB.
                limit = max(32 * 1024 * 1024, min(3 * cap // 4, 96 * 1024 * 1024))
        except Exception:
            pass
        _VMEM_LIMIT_CACHE = limit
    return _VMEM_LIMIT_CACHE


def _mosaic_params(semantics):
    return pltpu.CompilerParams(dimension_semantics=semantics,
                                vmem_limit_bytes=_vmem_limit())


# ----------------------------------------------------------------------------
# Pallas kernels
# ----------------------------------------------------------------------------
def _conv_tap_kernel(x_ref, w_ref, b_ref, a_ref, *rest, offsets, res_scale,
                     add_residual):
    """One conv layer for one batch sample (in-kernel im2col).

    x_ref : (Mf + shift, Cin_eq)  flat padded activation frame (bf16)
    w_ref : (T, Cin_eq, Cout)     stacked tap weights (bf16), VMEM resident
    b_ref : (1, Cout) f32 bias
    a_ref : (1, Cout) f32 PReLU alpha (1.0 -> identity)
    rest  : [r_ref (Mf, Cout)], o_ref (Mf, Cout), acc_ref (Mf, Cout) f32

    out = [residual + res_scale *] prelu(sum_t shift_t(x) @ w_t + b)

    The kh*kw taps are accumulated as shifted sub-matmuls of the flat frame,
    so no (M, kh*kw*C) im2col matrix is ever materialized in HBM.
    """
    if add_residual:
        r_ref, o_ref, acc_ref = rest
    else:
        o_ref, acc_ref = rest
    mf = o_ref.shape[0]

    acc_ref[...] = jnp.zeros_like(acc_ref)
    for t, off in enumerate(offsets):                       # static, unrolled
        acc_ref[...] += jnp.dot(x_ref[pl.ds(off, mf), :], w_ref[t],
                                preferred_element_type=jnp.float32)

    acc = acc_ref[...] + b_ref[...]
    acc = jnp.where(acc >= 0.0, acc, a_ref[...] * acc)      # PReLU (alpha=1 -> id)
    if add_residual:
        acc = r_ref[...].astype(jnp.float32) + res_scale * acc
    o_ref[...] = acc.astype(o_ref.dtype)


def conv_layer_pallas(x3, w, b, alpha, offsets, mf, residual=None,
                      res_scale=1.0, out_dtype=jnp.bfloat16):
    """x3: (N, Mf+shift, Cin_eq) bf16 flat frames -> (N, Mf, Cout)."""
    n, mx, cf = x3.shape
    n_taps, _, cout = w.shape
    add_res = residual is not None

    in_specs = [
        pl.BlockSpec((None, mx, cf), lambda i: (i, 0, 0)),      # per-sample frame
        pl.BlockSpec((n_taps, cf, cout), lambda i: (0, 0, 0)),  # weights resident
        pl.BlockSpec((1, cout), lambda i: (0, 0)),
        pl.BlockSpec((1, cout), lambda i: (0, 0)),
    ]
    args = [x3, w, b, alpha]
    if add_res:
        in_specs.append(pl.BlockSpec((None, mf, cout), lambda i: (i, 0, 0)))
        args.append(residual)

    itemsize = jnp.dtype(out_dtype).itemsize
    bytes_accessed = int(x3.size * x3.dtype.itemsize + w.size * 2
                         + n * mf * cout * itemsize
                         + (residual.size * residual.dtype.itemsize if add_res else 0)
                         + 2 * cout * 4)
    cost = pl.CostEstimate(flops=2 * n * mf * cf * cout * n_taps,
                           transcendentals=0, bytes_accessed=bytes_accessed)

    return pl.pallas_call(
        partial(_conv_tap_kernel, offsets=tuple(int(o) for o in offsets),
                res_scale=float(res_scale), add_residual=add_res),
        out_shape=jax.ShapeDtypeStruct((n, mf, cout), out_dtype),
        grid=(n,),
        in_specs=in_specs,
        out_specs=pl.BlockSpec((None, mf, cout), lambda i: (i, 0, 0)),
        scratch_shapes=[pltpu.VMEM((mf, cout), jnp.float32)],
        compiler_params=_mosaic_params(("parallel",)),      # megacore over batch
        cost_estimate=cost,
    )(*args)


def _fc_stack_kernel(x_ref, w0_ref, b0_ref, a0_ref, *rest, nblocks):
    """Whole FC stack (lin0 + PReLU + all MiniFCResBlocks) in one call.

    The running activation h stays in f32 (all residual adds, including the
    last block's, are f32); bf16 only at the MXU inputs.
    """
    if nblocks > 0:
        w1_ref, b1_ref, a1_ref, w2_ref, b2_ref, o_ref = rest
    else:
        (o_ref,) = rest
    h = jnp.dot(x_ref[...], w0_ref[...],
                preferred_element_type=jnp.float32) + b0_ref[...]
    h = jnp.where(h >= 0.0, h, a0_ref[...] * h)
    for i in range(nblocks):                                 # static, unrolled
        t = jnp.dot(h.astype(jnp.bfloat16), w1_ref[i],
                    preferred_element_type=jnp.float32) + b1_ref[i]
        t = jnp.where(t >= 0.0, t, a1_ref[i] * t)
        h = h + (jnp.dot(t.astype(jnp.bfloat16), w2_ref[i],
                         preferred_element_type=jnp.float32) + b2_ref[i])
    o_ref[...] = h.astype(o_ref.dtype)


def fc_stack_pallas(x2d, fc):
    m, k0 = x2d.shape
    f = fc["w0"].shape[1]
    nb = fc["nblocks"]
    args = [x2d.astype(jnp.bfloat16), fc["w0"], fc["b0"], fc["a0"]]
    in_specs = [
        pl.BlockSpec((m, k0), lambda i: (0, 0)),
        pl.BlockSpec((k0, f), lambda i: (0, 0)),
        pl.BlockSpec((1, f), lambda i: (0, 0)),
        pl.BlockSpec((1, f), lambda i: (0, 0)),
    ]
    if nb > 0:
        args += [fc["w1"], fc["b1"], fc["a1"], fc["w2"], fc["b2"]]
        in_specs += [
            pl.BlockSpec((nb, f, f), lambda i: (0, 0, 0)),
            pl.BlockSpec((nb, 1, f), lambda i: (0, 0, 0)),
            pl.BlockSpec((nb, 1, f), lambda i: (0, 0, 0)),
            pl.BlockSpec((nb, f, f), lambda i: (0, 0, 0)),
            pl.BlockSpec((nb, 1, f), lambda i: (0, 0, 0)),
        ]
    flops = 2 * m * (k0 * f + nb * 2 * f * f)
    bytes_accessed = int(m * k0 * 2 + k0 * f * 2 + nb * 4 * f * f
                         + m * f * 4 + (2 + 3 * nb) * f * 4)
    return pl.pallas_call(
        partial(_fc_stack_kernel, nblocks=nb),
        out_shape=jax.ShapeDtypeStruct((m, f), jnp.float32),
        grid=(1,),
        in_specs=in_specs,
        out_specs=pl.BlockSpec((m, f), lambda i: (0, 0)),
        compiler_params=_mosaic_params(("arbitrary",)),
        cost_estimate=pl.CostEstimate(flops=flops, transcendentals=0,
                                      bytes_accessed=bytes_accessed),
    )(*args)


def _combine_kernel(a_ref, b_ref, o_ref, *, sa, sb):
    o_ref[...] = (sa * a_ref[...].astype(jnp.float32)
                  + sb * b_ref[...].astype(jnp.float32)).astype(o_ref.dtype)


def combine2d(a, b, sa=1.0, sb=1.0, out_dtype=jnp.bfloat16):
    """sa*a + sb*b, full-block (used only for the reflect path)."""
    m, n = a.shape
    return pl.pallas_call(
        partial(_combine_kernel, sa=float(sa), sb=float(sb)),
        out_shape=jax.ShapeDtypeStruct((m, n), out_dtype),
        grid=(1,),
        in_specs=[pl.BlockSpec((m, n), lambda i: (0, 0)),
                  pl.BlockSpec((m, n), lambda i: (0, 0))],
        out_specs=pl.BlockSpec((m, n), lambda i: (0, 0)),
        compiler_params=_mosaic_params(("arbitrary",)),
    )(a, b)


# ----------------------------------------------------------------------------
# conv-layer wrapper: frame construction (pad / space-to-depth) in XLA, the
# matmul + bias + PReLU + residual fusion in Pallas.
# ----------------------------------------------------------------------------
def _space_to_depth(x):
    # (N, H, W, C) -> (N, H//2, W//2, 4C), channel order (rh, rw, c)
    n, h, w, c = x.shape
    x = x.reshape(n, h // 2, 2, w // 2, 2, c)
    x = x.transpose(0, 1, 3, 2, 4, 5)
    return x.reshape(n, h // 2, w // 2, 4 * c)


def run_conv(x, layer, residual=None, res_scale=1.0):
    """x: (N,H,W,C) bf16 NHWC; layer: prepped conv; residual: (N,OH,OW,Cout)."""
    n, h, w_dim, _ = x.shape
    k, s, p = layer["k"], layer["stride"], layer["pad"]
    oh = (h + 2 * p - k) // s + 1
    ow = (w_dim + 2 * p - k) // s + 1

    xp = x if p == 0 else jnp.pad(x, ((0, 0), (p, p), (p, p), (0, 0)))
    if s == 2:
        # stride-2 conv == stride-1 conv on a 2x2 space-to-depth input
        if xp.shape[1] % 2:
            xp = jnp.pad(xp, ((0, 0), (0, 1), (0, 0), (0, 0)))
        if xp.shape[2] % 2:
            xp = jnp.pad(xp, ((0, 0), (0, 0), (0, 1), (0, 0)))
        xp = _space_to_depth(xp)

    nn, hf, wf, cf = xp.shape
    assert cf == layer["cin_eq"], (cf, layer["cin_eq"])
    kk_h, kk_w = layer["kk_h"], layer["kk_w"]
    assert hf >= oh + kk_h - 1 and wf >= ow + kk_w - 1

    mf = hf * wf
    shift = (kk_h - 1) * wf + (kk_w - 1)
    x3 = xp.reshape(nn, mf, cf)
    if shift:
        x3 = jnp.pad(x3, ((0, 0), (0, shift), (0, 0)))        # tap-shift tail
    offsets = tuple(i * wf + j for i in range(kk_h) for j in range(kk_w))

    cout = layer["cout"]
    res3 = None
    if residual is not None:
        rf = residual
        if rf.shape[1] != hf or rf.shape[2] != wf:
            rf = jnp.pad(rf, ((0, 0), (0, hf - rf.shape[1]),
                              (0, wf - rf.shape[2]), (0, 0)))
        res3 = rf.reshape(nn, mf, cout)

    out3 = conv_layer_pallas(x3, layer["w"], layer["b"], layer["alpha"],
                             offsets, mf, residual=res3, res_scale=res_scale)
    out = out3.reshape(nn, hf, wf, cout)
    if hf != oh or wf != ow:
        out = out[:, :oh, :ow, :]                             # drop frame margin
    return out


# ----------------------------------------------------------------------------
# parameter init (deterministic, synthetic) — raw weight-norm params
# ----------------------------------------------------------------------------
def _init_wn_conv(key, cin, cout, k):
    k1, k2 = jax.random.split(key)
    v = jax.random.normal(k1, (cout, cin, k, k), jnp.float32) * 0.1
    g = jnp.sqrt(jnp.sum(v.reshape(cout, -1) ** 2, axis=1))
    b = jax.random.normal(k2, (cout,), jnp.float32) * 0.01
    return {"v": v, "g": g, "b": b}


def _init_wn_linear(key, fin, fout):
    k1, k2 = jax.random.split(key)
    v = jax.random.normal(k1, (fout, fin), jnp.float32) * 0.05
    g = jnp.sqrt(jnp.sum(v ** 2, axis=1))
    b = jax.random.normal(k2, (fout,), jnp.float32) * 0.01
    return {"v": v, "g": g, "b": b}


def _init_prelu(c):
    return jnp.full((c,), 0.25, jnp.float32)


def _init_resblock(key, cin, cout, stride=1, padding=0, scale=1.0):
    # TODO(synk): MiniResBlock internals reconstructed (WN convs + PReLU + skip)
    k1, k2, k3 = jax.random.split(key, 3)
    if stride == 1:
        conv1 = {"p": _init_wn_conv(k1, cin, cout, 3), "stride": 1, "pad": 1}
    else:
        conv1 = {"p": _init_wn_conv(k1, cin, cout, 2), "stride": stride, "pad": padding}
    conv2 = {"p": _init_wn_conv(k2, cout, cout, 3), "stride": 1, "pad": 1}
    skip = None
    if stride != 1:
        skip = {"p": _init_wn_conv(k3, cin, cout, 2), "stride": stride, "pad": padding}
    elif cin != cout:
        skip = {"p": _init_wn_conv(k3, cin, cout, 1), "stride": 1, "pad": 0}
    return {"type": "resblock", "conv1": conv1, "alpha": _init_prelu(cout),
            "conv2": conv2, "skip": skip, "scale": float(scale)}


def init_discriminator(key, in_size, in_channels, conv_channels, conv_layers,
                       fc_features, fc_layers):
    num_levels = len(conv_channels)
    top_size, paddings = get_paddings(in_size, num_levels)
    top_channels = conv_channels[-1] if num_levels > 0 else in_channels
    keys = iter(jax.random.split(key, 256))
    conv = []
    for i in range(num_levels):
        if i == 0:
            conv.append({"type": "conv_prelu",
                         "conv": {"p": _init_wn_conv(next(keys), in_channels,
                                                     conv_channels[0], 6),
                                  "stride": 2, "pad": 2 + paddings[0]},
                         "alpha": _init_prelu(conv_channels[0])})
        else:
            conv.append(_init_resblock(next(keys), conv_channels[i - 1],
                                       conv_channels[i], 2, paddings[i],
                                       1.0 / (i + 1)))
        for _ in range(1, conv_layers[i]):
            conv.append(_init_resblock(next(keys), conv_channels[i], conv_channels[i]))
    fc = {"lin0": _init_wn_linear(next(keys), top_channels * top_size * top_size,
                                  fc_features),
          "alpha0": _init_prelu(fc_features),
          "blocks": [{"lin1": _init_wn_linear(next(keys), fc_features, fc_features),
                      "alpha": _init_prelu(fc_features),
                      "lin2": _init_wn_linear(next(keys), fc_features, fc_features)}
                     for _ in range(fc_layers)]}
    return {"conv": conv, "fc": fc, "top_size": top_size,
            "top_channels": top_channels}


# ----------------------------------------------------------------------------
# one-time prep: weight-norm reparam + stride-2 -> space-to-depth rewrite +
# tap stacking + conv1/skip fusion + bf16 cast (all hoisted out of forward)
# ----------------------------------------------------------------------------
def _wn_conv_weight(p):
    v, g, b = p["v"], p["g"], p["b"]
    cout = v.shape[0]
    norm = jnp.maximum(jnp.sqrt(jnp.sum(v.reshape(cout, -1) ** 2, axis=1)), 1e-12)
    return v * (g / norm)[:, None, None, None], b


def _wn_linear_weight(p):
    v, g, b = p["v"], p["g"], p["b"]
    norm = jnp.maximum(jnp.sqrt(jnp.sum(v ** 2, axis=1)), 1e-12)
    return v * (g / norm)[:, None], b


def _prep_conv(conv_meta, alpha=None):
    w, b = _wn_conv_weight(conv_meta["p"])
    cout, cin, kh, kw = w.shape
    s = conv_meta["stride"]
    assert s in (1, 2)
    if s == 2:
        # stride-2 kxk conv == stride-1 ceil(k/2) conv on space-to-depth input
        kh_e, kw_e = kh + (kh % 2), kw + (kw % 2)
        wp = jnp.zeros((cout, cin, kh_e, kw_e), w.dtype).at[:, :, :kh, :kw].set(w)
        kk_h, kk_w = kh_e // 2, kw_e // 2
        wr = wp.reshape(cout, cin, kk_h, 2, kk_w, 2).transpose(2, 4, 3, 5, 1, 0)
        w_taps = wr.reshape(kk_h * kk_w, 4 * cin, cout)       # (rh, rw, cin) order
        cin_eq = 4 * cin
    else:
        kk_h, kk_w = kh, kw
        w_taps = jnp.transpose(w, (2, 3, 1, 0)).reshape(kh * kw, cin, cout)
        cin_eq = cin
    a = (jnp.ones((cout,), jnp.float32) if alpha is None
         else alpha.astype(jnp.float32))
    return {"w": w_taps.astype(jnp.bfloat16),
            "b": b.reshape(1, cout).astype(jnp.float32),
            "alpha": a.reshape(1, cout),
            "k": kh, "stride": s, "pad": conv_meta["pad"],
            "kk_h": kk_h, "kk_w": kk_w, "cin_eq": cin_eq, "cout": cout}


def _fuse_convs(p1, p2):
    """Same geometry + same input -> one matmul with Cout concatenated."""
    for key in ("k", "stride", "pad", "kk_h", "kk_w", "cin_eq"):
        assert p1[key] == p2[key]
    out = {key: p1[key] for key in ("k", "stride", "pad", "kk_h", "kk_w", "cin_eq")}
    out["w"] = jnp.concatenate([p1["w"], p2["w"]], axis=-1)
    out["b"] = jnp.concatenate([p1["b"], p2["b"]], axis=-1)
    out["alpha"] = jnp.concatenate([p1["alpha"], p2["alpha"]], axis=-1)
    out["cout"] = p1["cout"] + p2["cout"]
    return out


def prepare_discriminator(raw):
    conv = []
    for layer in raw["conv"]:
        if layer["type"] == "conv_prelu":
            conv.append({"type": "stem",
                         "conv": _prep_conv(layer["conv"], layer["alpha"])})
        else:
            c1 = _prep_conv(layer["conv1"], layer["alpha"])
            c2 = _prep_conv(layer["conv2"], None)
            entry = {"type": "resblock", "conv2": c2, "scale": layer["scale"],
                     "down": None, "split": None, "conv1": None, "skip": None}
            if layer["conv1"]["stride"] != 1:
                sk = _prep_conv(layer["skip"], None)
                entry["down"] = _fuse_convs(c1, sk)            # shared 2x2/s2 input
                entry["split"] = c1["cout"]
            else:
                entry["conv1"] = c1
                if layer["skip"] is not None:
                    entry["skip"] = _prep_conv(layer["skip"], None)
            conv.append(entry)

    fcr = raw["fc"]
    w0, b0 = _wn_linear_weight(fcr["lin0"])
    f, k0 = w0.shape
    c, s = raw["top_channels"], raw["top_size"]
    assert c * s * s == k0
    # NCHW-flat -> NHWC-flat row order (activations are flattened NHWC)
    w0 = w0.reshape(f, c, s, s).transpose(0, 2, 3, 1).reshape(f, k0)
    fc = {"w0": w0.T.astype(jnp.bfloat16),
          "b0": b0.reshape(1, f).astype(jnp.float32),
          "a0": fcr["alpha0"].astype(jnp.float32).reshape(1, f),
          "nblocks": len(fcr["blocks"])}
    if fc["nblocks"]:
        w1s, b1s, a1s, w2s, b2s = [], [], [], [], []
        for blk in fcr["blocks"]:
            w1, b1 = _wn_linear_weight(blk["lin1"])
            w2, b2 = _wn_linear_weight(blk["lin2"])
            w1s.append(w1.T)
            b1s.append(b1.reshape(1, f))
            a1s.append(blk["alpha"].astype(jnp.float32).reshape(1, f))
            w2s.append(w2.T)
            b2s.append(b2.reshape(1, f))
        fc["w1"] = jnp.stack(w1s).astype(jnp.bfloat16)
        fc["b1"] = jnp.stack(b1s).astype(jnp.float32)
        fc["a1"] = jnp.stack(a1s)
        fc["w2"] = jnp.stack(w2s).astype(jnp.bfloat16)
        fc["b2"] = jnp.stack(b2s).astype(jnp.float32)
    return {"conv": conv, "fc": fc}


# ----------------------------------------------------------------------------
# forward
# ----------------------------------------------------------------------------
def _apply_resblock(p, x):
    if p["down"] is not None:
        # fused conv1 + skip (one matmul over the shared space-to-depth input)
        both = run_conv(x, p["down"])
        h = both[..., :p["split"]]          # conv1 half, PReLU applied in-kernel
        skip = both[..., p["split"]:]       # skip half, alpha==1 -> identity
    else:
        h = run_conv(x, p["conv1"])                         # 3x3/s1 + fused PReLU
        skip = x if p["skip"] is None else run_conv(x, p["skip"])
    # conv2 + fused residual merge: out = skip + scale * conv2(h)
    return run_conv(h, p["conv2"], residual=skip, res_scale=p["scale"])


def apply_conv(prep, x_nhwc):
    for layer in prep["conv"]:
        if layer["type"] == "stem":
            x_nhwc = run_conv(x_nhwc, layer["conv"])
        else:
            x_nhwc = _apply_resblock(layer, x_nhwc)
    return x_nhwc.reshape(x_nhwc.shape[0], -1)     # NHWC flatten (lin0 permuted)


def apply_fc(prep, x2d):
    return fc_stack_pallas(x2d, prep["fc"])        # whole FC stack, one call


def discriminator_forward(prep, x, paired=None, random_offset=False,
                          reflect=False, seed=0):
    if random_offset:
        rng = random.Random(seed)      # host-side randomness, like the PyTorch code
        n, _, h, w = x.shape
        mo = h // 4
        dx = [rng.randrange(mo) + rng.randrange(mo) for _ in range(n)]
        dy = [rng.randrange(mo) + rng.randrange(mo) for _ in range(n)]
        xp = jnp.pad(x, ((0, 0), (0, 0), (mo, mo), (mo, mo)))
        x = jnp.stack([xp[k, :, dy[k]:dy[k] + h, dx[k]:dx[k] + w]
                       for k in range(n)], 0)
        if paired is not None:
            pp = jnp.pad(paired, ((0, 0), (0, 0), (mo, mo), (mo, mo)))
            paired = jnp.stack([pp[k, :, dy[k]:dy[k] + h, dx[k]:dx[k] + w]
                                for k in range(n)], 0)

    # single NCHW->NHWC transition + bf16 cast for the whole network
    x = jnp.transpose(x, (0, 2, 3, 1)).astype(jnp.bfloat16)
    if paired is None:
        return apply_fc(prep, apply_conv(prep, x))

    paired = jnp.transpose(paired, (0, 2, 3, 1)).astype(jnp.bfloat16)
    bsz = x.shape[0]
    # one conv pass for x and paired (concatenated along batch)
    co_both = apply_conv(prep, jnp.concatenate([x, paired], axis=0))
    co, pco = co_both[:bsz], co_both[bsz:]
    if reflect:
        comb = combine2d(co, pco, 2.0, -1.0)
        # all three FC heads in one fused FC call
        fc_all = apply_fc(prep, jnp.concatenate([co, pco, comb], axis=0))
        return fc_all[:bsz], fc_all[bsz:2 * bsz], fc_all[2 * bsz:]
    fc_all = apply_fc(prep, co_both)
    return fc_all[:bsz], fc_all[bsz:], None


# ----------------------------------------------------------------------------
if __name__ == "__main__":
    key = jax.random.PRNGKey(0)
    pkey, xkey = jax.random.split(key)

    # small config: in_size=16, in_channels=4, conv_channels=(8,16),
    # conv_layers=(1,1), fc_features=32, fc_layers=1, batch=2
    raw = init_discriminator(pkey, in_size=16, in_channels=4,
                             conv_channels=(8, 16), conv_layers=(1, 1),
                             fc_features=32, fc_layers=1)
    prep = prepare_discriminator(raw)   # weight prep hoisted out of forward

    x = jax.random.normal(xkey, (2, 4, 16, 16), jnp.float32)

    fwd = jax.jit(lambda inp: discriminator_forward(prep, inp))
    out = jax.block_until_ready(fwd(x))                       # paired=None path
    assert out.shape == (2, 32) and out.dtype == jnp.float32, (out.shape, out.dtype)

    # also exercise the paired + reflect path (shared conv + fused FC heads)
    y = jax.random.normal(jax.random.PRNGKey(1), (2, 4, 16, 16), jnp.float32)
    pfwd = jax.jit(lambda a, b: discriminator_forward(prep, a, paired=b, reflect=True))
    o1, o2, o3 = pfwd(x, y)
    jax.block_until_ready((o1, o2, o3))
    assert o1.shape == (2, 32) and o2.shape == (2, 32) and o3.shape == (2, 32)

    print("KERNEL_OK")
</pallas_src>

<mosaic_0001>
module attributes {stable_mosaic.version = 11 : i64} {
  func.func @_conv_tap_kernel(%arg0: i32, %arg1: memref<1x122x16xbf16, #tpu.memory_space<vmem>>, %arg2: memref<9x16x8xbf16, #tpu.memory_space<vmem>>, %arg3: memref<1x8xf32, #tpu.memory_space<vmem>>, %arg4: memref<1x8xf32, #tpu.memory_space<vmem>>, %arg5: memref<1x100x8xbf16, #tpu.memory_space<vmem>>, %arg6: memref<100x8xf32, #tpu.memory_space<vmem>>) attributes {dimension_semantics = [#tpu.dimension_semantics<parallel>], iteration_bounds = array<i64: 2>, scalar_prefetch = 0 : i64, scratch_operands = 1 : i64, tpu.core_type = #tpu.core_type<tc>, window_params = [{transform_indices = @transform_0, window_bounds = array<i64: 1, 122, 16>}, {pipeline_mode = #tpu.pipeline_mode<synchronous>, transform_indices = @transform_1, window_bounds = array<i64: 9, 16, 8>}, {pipeline_mode = #tpu.pipeline_mode<synchronous>, transform_indices = @transform_2, window_bounds = array<i64: 1, 8>}, {pipeline_mode = #tpu.pipeline_mode<synchronous>, transform_indices = @transform_3, window_bounds = array<i64: 1, 8>}, {transform_indices = @transform_4, window_bounds = array<i64: 1, 100, 8>}]} {
    %cst = arith.constant 0.000000e+00 : f32
    %0 = vector.broadcast %cst : f32 to vector<100x8xf32>
    %c0 = arith.constant 0 : index
    %c0_0 = arith.constant 0 : index
    %1 = vector.load %arg6[%c0, %c0_0] : memref<100x8xf32, #tpu.memory_space<vmem>>, vector<100x8xf32>
    tpu.vector_store %arg6[%c0, %c0_0], %0 {strides = array<i32>} : memref<100x8xf32, #tpu.memory_space<vmem>>, vector<100x8xf32>,
    %c0_1 = arith.constant 0 : index
    %c0_2 = arith.constant 0 : index
    %2 = vector.load %arg6[%c0_1, %c0_2] : memref<100x8xf32, #tpu.memory_space<vmem>>, vector<100x8xf32>
    %c0_3 = arith.constant 0 : index
    %c0_4 = arith.constant 0 : index
    %c0_5 = arith.constant 0 : index
    %3 = vector.load %arg1[%c0_3, %c0_4, %c0_5] : memref<1x122x16xbf16, #tpu.memory_space<vmem>>, vector<1x100x16xbf16>
    %4 = vector.shape_cast %3 : vector<1x100x16xbf16> to vector<100x16xbf16>
    %c0_6 = arith.constant 0 : index
    %c0_7 = arith.constant 0 : index
    %c0_8 = arith.constant 0 : index
    %5 = vector.load %arg2[%c0_6, %c0_7, %c0_8] : memref<9x16x8xbf16, #tpu.memory_space<vmem>>, vector<1x16x8xbf16>
    %6 = vector.shape_cast %5 : vector<1x16x8xbf16> to vector<16x8xbf16>
    %cst_9 = arith.constant dense<0.000000e+00> : vector<100x8xf32>
    %7 = tpu.matmul %4, %6, %cst_9 {dimension_numbers = #tpu.dot_dimension_numbers<[1], [0], [0], [1], [0, 0, 1, 1], [], []>} : vector<100x16xbf16>, vector<16x8xbf16>, vector<100x8xf32> -> vector<100x8xf32>
    %8 = arith.addf %2, %7 : vector<100x8xf32>
    %c0_10 = arith.constant 0 : index
    %c0_11 = arith.constant 0 : index
    %9 = vector.load %arg6[%c0_10, %c0_11] : memref<100x8xf32, #tpu.memory_space<vmem>>, vector<100x8xf32>
    tpu.vector_store %arg6[%c0_10, %c0_11], %8 {strides = array<i32>} : memref<100x8xf32, #tpu.memory_space<vmem>>, vector<100x8xf32>,
    %c0_12 = arith.constant 0 : index
    %c0_13 = arith.constant 0 : index
    %10 = vector.load %arg6[%c0_12, %c0_13] : memref<100x8xf32, #tpu.memory_space<vmem>>, vector<100x8xf32>
    %c0_14 = arith.constant 0 : index
    %c1 = arith.constant 1 : index
    %c0_15 = arith.constant 0 : index
    %11 = vector.load %arg1[%c0_14, %c1, %c0_15] : memref<1x122x16xbf16, #tpu.memory_space<vmem>>, vector<1x100x16xbf16>
    %12 = vector.shape_cast %11 : vector<1x100x16xbf16> to vector<100x16xbf16>
    %c1_16 = arith.constant 1 : index
    %c0_17 = arith.constant 0 : index
    %c0_18 = arith.constant 0 : index
    %13 = vector.load %arg2[%c1_16, %c0_17, %c0_18] : memref<9x16x8xbf16, #tpu.memory_space<vmem>>, vector<1x16x8xbf16>
    %14 = vector.shape_cast %13 : vector<1x16x8xbf16> to vector<16x8xbf16>
    %cst_19 = arith.constant dense<0.000000e+00> : vector<100x8xf32>
    %15 = tpu.matmul %12, %14, %cst_19 {dimension_numbers = #tpu.dot_dimension_numbers<[1], [0], [0], [1], [0, 0, 1, 1], [], []>} : vector<100x16xbf16>, vector<16x8xbf16>, vector<100x8xf32> -> vector<100x8xf32>
    %16 = arith.addf %10, %15 : vector<100x8xf32>
    %c0_20 = arith.constant 0 : index
    %c0_21 = arith.constant 0 : index
    %17 = vector.load %arg6[%c0_20, %c0_21] : memref<100x8xf32, #tpu.memory_space<vmem>>, vector<100x8xf32>
    tpu.vector_store %arg6[%c0_20, %c0_21], %16 {strides = array<i32>} : memref<100x8xf32, #tpu.memory_space<vmem>>, vector<100x8xf32>,
    %c0_22 = arith.constant 0 : index
    %c0_23 = arith.constant 0 : index
    %18 = vector.load %arg6[%c0_22, %c0_23] : memref<100x8xf32, #tpu.memory_space<vmem>>, vector<100x8xf32>
    %c0_24 = arith.constant 0 : index
    %c2 = arith.constant 2 : index
    %c0_25 = arith.constant 0 : index
    %19 = vector.load %arg1[%c0_24, %c2, %c0_25] : memref<1x122x16xbf16, #tpu.memory_space<vmem>>, vector<1x100x16xbf16>
    %20 = vector.shape_cast %19 : vector<1x100x16xbf16> to vector<100x16xbf16>
    %c2_26 = arith.constant 2 : index
    %c0_27 = arith.constant 0 : index
    %c0_28 = arith.constant 0 : index
    %21 = vector.load %arg2[%c2_26, %c0_27, %c0_28] : memref<9x16x8xbf16, #tpu.memory_space<vmem>>, vector<1x16x8xbf16>
    %22 = vector.shape_cast %21 : vector<1x16x8xbf16> to vector<16x8xbf16>
    %cst_29 = arith.constant dense<0.000000e+00> : vector<100x8xf32>
    %23 = tpu.matmul %20, %22, %cst_29 {dimension_numbers = #tpu.dot_dimension_numbers<[1], [0], [0], [1], [0, 0, 1, 1], [], []>} : vector<100x16xbf16>, vector<16x8xbf16>, vector<100x8xf32> -> vector<100x8xf32>
    %24 = arith.addf %18, %23 : vector<100x8xf32>
    %c0_30 = arith.constant 0 : index
    %c0_31 = arith.constant 0 : index
    %25 = vector.load %arg6[%c0_30, %c0_31] : memref<100x8xf32, #tpu.memory_space<vmem>>, vector<100x8xf32>
    tpu.vector_store %arg6[%c0_30, %c0_31], %24 {strides = array<i32>} : memref<100x8xf32, #tpu.memory_space<vmem>>, vector<100x8xf32>,
    %c0_32 = arith.constant 0 : index
    %c0_33 = arith.constant 0 : index
    %26 = vector.load %arg6[%c0_32, %c0_33] : memref<100x8xf32, #tpu.memory_space<vmem>>, vector<100x8xf32>
    %c0_34 = arith.constant 0 : index
    %c10 = arith.constant 10 : index
    %c0_35 = arith.constant 0 : index
    %27 = vector.load %arg1[%c0_34, %c10, %c0_35] : memref<1x122x16xbf16, #tpu.memory_space<vmem>>, vector<1x100x16xbf16>
    %28 = vector.shape_cast %27 : vector<1x100x16xbf16> to vector<100x16xbf16>
    %c3 = arith.constant 3 : index
    %c0_36 = arith.constant 0 : index
    %c0_37 = arith.constant 0 : index
    %29 = vector.load %arg2[%c3, %c0_36, %c0_37] : memref<9x16x8xbf16, #tpu.memory_space<vmem>>, vector<1x16x8xbf16>
    %30 = vector.shape_cast %29 : vector<1x16x8xbf16> to vector<16x8xbf16>
    %cst_38 = arith.constant dense<0.000000e+00> : vector<100x8xf32>
    %31 = tpu.matmul %28, %30, %cst_38 {dimension_numbers = #tpu.dot_dimension_numbers<[1], [0], [0], [1], [0, 0, 1, 1], [], []>} : vector<100x16xbf16>, vector<16x8xbf16>, vector<100x8xf32> -> vector<100x8xf32>
    %32 = arith.addf %26, %31 : vector<100x8xf32>
    %c0_39 = arith.constant 0 : index
    %c0_40 = arith.constant 0 : index
    %33 = vector.load %arg6[%c0_39, %c0_40] : memref<100x8xf32, #tpu.memory_space<vmem>>, vector<100x8xf32>
    tpu.vector_store %arg6[%c0_39, %c0_40], %32 {strides = array<i32>} : memref<100x8xf32, #tpu.memory_space<vmem>>, vector<100x8xf32>,
    %c0_41 = arith.constant 0 : index
    %c0_42 = arith.constant 0 : index
    %34 = vector.load %arg6[%c0_41, %c0_42] : memref<100x8xf32, #tpu.memory_space<vmem>>, vector<100x8xf32>
    %c0_43 = arith.constant 0 : index
    %c11 = arith.constant 11 : index
    %c0_44 = arith.constant 0 : index
    %35 = vector.load %arg1[%c0_43, %c11, %c0_44] : memref<1x122x16xbf16, #tpu.memory_space<vmem>>, vector<1x100x16xbf16>
    %36 = vector.shape_cast %35 : vector<1x100x16xbf16> to vector<100x16xbf16>
    %c4 = arith.constant 4 : index
    %c0_45 = arith.constant 0 : index
    %c0_46 = arith.constant 0 : index
    %37 = vector.load %arg2[%c4, %c0_45, %c0_46] : memref<9x16x8xbf16, #tpu.memory_space<vmem>>, vector<1x16x8xbf16>
    %38 = vector.shape_cast %37 : vector<1x16x8xbf16> to vector<16x8xbf16>
    %cst_47 = arith.constant dense<0.000000e+00> : vector<100x8xf32>
    %39 = tpu.matmul %36, %38, %cst_47 {dimension_numbers = #tpu.dot_dimension_numbers<[1], [0], [0], [1], [0, 0, 1, 1], [], []>} : vector<100x16xbf16>, vector<16x8xbf16>, vector<100x8xf32> -> vector<100x8xf32>
    %40 = arith.addf %34, %39 : vector<100x8xf32>
    %c0_48 = arith.constant 0 : index
    %c0_49 = arith.constant 0 : index
    %41 = vector.load %arg6[%c0_48, %c0_49] : memref<100x8xf32, #tpu.memory_space<vmem>>, vector<100x8xf32>
    tpu.vector_store %arg6[%c0_48, %c0_49], %40 {strides = array<i32>} : memref<100x8xf32, #tpu.memory_space<vmem>>, vector<100x8xf32>,
    %c0_50 = arith.constant 0 : index
    %c0_51 = arith.constant 0 : index
    %42 = vector.load %arg6[%c0_50, %c0_51] : memref<100x8xf32, #tpu.memory_space<vmem>>, vector<100x8xf32>
    %c0_52 = arith.constant 0 : index
    %c12 = arith.constant 12 : index
    %c0_53 = arith.constant 0 : index
    %43 = vector.load %arg1[%c0_52, %c12, %c0_53] : memref<1x122x16xbf16, #tpu.memory_space<vmem>>, vector<1x100x16xbf16>
    %44 = vector.shape_cast %43 : vector<1x100x16xbf16> to vector<100x16xbf16>
    %c5 = arith.constant 5 : index
    %c0_54 = arith.constant 0 : index
    %c0_55 = arith.constant 0 : index
    %45 = vector.load %arg2[%c5, %c0_54, %c0_55] : memref<9x16x8xbf16, #tpu.memory_space<vmem>>, vector<1x16x8xbf16>
    %46 = vector.shape_cast %45 : vector<1x16x8xbf16> to vector<16x8xbf16>
    %cst_56 = arith.constant dense<0.000000e+00> : vector<100x8xf32>
    %47 = tpu.matmul %44, %46, %cst_56 {dimension_numbers = #tpu.dot_dimension_numbers<[1], [0], [0], [1], [0, 0, 1, 1], [], []>} : vector<100x16xbf16>, vector<16x8xbf16>, vector<100x8xf32> -> vector<100x8xf32>
    %48 = arith.addf %42, %47 : vector<100x8xf32>
    %c0_57 = arith.constant 0 : index
    %c0_58 = arith.constant 0 : index
    %49 = vector.load %arg6[%c0_57, %c0_58] : memref<100x8xf32, #tpu.memory_space<vmem>>, vector<100x8xf32>
    tpu.vector_store %arg6[%c0_57, %c0_58], %48 {strides = array<i32>} : memref<100x8xf32, #tpu.memory_space<vmem>>, vector<100x8xf32>,
    %c0_59 = arith.constant 0 : index
    %c0_60 = arith.constant 0 : index
    %50 = vector.load %arg6[%c0_59, %c0_60] : memref<100x8xf32, #tpu.memory_space<vmem>>, vector<100x8xf32>
    %c0_61 = arith.constant 0 : index
    %c20 = arith.constant 20 : index
    %c0_62 = arith.constant 0 : index
    %51 = vector.load %arg1[%c0_61, %c20, %c0_62] : memref<1x122x16xbf16, #tpu.memory_space<vmem>>, vector<1x100x16xbf16>
    %52 = vector.shape_cast %51 : vector<1x100x16xbf16> to vector<100x16xbf16>
    %c6 = arith.constant 6 : index
    %c0_63 = arith.constant 0 : index
    %c0_64 = arith.constant 0 : index
    %53 = vector.load %arg2[%c6, %c0_63, %c0_64] : memref<9x16x8xbf16, #tpu.memory_space<vmem>>, vector<1x16x8xbf16>
    %54 = vector.shape_cast %53 : vector<1x16x8xbf16> to vector<16x8xbf16>
    %cst_65 = arith.constant dense<0.000000e+00> : vector<100x8xf32>
    %55 = tpu.matmul %52, %54, %cst_65 {dimension_numbers = #tpu.dot_dimension_numbers<[1], [0], [0], [1], [0, 0, 1, 1], [], []>} : vector<100x16xbf16>, vector<16x8xbf16>, vector<100x8xf32> -> vector<100x8xf32>
    %56 = arith.addf %50, %55 : vector<100x8xf32>
    %c0_66 = arith.constant 0 : index
    %c0_67 = arith.constant 0 : index
    %57 = vector.load %arg6[%c0_66, %c0_67] : memref<100x8xf32, #tpu.memory_space<vmem>>, vector<100x8xf32>
    tpu.vector_store %arg6[%c0_66, %c0_67], %56 {strides = array<i32>} : memref<100x8xf32, #tpu.memory_space<vmem>>, vector<100x8xf32>,
    %c0_68 = arith.constant 0 : index
    %c0_69 = arith.constant 0 : index
    %58 = vector.load %arg6[%c0_68, %c0_69] : memref<100x8xf32, #tpu.memory_space<vmem>>, vector<100x8xf32>
    %c0_70 = arith.constant 0 : index
    %c21 = arith.constant 21 : index
    %c0_71 = arith.constant 0 : index
    %59 = vector.load %arg1[%c0_70, %c21, %c0_71] : memref<1x122x16xbf16, #tpu.memory_space<vmem>>, vector<1x100x16xbf16>
    %60 = vector.shape_cast %59 : vector<1x100x16xbf16> to vector<100x16xbf16>
    %c7 = arith.constant 7 : index
    %c0_72 = arith.constant 0 : index
    %c0_73 = arith.constant 0 : index
    %61 = vector.load %arg2[%c7, %c0_72, %c0_73] : memref<9x16x8xbf16, #tpu.memory_space<vmem>>, vector<1x16x8xbf16>
    %62 = vector.shape_cast %61 : vector<1x16x8xbf16> to vector<16x8xbf16>
    %cst_74 = arith.constant dense<0.000000e+00> : vector<100x8xf32>
    %63 = tpu.matmul %60, %62, %cst_74 {dimension_numbers = #tpu.dot_dimension_numbers<[1], [0], [0], [1], [0, 0, 1, 1], [], []>} : vector<100x16xbf16>, vector<16x8xbf16>, vector<100x8xf32> -> vector<100x8xf32>
    %64 = arith.addf %58, %63 : vector<100x8xf32>
    %c0_75 = arith.constant 0 : index
    %c0_76 = arith.constant 0 : index
    %65 = vector.load %arg6[%c0_75, %c0_76] : memref<100x8xf32, #tpu.memory_space<vmem>>, vector<100x8xf32>
    tpu.vector_store %arg6[%c0_75, %c0_76], %64 {strides = array<i32>} : memref<100x8xf32, #tpu.memory_space<vmem>>, vector<100x8xf32>,
    %c0_77 = arith.constant 0 : index
    %c0_78 = arith.constant 0 : index
    %66 = vector.load %arg6[%c0_77, %c0_78] : memref<100x8xf32, #tpu.memory_space<vmem>>, vector<100x8xf32>
    %c0_79 = arith.constant 0 : index
    %c22 = arith.constant 22 : index
    %c0_80 = arith.constant 0 : index
    %67 = vector.load %arg1[%c0_79, %c22, %c0_80] : memref<1x122x16xbf16, #tpu.memory_space<vmem>>, vector<1x100x16xbf16>
    %68 = vector.shape_cast %67 : vector<1x100x16xbf16> to vector<100x16xbf16>
    %c8 = arith.constant 8 : index
    %c0_81 = arith.constant 0 : index
    %c0_82 = arith.constant 0 : index
    %69 = vector.load %arg2[%c8, %c0_81, %c0_82] : memref<9x16x8xbf16, #tpu.memory_space<vmem>>, vector<1x16x8xbf16>
    %70 = vector.shape_cast %69 : vector<1x16x8xbf16> to vector<16x8xbf16>
    %cst_83 = arith.constant dense<0.000000e+00> : vector<100x8xf32>
    %71 = tpu.matmul %68, %70, %cst_83 {dimension_numbers = #tpu.dot_dimension_numbers<[1], [0], [0], [1], [0, 0, 1, 1], [], []>} : vector<100x16xbf16>, vector<16x8xbf16>, vector<100x8xf32> -> vector<100x8xf32>
    %72 = arith.addf %66, %71 : vector<100x8xf32>
    %c0_84 = arith.constant 0 : index
    %c0_85 = arith.constant 0 : index
    %73 = vector.load %arg6[%c0_84, %c0_85] : memref<100x8xf32, #tpu.memory_space<vmem>>, vector<100x8xf32>
    tpu.vector_store %arg6[%c0_84, %c0_85], %72 {strides = array<i32>} : memref<100x8xf32, #tpu.memory_space<vmem>>, vector<100x8xf32>,
    %c0_86 = arith.constant 0 : index
    %c0_87 = arith.constant 0 : index
    %74 = vector.load %arg6[%c0_86, %c0_87] : memref<100x8xf32, #tpu.memory_space<vmem>>, vector<100x8xf32>
    %c0_88 = arith.constant 0 : index
    %c0_89 = arith.constant 0 : index
    %75 = vector.load %arg3[%c0_88, %c0_89] : memref<1x8xf32, #tpu.memory_space<vmem>>, vector<1x8xf32>
    %76 = vector.broadcast %75 : vector<1x8xf32> to vector<100x8xf32>
    %77 = arith.addf %74, %76 : vector<100x8xf32>
    %cst_90 = arith.constant 0.000000e+00 : f32
    %78 = vector.broadcast %cst_90 : f32 to vector<100x8xf32>
    %79 = arith.cmpf oge, %77, %78 : vector<100x8xf32>
    %c0_91 = arith.constant 0 : index
    %c0_92 = arith.constant 0 : index
    %80 = vector.load %arg4[%c0_91, %c0_92] : memref<1x8xf32, #tpu.memory_space<vmem>>, vector<1x8xf32>
    %81 = vector.broadcast %80 : vector<1x8xf32> to vector<100x8xf32>
    %82 = arith.mulf %81, %77 : vector<100x8xf32>
    %83 = arith.select %79, %77, %82 : vector<100x8xi1>, vector<100x8xf32>
    %84 = arith.truncf %83 : vector<100x8xf32> to vector<100x8xbf16>
    %c0_93 = arith.constant 0 : index
    %c0_94 = arith.constant 0 : index
    %c0_95 = arith.constant 0 : index
    %85 = vector.load %arg5[%c0_93, %c0_94, %c0_95] : memref<1x100x8xbf16, #tpu.memory_space<vmem>>, vector<1x100x8xbf16>
    %86 = vector.shape_cast %85 : vector<1x100x8xbf16> to vector<100x8xbf16>
    %87 = vector.shape_cast %84 : vector<100x8xbf16> to vector<1x100x8xbf16>
    tpu.vector_store %arg5[%c0_93, %c0_94, %c0_95], %87 {strides = array<i32>} : memref<1x100x8xbf16, #tpu.memory_space<vmem>>, vector<1x100x8xbf16>,
    return
  }
  func.func @transform_0(%arg0: i32) -> (i32, i32, i32) {
    %c0_i32 = arith.constant 0 : i32
    %c0_i32_0 = arith.constant 0 : i32
    %c0_i32_1 = arith.constant 0 : i32
    return %arg0, %c0_i32, %c0_i32_0 : i32, i32, i32
  }
  func.func @transform_1(%arg0: i32) -> (i32, i32, i32) {
    %c0_i32 = arith.constant 0 : i32
    %c0_i32_0 = arith.constant 0 : i32
    %c0_i32_1 = arith.constant 0 : i32
    %c0_i32_2 = arith.constant 0 : i32
    return %c0_i32, %c0_i32_0, %c0_i32_1 : i32, i32, i32
  }
  func.func @transform_2(%arg0: i32) -> (i32, i32) {
    %c0_i32 = arith.constant 0 : i32
    %c0_i32_0 = arith.constant 0 : i32
    %c0_i32_1 = arith.constant 0 : i32
    return %c0_i32, %c0_i32_0 : i32, i32
  }
  func.func @transform_3(%arg0: i32) -> (i32, i32) {
    %c0_i32 = arith.constant 0 : i32
    %c0_i32_0 = arith.constant 0 : i32
    %c0_i32_1 = arith.constant 0 : i32
    return %c0_i32, %c0_i32_0 : i32, i32
  }
  func.func @transform_4(%arg0: i32) -> (i32, i32, i32) {
    %c0_i32 = arith.constant 0 : i32
    %c0_i32_0 = arith.constant 0 : i32
    %c0_i32_1 = arith.constant 0 : i32
    return %arg0, %c0_i32, %c0_i32_0 : i32, i32, i32
  }
}

module attributes {stable_mosaic.version = 11 : i64} {
  func.func @_conv_tap_kernel(%arg0: i32, %arg1: memref<1x16x32xbf16, #tpu.memory_space<vmem>>, %arg2: memref<1x32x32xbf16, #tpu.memory_space<vmem>>, %arg3: memref<1x32xf32, #tpu.memory_space<vmem>>, %arg4: memref<1x32xf32, #tpu.memory_space<vmem>>, %arg5: memref<1x16x32xbf16, #tpu.memory_space<vmem>>, %arg6: memref<16x32xf32, #tpu.memory_space<vmem>>) attributes {dimension_semantics = [#tpu.dimension_semantics<parallel>], iteration_bounds = array<i64: 2>, scalar_prefetch = 0 : i64, scratch_operands = 1 : i64, tpu.core_type = #tpu.core_type<tc>, window_params = [{transform_indices = @transform_0, window_bounds = array<i64: 1, 16, 32>}, {pipeline_mode = #tpu.pipeline_mode<synchronous>, transform_indices = @transform_1, window_bounds = array<i64: 1, 32, 32>}, {pipeline_mode = #tpu.pipeline_mode<synchronous>, transform_indices = @transform_2, window_bounds = array<i64: 1, 32>}, {pipeline_mode = #tpu.pipeline_mode<synchronous>, transform_indices = @transform_3, window_bounds = array<i64: 1, 32>}, {transform_indices = @transform_4, window_bounds = array<i64: 1, 16, 32>}]} {
    %cst = arith.constant 0.000000e+00 : f32
    %0 = vector.broadcast %cst : f32 to vector<16x32xf32>
    %c0 = arith.constant 0 : index
    %c0_0 = arith.constant 0 : index
    %1 = vector.load %arg6[%c0, %c0_0] : memref<16x32xf32, #tpu.memory_space<vmem>>, vector<16x32xf32>
    tpu.vector_store %arg6[%c0, %c0_0], %0 {strides = array<i32>} : memref<16x32xf32, #tpu.memory_space<vmem>>, vector<16x32xf32>,
    %c0_1 = arith.constant 0 : index
    %c0_2 = arith.constant 0 : index
    %2 = vector.load %arg6[%c0_1, %c0_2] : memref<16x32xf32, #tpu.memory_space<vmem>>, vector<16x32xf32>
    %c0_3 = arith.constant 0 : index
    %c0_4 = arith.constant 0 : index
    %c0_5 = arith.constant 0 : index
    %3 = vector.load %arg1[%c0_3, %c0_4, %c0_5] : memref<1x16x32xbf16, #tpu.memory_space<vmem>>, vector<1x16x32xbf16>
    %4 = vector.shape_cast %3 : vector<1x16x32xbf16> to vector<16x32xbf16>
    %c0_6 = arith.constant 0 : index
    %c0_7 = arith.constant 0 : index
    %c0_8 = arith.constant 0 : index
    %5 = vector.load %arg2[%c0_6, %c0_7, %c0_8] : memref<1x32x32xbf16, #tpu.memory_space<vmem>>, vector<1x32x32xbf16>
    %6 = vector.shape_cast %5 : vector<1x32x32xbf16> to vector<32x32xbf16>
    %cst_9 = arith.constant dense<0.000000e+00> : vector<16x32xf32>
    %7 = tpu.matmul %4, %6, %cst_9 {dimension_numbers = #tpu.dot_dimension_numbers<[1], [0], [0], [1], [0, 0, 1, 1], [], []>} : vector<16x32xbf16>, vector<32x32xbf16>, vector<16x32xf32> -> vector<16x32xf32>
    %8 = arith.addf %2, %7 : vector<16x32xf32>
    %c0_10 = arith.constant 0 : index
    %c0_11 = arith.constant 0 : index
    %9 = vector.load %arg6[%c0_10, %c0_11] : memref<16x32xf32, #tpu.memory_space<vmem>>, vector<16x32xf32>
    tpu.vector_store %arg6[%c0_10, %c0_11], %8 {strides = array<i32>} : memref<16x32xf32, #tpu.memory_space<vmem>>, vector<16x32xf32>,
    %c0_12 = arith.constant 0 : index
    %c0_13 = arith.constant 0 : index
    %10 = vector.load %arg6[%c0_12, %c0_13] : memref<16x32xf32, #tpu.memory_space<vmem>>, vector<16x32xf32>
    %c0_14 = arith.constant 0 : index
    %c0_15 = arith.constant 0 : index
    %11 = vector.load %arg3[%c0_14, %c0_15] : memref<1x32xf32, #tpu.memory_space<vmem>>, vector<1x32xf32>
    %12 = vector.broadcast %11 : vector<1x32xf32> to vector<16x32xf32>
    %13 = arith.addf %10, %12 : vector<16x32xf32>
    %cst_16 = arith.constant 0.000000e+00 : f32
    %14 = vector.broadcast %cst_16 : f32 to vector<16x32xf32>
    %15 = arith.cmpf oge, %13, %14 : vector<16x32xf32>
    %c0_17 = arith.constant 0 : index
    %c0_18 = arith.constant 0 : index
    %16 = vector.load %arg4[%c0_17, %c0_18] : memref<1x32xf32, #tpu.memory_space<vmem>>, vector<1x32xf32>
    %17 = vector.broadcast %16 : vector<1x32xf32> to vector<16x32xf32>
    %18 = arith.mulf %17, %13 : vector<16x32xf32>
    %19 = arith.select %15, %13, %18 : vector<16x32xi1>, vector<16x32xf32>
    %20 = arith.truncf %19 : vector<16x32xf32> to vector<16x32xbf16>
    %c0_19 = arith.constant 0 : index
    %c0_20 = arith.constant 0 : index
    %c0_21 = arith.constant 0 : index
    %21 = vector.load %arg5[%c0_19, %c0_20, %c0_21] : memref<1x16x32xbf16, #tpu.memory_space<vmem>>, vector<1x16x32xbf16>
    %22 = vector.shape_cast %21 : vector<1x16x32xbf16> to vector<16x32xbf16>
    %23 = vector.shape_cast %20 : vector<16x32xbf16> to vector<1x16x32xbf16>
    tpu.vector_store %arg5[%c0_19, %c0_20, %c0_21], %23 {strides = array<i32>} : memref<1x16x32xbf16, #tpu.memory_space<vmem>>, vector<1x16x32xbf16>,
    return
  }
  func.func @transform_0(%arg0: i32) -> (i32, i32, i32) {
    %c0_i32 = arith.constant 0 : i32
    %c0_i32_0 = arith.constant 0 : i32
    %c0_i32_1 = arith.constant 0 : i32
    return %arg0, %c0_i32, %c0_i32_0 : i32, i32, i32
  }
  func.func @transform_1(%arg0: i32) -> (i32, i32, i32) {
    %c0_i32 = arith.constant 0 : i32
    %c0_i32_0 = arith.constant 0 : i32
    %c0_i32_1 = arith.constant 0 : i32
    %c0_i32_2 = arith.constant 0 : i32
    return %c0_i32, %c0_i32_0, %c0_i32_1 : i32, i32, i32
  }
  func.func @transform_2(%arg0: i32) -> (i32, i32) {
    %c0_i32 = arith.constant 0 : i32
    %c0_i32_0 = arith.constant 0 : i32
    %c0_i32_1 = arith.constant 0 : i32
    return %c0_i32, %c0_i32_0 : i32, i32
  }
  func.func @transform_3(%arg0: i32) -> (i32, i32) {
    %c0_i32 = arith.constant 0 : i32
    %c0_i32_0 = arith.constant 0 : i32
    %c0_i32_1 = arith.constant 0 : i32
    return %c0_i32, %c0_i32_0 : i32, i32
  }
  func.func @transform_4(%arg0: i32) -> (i32, i32, i32) {
    %c0_i32 = arith.constant 0 : i32
    %c0_i32_0 = arith.constant 0 : i32
    %c0_i32_1 = arith.constant 0 : i32
    return %arg0, %c0_i32, %c0_i32_0 : i32, i32, i32
  }
}

module attributes {stable_mosaic.version = 11 : i64} {
  func.func @_conv_tap_kernel(%arg0: i32, %arg1: memref<1x50x16xbf16, #tpu.memory_space<vmem>>, %arg2: memref<9x16x16xbf16, #tpu.memory_space<vmem>>, %arg3: memref<1x16xf32, #tpu.memory_space<vmem>>, %arg4: memref<1x16xf32, #tpu.memory_space<vmem>>, %arg5: memref<1x36x16xbf16, #tpu.memory_space<vmem>>, %arg6: memref<1x36x16xbf16, #tpu.memory_space<vmem>>, %arg7: memref<36x16xf32, #tpu.memory_space<vmem>>) attributes {dimension_semantics = [#tpu.dimension_semantics<parallel>], iteration_bounds = array<i64: 2>, scalar_prefetch = 0 : i64, scratch_operands = 1 : i64, tpu.core_type = #tpu.core_type<tc>, window_params = [{transform_indices = @transform_0, window_bounds = array<i64: 1, 50, 16>}, {pipeline_mode = #tpu.pipeline_mode<synchronous>, transform_indices = @transform_1, window_bounds = array<i64: 9, 16, 16>}, {pipeline_mode = #tpu.pipeline_mode<synchronous>, transform_indices = @transform_2, window_bounds = array<i64: 1, 16>}, {pipeline_mode = #tpu.pipeline_mode<synchronous>, transform_indices = @transform_3, window_bounds = array<i64: 1, 16>}, {transform_indices = @transform_4, window_bounds = array<i64: 1, 36, 16>}, {transform_indices = @transform_5, window_bounds = array<i64: 1, 36, 16>}]} {
    %cst = arith.constant 0.000000e+00 : f32
    %0 = vector.broadcast %cst : f32 to vector<36x16xf32>
    %c0 = arith.constant 0 : index
    %c0_0 = arith.constant 0 : index
    %1 = vector.load %arg7[%c0, %c0_0] : memref<36x16xf32, #tpu.memory_space<vmem>>, vector<36x16xf32>
    tpu.vector_store %arg7[%c0, %c0_0], %0 {strides = array<i32>} : memref<36x16xf32, #tpu.memory_space<vmem>>, vector<36x16xf32>,
    %c0_1 = arith.constant 0 : index
    %c0_2 = arith.constant 0 : index
    %2 = vector.load %arg7[%c0_1, %c0_2] : memref<36x16xf32, #tpu.memory_space<vmem>>, vector<36x16xf32>
    %c0_3 = arith.constant 0 : index
    %c0_4 = arith.constant 0 : index
    %c0_5 = arith.constant 0 : index
    %3 = vector.load %arg1[%c0_3, %c0_4, %c0_5] : memref<1x50x16xbf16, #tpu.memory_space<vmem>>, vector<1x36x16xbf16>
    %4 = vector.shape_cast %3 : vector<1x36x16xbf16> to vector<36x16xbf16>
    %c0_6 = arith.constant 0 : index
    %c0_7 = arith.constant 0 : index
    %c0_8 = arith.constant 0 : index
    %5 = vector.load %arg2[%c0_6, %c0_7, %c0_8] : memref<9x16x16xbf16, #tpu.memory_space<vmem>>, vector<1x16x16xbf16>
    %6 = vector.shape_cast %5 : vector<1x16x16xbf16> to vector<16x16xbf16>
    %cst_9 = arith.constant dense<0.000000e+00> : vector<36x16xf32>
    %7 = tpu.matmul %4, %6, %cst_9 {dimension_numbers = #tpu.dot_dimension_numbers<[1], [0], [0], [1], [0, 0, 1, 1], [], []>} : vector<36x16xbf16>, vector<16x16xbf16>, vector<36x16xf32> -> vector<36x16xf32>
    %8 = arith.addf %2, %7 : vector<36x16xf32>
    %c0_10 = arith.constant 0 : index
    %c0_11 = arith.constant 0 : index
    %9 = vector.load %arg7[%c0_10, %c0_11] : memref<36x16xf32, #tpu.memory_space<vmem>>, vector<36x16xf32>
    tpu.vector_store %arg7[%c0_10, %c0_11], %8 {strides = array<i32>} : memref<36x16xf32, #tpu.memory_space<vmem>>, vector<36x16xf32>,
    %c0_12 = arith.constant 0 : index
    %c0_13 = arith.constant 0 : index
    %10 = vector.load %arg7[%c0_12, %c0_13] : memref<36x16xf32, #tpu.memory_space<vmem>>, vector<36x16xf32>
    %c0_14 = arith.constant 0 : index
    %c1 = arith.constant 1 : index
    %c0_15 = arith.constant 0 : index
    %11 = vector.load %arg1[%c0_14, %c1, %c0_15] : memref<1x50x16xbf16, #tpu.memory_space<vmem>>, vector<1x36x16xbf16>
    %12 = vector.shape_cast %11 : vector<1x36x16xbf16> to vector<36x16xbf16>
    %c1_16 = arith.constant 1 : index
    %c0_17 = arith.constant 0 : index
    %c0_18 = arith.constant 0 : index
    %13 = vector.load %arg2[%c1_16, %c0_17, %c0_18] : memref<9x16x16xbf16, #tpu.memory_space<vmem>>, vector<1x16x16xbf16>
    %14 = vector.shape_cast %13 : vector<1x16x16xbf16> to vector<16x16xbf16>
    %cst_19 = arith.constant dense<0.000000e+00> : vector<36x16xf32>
    %15 = tpu.matmul %12, %14, %cst_19 {dimension_numbers = #tpu.dot_dimension_numbers<[1], [0], [0], [1], [0, 0, 1, 1], [], []>} : vector<36x16xbf16>, vector<16x16xbf16>, vector<36x16xf32> -> vector<36x16xf32>
    %16 = arith.addf %10, %15 : vector<36x16xf32>
    %c0_20 = arith.constant 0 : index
    %c0_21 = arith.constant 0 : index
    %17 = vector.load %arg7[%c0_20, %c0_21] : memref<36x16xf32, #tpu.memory_space<vmem>>, vector<36x16xf32>
    tpu.vector_store %arg7[%c0_20, %c0_21], %16 {strides = array<i32>} : memref<36x16xf32, #tpu.memory_space<vmem>>, vector<36x16xf32>,
    %c0_22 = arith.constant 0 : index
    %c0_23 = arith.constant 0 : index
    %18 = vector.load %arg7[%c0_22, %c0_23] : memref<36x16xf32, #tpu.memory_space<vmem>>, vector<36x16xf32>
    %c0_24 = arith.constant 0 : index
    %c2 = arith.constant 2 : index
    %c0_25 = arith.constant 0 : index
    %19 = vector.load %arg1[%c0_24, %c2, %c0_25] : memref<1x50x16xbf16, #tpu.memory_space<vmem>>, vector<1x36x16xbf16>
    %20 = vector.shape_cast %19 : vector<1x36x16xbf16> to vector<36x16xbf16>
    %c2_26 = arith.constant 2 : index
    %c0_27 = arith.constant 0 : index
    %c0_28 = arith.constant 0 : index
    %21 = vector.load %arg2[%c2_26, %c0_27, %c0_28] : memref<9x16x16xbf16, #tpu.memory_space<vmem>>, vector<1x16x16xbf16>
    %22 = vector.shape_cast %21 : vector<1x16x16xbf16> to vector<16x16xbf16>
    %cst_29 = arith.constant dense<0.000000e+00> : vector<36x16xf32>
    %23 = tpu.matmul %20, %22, %cst_29 {dimension_numbers = #tpu.dot_dimension_numbers<[1], [0], [0], [1], [0, 0, 1, 1], [], []>} : vector<36x16xbf16>, vector<16x16xbf16>, vector<36x16xf32> -> vector<36x16xf32>
    %24 = arith.addf %18, %23 : vector<36x16xf32>
    %c0_30 = arith.constant 0 : index
    %c0_31 = arith.constant 0 : index
    %25 = vector.load %arg7[%c0_30, %c0_31] : memref<36x16xf32, #tpu.memory_space<vmem>>, vector<36x16xf32>
    tpu.vector_store %arg7[%c0_30, %c0_31], %24 {strides = array<i32>} : memref<36x16xf32, #tpu.memory_space<vmem>>, vector<36x16xf32>,
    %c0_32 = arith.constant 0 : index
    %c0_33 = arith.constant 0 : index
    %26 = vector.load %arg7[%c0_32, %c0_33] : memref<36x16xf32, #tpu.memory_space<vmem>>, vector<36x16xf32>
    %c0_34 = arith.constant 0 : index
    %c6 = arith.constant 6 : index
    %c0_35 = arith.constant 0 : index
    %27 = vector.load %arg1[%c0_34, %c6, %c0_35] : memref<1x50x16xbf16, #tpu.memory_space<vmem>>, vector<1x36x16xbf16>
    %28 = vector.shape_cast %27 : vector<1x36x16xbf16> to vector<36x16xbf16>
    %c3 = arith.constant 3 : index
    %c0_36 = arith.constant 0 : index
    %c0_37 = arith.constant 0 : index
    %29 = vector.load %arg2[%c3, %c0_36, %c0_37] : memref<9x16x16xbf16, #tpu.memory_space<vmem>>, vector<1x16x16xbf16>
    %30 = vector.shape_cast %29 : vector<1x16x16xbf16> to vector<16x16xbf16>
    %cst_38 = arith.constant dense<0.000000e+00> : vector<36x16xf32>
    %31 = tpu.matmul %28, %30, %cst_38 {dimension_numbers = #tpu.dot_dimension_numbers<[1], [0], [0], [1], [0, 0, 1, 1], [], []>} : vector<36x16xbf16>, vector<16x16xbf16>, vector<36x16xf32> -> vector<36x16xf32>
    %32 = arith.addf %26, %31 : vector<36x16xf32>
    %c0_39 = arith.constant 0 : index
    %c0_40 = arith.constant 0 : index
    %33 = vector.load %arg7[%c0_39, %c0_40] : memref<36x16xf32, #tpu.memory_space<vmem>>, vector<36x16xf32>
    tpu.vector_store %arg7[%c0_39, %c0_40], %32 {strides = array<i32>} : memref<36x16xf32, #tpu.memory_space<vmem>>, vector<36x16xf32>,
    %c0_41 = arith.constant 0 : index
    %c0_42 = arith.constant 0 : index
    %34 = vector.load %arg7[%c0_41, %c0_42] : memref<36x16xf32, #tpu.memory_space<vmem>>, vector<36x16xf32>
    %c0_43 = arith.constant 0 : index
    %c7 = arith.constant 7 : index
    %c0_44 = arith.constant 0 : index
    %35 = vector.load %arg1[%c0_43, %c7, %c0_44] : memref<1x50x16xbf16, #tpu.memory_space<vmem>>, vector<1x36x16xbf16>
    %36 = vector.shape_cast %35 : vector<1x36x16xbf16> to vector<36x16xbf16>
    %c4 = arith.constant 4 : index
    %c0_45 = arith.constant 0 : index
    %c0_46 = arith.constant 0 : index
    %37 = vector.load %arg2[%c4, %c0_45, %c0_46] : memref<9x16x16xbf16, #tpu.memory_space<vmem>>, vector<1x16x16xbf16>
    %38 = vector.shape_cast %37 : vector<1x16x16xbf16> to vector<16x16xbf16>
    %cst_47 = arith.constant dense<0.000000e+00> : vector<36x16xf32>
    %39 = tpu.matmul %36, %38, %cst_47 {dimension_numbers = #tpu.dot_dimension_numbers<[1], [0], [0], [1], [0, 0, 1, 1], [], []>} : vector<36x16xbf16>, vector<16x16xbf16>, vector<36x16xf32> -> vector<36x16xf32>
    %40 = arith.addf %34, %39 : vector<36x16xf32>
    %c0_48 = arith.constant 0 : index
    %c0_49 = arith.constant 0 : index
    %41 = vector.load %arg7[%c0_48, %c0_49] : memref<36x16xf32, #tpu.memory_space<vmem>>, vector<36x16xf32>
    tpu.vector_store %arg7[%c0_48, %c0_49], %40 {strides = array<i32>} : memref<36x16xf32, #tpu.memory_space<vmem>>, vector<36x16xf32>,
    %c0_50 = arith.constant 0 : index
    %c0_51 = arith.constant 0 : index
    %42 = vector.load %arg7[%c0_50, %c0_51] : memref<36x16xf32, #tpu.memory_space<vmem>>, vector<36x16xf32>
    %c0_52 = arith.constant 0 : index
    %c8 = arith.constant 8 : index
    %c0_53 = arith.constant 0 : index
    %43 = vector.load %arg1[%c0_52, %c8, %c0_53] : memref<1x50x16xbf16, #tpu.memory_space<vmem>>, vector<1x36x16xbf16>
    %44 = vector.shape_cast %43 : vector<1x36x16xbf16> to vector<36x16xbf16>
    %c5 = arith.constant 5 : index
    %c0_54 = arith.constant 0 : index
    %c0_55 = arith.constant 0 : index
    %45 = vector.load %arg2[%c5, %c0_54, %c0_55] : memref<9x16x16xbf16, #tpu.memory_space<vmem>>, vector<1x16x16xbf16>
    %46 = vector.shape_cast %45 : vector<1x16x16xbf16> to vector<16x16xbf16>
    %cst_56 = arith.constant dense<0.000000e+00> : vector<36x16xf32>
    %47 = tpu.matmul %44, %46, %cst_56 {dimension_numbers = #tpu.dot_dimension_numbers<[1], [0], [0], [1], [0, 0, 1, 1], [], []>} : vector<36x16xbf16>, vector<16x16xbf16>, vector<36x16xf32> -> vector<36x16xf32>
    %48 = arith.addf %42, %47 : vector<36x16xf32>
    %c0_57 = arith.constant 0 : index
    %c0_58 = arith.constant 0 : index
    %49 = vector.load %arg7[%c0_57, %c0_58] : memref<36x16xf32, #tpu.memory_space<vmem>>, vector<36x16xf32>
    tpu.vector_store %arg7[%c0_57, %c0_58], %48 {strides = array<i32>} : memref<36x16xf32, #tpu.memory_space<vmem>>, vector<36x16xf32>,
    %c0_59 = arith.constant 0 : index
    %c0_60 = arith.constant 0 : index
    %50 = vector.load %arg7[%c0_59, %c0_60] : memref<36x16xf32, #tpu.memory_space<vmem>>, vector<36x16xf32>
    %c0_61 = arith.constant 0 : index
    %c12 = arith.constant 12 : index
    %c0_62 = arith.constant 0 : index
    %51 = vector.load %arg1[%c0_61, %c12, %c0_62] : memref<1x50x16xbf16, #tpu.memory_space<vmem>>, vector<1x36x16xbf16>
    %52 = vector.shape_cast %51 : vector<1x36x16xbf16> to vector<36x16xbf16>
    %c6_63 = arith.constant 6 : index
    %c0_64 = arith.constant 0 : index
    %c0_65 = arith.constant 0 : index
    %53 = vector.load %arg2[%c6_63, %c0_64, %c0_65] : memref<9x16x16xbf16, #tpu.memory_space<vmem>>, vector<1x16x16xbf16>
    %54 = vector.shape_cast %53 : vector<1x16x16xbf16> to vector<16x16xbf16>
    %cst_66 = arith.constant dense<0.000000e+00> : vector<36x16xf32>
    %55 = tpu.matmul %52, %54, %cst_66 {dimension_numbers = #tpu.dot_dimension_numbers<[1], [0], [0], [1], [0, 0, 1, 1], [], []>} : vector<36x16xbf16>, vector<16x16xbf16>, vector<36x16xf32> -> vector<36x16xf32>
    %56 = arith.addf %50, %55 : vector<36x16xf32>
    %c0_67 = arith.constant 0 : index
    %c0_68 = arith.constant 0 : index
    %57 = vector.load %arg7[%c0_67, %c0_68] : memref<36x16xf32, #tpu.memory_space<vmem>>, vector<36x16xf32>
    tpu.vector_store %arg7[%c0_67, %c0_68], %56 {strides = array<i32>} : memref<36x16xf32, #tpu.memory_space<vmem>>, vector<36x16xf32>,
    %c0_69 = arith.constant 0 : index
    %c0_70 = arith.constant 0 : index
    %58 = vector.load %arg7[%c0_69, %c0_70] : memref<36x16xf32, #tpu.memory_space<vmem>>, vector<36x16xf32>
    %c0_71 = arith.constant 0 : index
    %c13 = arith.constant 13 : index
    %c0_72 = arith.constant 0 : index
    %59 = vector.load %arg1[%c0_71, %c13, %c0_72] : memref<1x50x16xbf16, #tpu.memory_space<vmem>>, vector<1x36x16xbf16>
    %60 = vector.shape_cast %59 : vector<1x36x16xbf16> to vector<36x16xbf16>
    %c7_73 = arith.constant 7 : index
    %c0_74 = arith.constant 0 : index
    %c0_75 = arith.constant 0 : index
    %61 = vector.load %arg2[%c7_73, %c0_74, %c0_75] : memref<9x16x16xbf16, #tpu.memory_space<vmem>>, vector<1x16x16xbf16>
    %62 = vector.shape_cast %61 : vector<1x16x16xbf16> to vector<16x16xbf16>
    %cst_76 = arith.constant dense<0.000000e+00> : vector<36x16xf32>
    %63 = tpu.matmul %60, %62, %cst_76 {dimension_numbers = #tpu.dot_dimension_numbers<[1], [0], [0], [1], [0, 0, 1, 1], [], []>} : vector<36x16xbf16>, vector<16x16xbf16>, vector<36x16xf32> -> vector<36x16xf32>
    %64 = arith.addf %58, %63 : vector<36x16xf32>
    %c0_77 = arith.constant 0 : index
    %c0_78 = arith.constant 0 : index
    %65 = vector.load %arg7[%c0_77, %c0_78] : memref<36x16xf32, #tpu.memory_space<vmem>>, vector<36x16xf32>
    tpu.vector_store %arg7[%c0_77, %c0_78], %64 {strides = array<i32>} : memref<36x16xf32, #tpu.memory_space<vmem>>, vector<36x16xf32>,
    %c0_79 = arith.constant 0 : index
    %c0_80 = arith.constant 0 : index
    %66 = vector.load %arg7[%c0_79, %c0_80] : memref<36x16xf32, #tpu.memory_space<vmem>>, vector<36x16xf32>
    %c0_81 = arith.constant 0 : index
    %c14 = arith.constant 14 : index
    %c0_82 = arith.constant 0 : index
    %67 = vector.load %arg1[%c0_81, %c14, %c0_82] : memref<1x50x16xbf16, #tpu.memory_space<vmem>>, vector<1x36x16xbf16>
    %68 = vector.shape_cast %67 : vector<1x36x16xbf16> to vector<36x16xbf16>
    %c8_83 = arith.constant 8 : index
    %c0_84 = arith.constant 0 : index
    %c0_85 = arith.constant 0 : index
    %69 = vector.load %arg2[%c8_83, %c0_84, %c0_85] : memref<9x16x16xbf16, #tpu.memory_space<vmem>>, vector<1x16x16xbf16>
    %70 = vector.shape_cast %69 : vector<1x16x16xbf16> to vector<16x16xbf16>
    %cst_86 = arith.constant dense<0.000000e+00> : vector<36x16xf32>
    %71 = tpu.matmul %68, %70, %cst_86 {dimension_numbers = #tpu.dot_dimension_numbers<[1], [0], [0], [1], [0, 0, 1, 1], [], []>} : vector<36x16xbf16>, vector<16x16xbf16>, vector<36x16xf32> -> vector<36x16xf32>
    %72 = arith.addf %66, %71 : vector<36x16xf32>
    %c0_87 = arith.constant 0 : index
    %c0_88 = arith.constant 0 : index
    %73 = vector.load %arg7[%c0_87, %c0_88] : memref<36x16xf32, #tpu.memory_space<vmem>>, vector<36x16xf32>
    tpu.vector_store %arg7[%c0_87, %c0_88], %72 {strides = array<i32>} : memref<36x16xf32, #tpu.memory_space<vmem>>, vector<36x16xf32>,
    %c0_89 = arith.constant 0 : index
    %c0_90 = arith.constant 0 : index
    %74 = vector.load %arg7[%c0_89, %c0_90] : memref<36x16xf32, #tpu.memory_space<vmem>>, vector<36x16xf32>
    %c0_91 = arith.constant 0 : index
    %c0_92 = arith.constant 0 : index
    %75 = vector.load %arg3[%c0_91, %c0_92] : memref<1x16xf32, #tpu.memory_space<vmem>>, vector<1x16xf32>
    %76 = vector.broadcast %75 : vector<1x16xf32> to vector<36x16xf32>
    %77 = arith.addf %74, %76 : vector<36x16xf32>
    %cst_93 = arith.constant 0.000000e+00 : f32
    %78 = vector.broadcast %cst_93 : f32 to vector<36x16xf32>
    %79 = arith.cmpf oge, %77, %78 : vector<36x16xf32>
    %c0_94 = arith.constant 0 : index
    %c0_95 = arith.constant 0 : index
    %80 = vector.load %arg4[%c0_94, %c0_95] : memref<1x16xf32, #tpu.memory_space<vmem>>, vector<1x16xf32>
    %81 = vector.broadcast %80 : vector<1x16xf32> to vector<36x16xf32>
    %82 = arith.mulf %81, %77 : vector<36x16xf32>
    %83 = arith.select %79, %77, %82 : vector<36x16xi1>, vector<36x16xf32>
    %c0_96 = arith.constant 0 : index
    %c0_97 = arith.constant 0 : index
    %c0_98 = arith.constant 0 : index
    %84 = vector.load %arg5[%c0_96, %c0_97, %c0_98] : memref<1x36x16xbf16, #tpu.memory_space<vmem>>, vector<1x36x16xbf16>
    %85 = vector.shape_cast %84 : vector<1x36x16xbf16> to vector<36x16xbf16>
    %86 = arith.extf %85 : vector<36x16xbf16> to vector<36x16xf32>
    %cst_99 = arith.constant 5.000000e-01 : f32
    %87 = vector.broadcast %cst_99 : f32 to vector<36x16xf32>
    %88 = arith.mulf %87, %83 : vector<36x16xf32>
    %89 = arith.addf %86, %88 : vector<36x16xf32>
    %90 = arith.truncf %89 : vector<36x16xf32> to vector<36x16xbf16>
    %c0_100 = arith.constant 0 : index
    %c0_101 = arith.constant 0 : index
    %c0_102 = arith.constant 0 : index
    %91 = vector.load %arg6[%c0_100, %c0_101, %c0_102] : memref<1x36x16xbf16, #tpu.memory_space<vmem>>, vector<1x36x16xbf16>
    %92 = vector.shape_cast %91 : vector<1x36x16xbf16> to vector<36x16xbf16>
    %93 = vector.shape_cast %90 : vector<36x16xbf16> to vector<1x36x16xbf16>
    tpu.vector_store %arg6[%c0_100, %c0_101, %c0_102], %93 {strides = array<i32>} : memref<1x36x16xbf16, #tpu.memory_space<vmem>>, vector<1x36x16xbf16>,
    return
  }
  func.func @transform_0(%arg0: i32) -> (i32, i32, i32) {
    %c0_i32 = arith.constant 0 : i32
    %c0_i32_0 = arith.constant 0 : i32
    %c0_i32_1 = arith.constant 0 : i32
    return %arg0, %c0_i32, %c0_i32_0 : i32, i32, i32
  }
  func.func @transform_1(%arg0: i32) -> (i32, i32, i32) {
    %c0_i32 = arith.constant 0 : i32
    %c0_i32_0 = arith.constant 0 : i32
    %c0_i32_1 = arith.constant 0 : i32
    %c0_i32_2 = arith.constant 0 : i32
    return %c0_i32, %c0_i32_0, %c0_i32_1 : i32, i32, i32
  }
  func.func @transform_2(%arg0: i32) -> (i32, i32) {
    %c0_i32 = arith.constant 0 : i32
    %c0_i32_0 = arith.constant 0 : i32
    %c0_i32_1 = arith.constant 0 : i32
    return %c0_i32, %c0_i32_0 : i32, i32
  }
  func.func @transform_3(%arg0: i32) -> (i32, i32) {
    %c0_i32 = arith.constant 0 : i32
    %c0_i32_0 = arith.constant 0 : i32
    %c0_i32_1 = arith.constant 0 : i32
    return %c0_i32, %c0_i32_0 : i32, i32
  }
  func.func @transform_4(%arg0: i32) -> (i32, i32, i32) {
    %c0_i32 = arith.constant 0 : i32
    %c0_i32_0 = arith.constant 0 : i32
    %c0_i32_1 = arith.constant 0 : i32
    return %arg0, %c0_i32, %c0_i32_0 : i32, i32, i32
  }
  func.func @transform_5(%arg0: i32) -> (i32, i32, i32) {
    %c0_i32 = arith.constant 0 : i32
    %c0_i32_0 = arith.constant 0 : i32
    %c0_i32_1 = arith.constant 0 : i32
    return %arg0, %c0_i32, %c0_i32_0 : i32, i32, i32
  }
}

module attributes {stable_mosaic.version = 11 : i64} {
  func.func @_fc_stack_kernel(%arg0: i32, %arg1: memref<2x256xbf16, #tpu.memory_space<vmem>>, %arg2: memref<256x32xbf16, #tpu.memory_space<vmem>>, %arg3: memref<1x32xf32, #tpu.memory_space<vmem>>, %arg4: memref<1x32xf32, #tpu.memory_space<vmem>>, %arg5: memref<1x32x32xbf16, #tpu.memory_space<vmem>>, %arg6: memref<1x1x32xf32, #tpu.memory_space<vmem>>, %arg7: memref<1x1x32xf32, #tpu.memory_space<vmem>>, %arg8: memref<1x32x32xbf16, #tpu.memory_space<vmem>>, %arg9: memref<1x1x32xf32, #tpu.memory_space<vmem>>, %arg10: memref<2x32xf32, #tpu.memory_space<vmem>>) attributes {dimension_semantics = [#tpu.dimension_semantics<arbitrary>], iteration_bounds = array<i64: 1>, scalar_prefetch = 0 : i64, scratch_operands = 0 : i64, tpu.core_type = #tpu.core_type<tc>, window_params = [{pipeline_mode = #tpu.pipeline_mode<synchronous>, transform_indices = @transform_0, window_bounds = array<i64: 2, 256>}, {pipeline_mode = #tpu.pipeline_mode<synchronous>, transform_indices = @transform_1, window_bounds = array<i64: 256, 32>}, {pipeline_mode = #tpu.pipeline_mode<synchronous>, transform_indices = @transform_2, window_bounds = array<i64: 1, 32>}, {pipeline_mode = #tpu.pipeline_mode<synchronous>, transform_indices = @transform_3, window_bounds = array<i64: 1, 32>}, {pipeline_mode = #tpu.pipeline_mode<synchronous>, transform_indices = @transform_4, window_bounds = array<i64: 1, 32, 32>}, {pipeline_mode = #tpu.pipeline_mode<synchronous>, transform_indices = @transform_5, window_bounds = array<i64: 1, 1, 32>}, {pipeline_mode = #tpu.pipeline_mode<synchronous>, transform_indices = @transform_6, window_bounds = array<i64: 1, 1, 32>}, {pipeline_mode = #tpu.pipeline_mode<synchronous>, transform_indices = @transform_7, window_bounds = array<i64: 1, 32, 32>}, {pipeline_mode = #tpu.pipeline_mode<synchronous>, transform_indices = @transform_8, window_bounds = array<i64: 1, 1, 32>}, {pipeline_mode = #tpu.pipeline_mode<synchronous>, transform_indices = @transform_9, window_bounds = array<i64: 2, 32>}]} {
    %c0 = arith.constant 0 : index
    %c0_0 = arith.constant 0 : index
    %0 = vector.load %arg1[%c0, %c0_0] : memref<2x256xbf16, #tpu.memory_space<vmem>>, vector<2x256xbf16>
    %c0_1 = arith.constant 0 : index
    %c0_2 = arith.constant 0 : index
    %1 = vector.load %arg2[%c0_1, %c0_2] : memref<256x32xbf16, #tpu.memory_space<vmem>>, vector<256x32xbf16>
    %cst = arith.constant dense<0.000000e+00> : vector<2x32xf32>
    %2 = tpu.matmul %0, %1, %cst {dimension_numbers = #tpu.dot_dimension_numbers<[1], [0], [0], [1], [0, 0, 1, 1], [], []>} : vector<2x256xbf16>, vector<256x32xbf16>, vector<2x32xf32> -> vector<2x32xf32>
    %c0_3 = arith.constant 0 : index
    %c0_4 = arith.constant 0 : index
    %3 = vector.load %arg3[%c0_3, %c0_4] : memref<1x32xf32, #tpu.memory_space<vmem>>, vector<1x32xf32>
    %4 = vector.broadcast %3 : vector<1x32xf32> to vector<2x32xf32>
    %5 = arith.addf %2, %4 : vector<2x32xf32>
    %cst_5 = arith.constant 0.000000e+00 : f32
    %6 = vector.broadcast %cst_5 : f32 to vector<2x32xf32>
    %7 = arith.cmpf oge, %5, %6 : vector<2x32xf32>
    %c0_6 = arith.constant 0 : index
    %c0_7 = arith.constant 0 : index
    %8 = vector.load %arg4[%c0_6, %c0_7] : memref<1x32xf32, #tpu.memory_space<vmem>>, vector<1x32xf32>
    %9 = vector.broadcast %8 : vector<1x32xf32> to vector<2x32xf32>
    %10 = arith.mulf %9, %5 : vector<2x32xf32>
    %11 = arith.select %7, %5, %10 : vector<2x32xi1>, vector<2x32xf32>
    %12 = arith.truncf %11 : vector<2x32xf32> to vector<2x32xbf16>
    %c0_8 = arith.constant 0 : index
    %c0_9 = arith.constant 0 : index
    %c0_10 = arith.constant 0 : index
    %13 = vector.load %arg5[%c0_8, %c0_9, %c0_10] : memref<1x32x32xbf16, #tpu.memory_space<vmem>>, vector<1x32x32xbf16>
    %14 = vector.shape_cast %13 : vector<1x32x32xbf16> to vector<32x32xbf16>
    %cst_11 = arith.constant dense<0.000000e+00> : vector<2x32xf32>
    %15 = tpu.matmul %12, %14, %cst_11 {dimension_numbers = #tpu.dot_dimension_numbers<[1], [0], [0], [1], [0, 0, 1, 1], [], []>} : vector<2x32xbf16>, vector<32x32xbf16>, vector<2x32xf32> -> vector<2x32xf32>
    %c0_12 = arith.constant 0 : index
    %c0_13 = arith.constant 0 : index
    %c0_14 = arith.constant 0 : index
    %16 = vector.load %arg6[%c0_12, %c0_13, %c0_14] : memref<1x1x32xf32, #tpu.memory_space<vmem>>, vector<1x1x32xf32>
    %17 = vector.shape_cast %16 : vector<1x1x32xf32> to vector<1x32xf32>
    %18 = vector.broadcast %17 : vector<1x32xf32> to vector<2x32xf32>
    %19 = arith.addf %15, %18 : vector<2x32xf32>
    %cst_15 = arith.constant 0.000000e+00 : f32
    %20 = vector.broadcast %cst_15 : f32 to vector<2x32xf32>
    %21 = arith.cmpf oge, %19, %20 : vector<2x32xf32>
    %c0_16 = arith.constant 0 : index
    %c0_17 = arith.constant 0 : index
    %c0_18 = arith.constant 0 : index
    %22 = vector.load %arg7[%c0_16, %c0_17, %c0_18] : memref<1x1x32xf32, #tpu.memory_space<vmem>>, vector<1x1x32xf32>
    %23 = vector.shape_cast %22 : vector<1x1x32xf32> to vector<1x32xf32>
    %24 = vector.broadcast %23 : vector<1x32xf32> to vector<2x32xf32>
    %25 = arith.mulf %24, %19 : vector<2x32xf32>
    %26 = arith.select %21, %19, %25 : vector<2x32xi1>, vector<2x32xf32>
    %27 = arith.truncf %26 : vector<2x32xf32> to vector<2x32xbf16>
    %c0_19 = arith.constant 0 : index
    %c0_20 = arith.constant 0 : index
    %c0_21 = arith.constant 0 : index
    %28 = vector.load %arg8[%c0_19, %c0_20, %c0_21] : memref<1x32x32xbf16, #tpu.memory_space<vmem>>, vector<1x32x32xbf16>
    %29 = vector.shape_cast %28 : vector<1x32x32xbf16> to vector<32x32xbf16>
    %cst_22 = arith.constant dense<0.000000e+00> : vector<2x32xf32>
    %30 = tpu.matmul %27, %29, %cst_22 {dimension_numbers = #tpu.dot_dimension_numbers<[1], [0], [0], [1], [0, 0, 1, 1], [], []>} : vector<2x32xbf16>, vector<32x32xbf16>, vector<2x32xf32> -> vector<2x32xf32>
    %c0_23 = arith.constant 0 : index
    %c0_24 = arith.constant 0 : index
    %c0_25 = arith.constant 0 : index
    %31 = vector.load %arg9[%c0_23, %c0_24, %c0_25] : memref<1x1x32xf32, #tpu.memory_space<vmem>>, vector<1x1x32xf32>
    %32 = vector.shape_cast %31 : vector<1x1x32xf32> to vector<1x32xf32>
    %33 = vector.broadcast %32 : vector<1x32xf32> to vector<2x32xf32>
    %34 = arith.addf %30, %33 : vector<2x32xf32>
    %35 = arith.addf %11, %34 : vector<2x32xf32>
    %c0_26 = arith.constant 0 : index
    %c0_27 = arith.constant 0 : index
    %36 = vector.load %arg10[%c0_26, %c0_27] : memref<2x32xf32, #tpu.memory_space<vmem>>, vector<2x32xf32>
    tpu.vector_store %arg10[%c0_26, %c0_27], %35 {strides = array<i32>} : memref<2x32xf32, #tpu.memory_space<vmem>>, vector<2x32xf32>,
    return
  }
  func.func @transform_0(%arg0: i32) -> (i32, i32) {
    %c0_i32 = arith.constant 0 : i32
    %c0_i32_0 = arith.constant 0 : i32
    %c0_i32_1 = arith.constant 0 : i32
    return %c0_i32, %c0_i32_0 : i32, i32
  }
  func.func @transform_1(%arg0: i32) -> (i32, i32) {
    %c0_i32 = arith.constant 0 : i32
    %c0_i32_0 = arith.constant 0 : i32
    %c0_i32_1 = arith.constant 0 : i32
    return %c0_i32, %c0_i32_0 : i32, i32
  }
  func.func @transform_2(%arg0: i32) -> (i32, i32) {
    %c0_i32 = arith.constant 0 : i32
    %c0_i32_0 = arith.constant 0 : i32
    %c0_i32_1 = arith.constant 0 : i32
    return %c0_i32, %c0_i32_0 : i32, i32
  }
  func.func @transform_3(%arg0: i32) -> (i32, i32) {
    %c0_i32 = arith.constant 0 : i32
    %c0_i32_0 = arith.constant 0 : i32
    %c0_i32_1 = arith.constant 0 : i32
    return %c0_i32, %c0_i32_0 : i32, i32
  }
  func.func @transform_4(%arg0: i32) -> (i32, i32, i32) {
    %c0_i32 = arith.constant 0 : i32
    %c0_i32_0 = arith.constant 0 : i32
    %c0_i32_1 = arith.constant 0 : i32
    %c0_i32_2 = arith.constant 0 : i32
    return %c0_i32, %c0_i32_0, %c0_i32_1 : i32, i32, i32
  }
  func.func @transform_5(%arg0: i32) -> (i32, i32, i32) {
    %c0_i32 = arith.constant 0 : i32
    %c0_i32_0 = arith.constant 0 : i32
    %c0_i32_1 = arith.constant 0 : i32
    %c0_i32_2 = arith.constant 0 : i32
    return %c0_i32, %c0_i32_0, %c0_i32_1 : i32, i32, i32
  }
  func.func @transform_6(%arg0: i32) -> (i32, i32, i32) {
    %c0_i32 = arith.constant 0 : i32
    %c0_i32_0 = arith.constant 0 : i32
    %c0_i32_1 = arith.constant 0 : i32
    %c0_i32_2 = arith.constant 0 : i32
    return %c0_i32, %c0_i32_0, %c0_i32_1 : i32, i32, i32
  }
  func.func @transform_7(%arg0: i32) -> (i32, i32, i32) {
    %c0_i32 = arith.constant 0 : i32
    %c0_i32_0 = arith.constant 0 : i32
    %c0_i32_1 = arith.constant 0 : i32
    %c0_i32_2 = arith.constant 0 : i32
    return %c0_i32, %c0_i32_0, %c0_i32_1 : i32, i32, i32
  }
  func.func @transform_8(%arg0: i32) -> (i32, i32, i32) {
    %c0_i32 = arith.constant 0 : i32
    %c0_i32_0 = arith.constant 0 : i32
    %c0_i32_1 = arith.constant 0 : i32
    %c0_i32_2 = arith.constant 0 : i32
    return %c0_i32, %c0_i32_0, %c0_i32_1 : i32, i32, i32
  }
  func.func @transform_9(%arg0: i32) -> (i32, i32) {
    %c0_i32 = arith.constant 0 : i32
    %c0_i32_0 = arith.constant 0 : i32
    %c0_i32_1 = arith.constant 0 : i32
    return %c0_i32, %c0_i32_0 : i32, i32
  }
}

</mosaic_0001>

<bundles_post_ra>
// kernel: _lambda_.5
= control target key start
LH: loop header
LB: loop body
LE: loop exit
PB: predicated region body
PF: predicated region fallthrough
CT: control target
= control target key end

     0   :  { %s447_s15 = smov 0   ;;  %s481_s0 = inlined_call_operand.vmem [shape: bf16[2,16,32], index: 0, kind: input, shape index: {}]   ;;  %s482_s1 = inlined_call_operand.vmem [shape: bf16[1,32,32], index: 1, kind: input, shape index: {}]   ;;  %s483_s2 = inlined_call_operand.vmem [shape: f32[1,32], index: 2, kind: input, shape index: {}]   ;;  %s484_s3 = inlined_call_operand.vmem [shape: f32[1,32], index: 3, kind: input, shape index: {}]   ;;  %s485_s4 = inlined_call_operand.vmem [shape: bf16[2,16,32], index: 4, kind: output, shape index: {}]  }
   0x1 LB: > { %s365_s16 = sadd.s32 4294967295, %s418_s15   ;;  %p369_p0 = scmp.ge.s32.totalorder %s418_s15, 1  ;;  %s418_s15 = sphi %s447_s15, %s14_s15  }
   0x2   : > { %p162_p1 = scmp.lt.s32.totalorder %s418_s15, 3 }
   0x4   : > { %p163_p2 = pnand %p369_p0, %p162_p1 }
   0x5   : > { %p188_p3 = scmp.lt.s32.totalorder (!%p163_p2), %s365_s16, 1 }
   0x6   : > { %166 = sbr.rel (%p163_p2) target bundleno = 235 (0xeb), region = 36 }
   0xb   : > { %v409_v0 = vld [vmem:[%s482_s1 + $0x8] sm:$0xff]   ;;  %v420_v1 = vmov 0.0   ;;  %v410_v2 = vld [vmem:[%s482_s1] sm:$0xff]   ;;  %vm421_vm0 = vmmov 0   ;;  %vm199_vm1 = vcmask 261120   ;;  %s487_s16 = smov (!%p188_p3, %s365_s16), 1 }
   0xc   : > { %391 = vmatprep.subr.bf16.mxu0 %v420_v1  ;;  %395 = vmatprep.mubr.msk.bf16.mxu0 %vm421_vm0, %v420_v1  ;;  %200 = vst.msk [vmem:[#allocation2] sm:$0xff] %vm199_vm1, %v420_v1  ;;  %201 = vst.msk [vmem:[#allocation2 + $0x8] sm:$0xff] %vm199_vm1, %v420_v1  ;;  %s384_s21 = sshll.u32 %s487_s16, 3  ;;  %v378_v12 = vld [vmem:[%s483_s2] ss:$0 sm:$0xff]  ;;  %vm307_vm3 = vcmask 257024  }
   0xd   : > { %392 = vmatpush3.bf16.msra.mxu0 %v409_v0  ;;  %s192_s24 = scalar_lea.vmem %s481_s0, %s384_s21  ;;  %v379_v14 = vld [vmem:[%s484_s3] ss:$0 sm:$0xff]  ;;  %s197_s5 = scalar_lea.vmem %s485_s4, %s384_s21 }
   0xe   : > { %393 = vmatprep.subr.bf16.mxu0 %v420_v1  ;;  %v411_v3 = vld [vmem:[%s192_s24] sm:$0xff]  }
  0x11   : > { %394 = vmatpush3.bf16.msra.mxu0 %v410_v2 }
  0x13   : > { %v202_v4 = vld [vmem:[#allocation2] sm:$0xff]  ;;  %v203_v8 = vld [vmem:[#allocation2 + $0x8] sm:$0xff] }
  0x14   : > { %396 = vmatmul.mubr.msk.bf16.vlgmr.msra.gmra.mxu0 %vm199_vm1, %v411_v3 }
  0xd4   : > { %v264_v5 = vpop.f32.mrf.mxu0 }
  0xd5   : > { %v271_v6 = vadd.f32 %v264_v5, %v202_v4 }
  0xd6   : > { %v397_v7 = vpop.f32.mrf.mxu0 }
  0xd7   : > { %273 = vst.msk [vmem:[#allocation2] sm:$0xff] %vm199_vm1, %v271_v6 }
  0xd8   : > { %v267_v9 = vpop.f32.mrf.mxu0 }
  0xd9   : > { %v272_v10 = vadd.f32 %v267_v9, %v203_v8 }
  0xda   : > { %v398_v11 = vpop.f32.mrf.mxu0 }
  0xdb   : > { %274 = vst.msk [vmem:[#allocation2 + $0x8] sm:$0xff] %vm199_vm1, %v272_v10 }
  0xde   : > { %v275_v13 = vld [vmem:[#allocation2] sm:$0xff] }
  0xdf   : > { %v284_v15 = vadd.f32 %v378_v12, %v275_v13 }
  0xe1   : > { %vm286_vm2 = vcmp.ge.f32.partialorder %v284_v15, 0.0  ;;  %v295_v16 = vmul.f32 %v379_v14, %v284_v15 }
  0xe2   : > { %v276_v17 = vld [vmem:[#allocation2 + $0x8] sm:$0xff] }
  0xe3   : > { %v297_v18 = vsel %vm286_vm2, %v284_v15, %v295_v16  ;;  %v285_v19 = vadd.f32 %v378_v12, %v276_v17 }
  0xe4   : > { %v386_v20 = vpack.c.bf16 %v297_v18, %v297_v18 }
  0xe5   : > { %vm287_vm4 = vcmp.ge.f32.partialorder %v285_v19, 0.0  ;;  %v296_v21 = vmul.f32 %v379_v14, %v285_v19 }
  0xe6   : > { %308 = vst.msk [vmem:[%s197_s5] sm:$0xf] %vm307_vm3, %v386_v20 }
  0xe7   : > { %v298_v22 = vsel %vm287_vm4, %v285_v19, %v296_v21 }
  0xe8   : > { %v387_v23 = vpack.c.bf16 %v298_v22, %v298_v22 }
  0xea   : > { %309 = vst.msk [vmem:[%s197_s5 + $0x4] sm:$0xf] %vm307_vm3, %v387_v23 }
  0xeb PF: > { %s14_s15 = sadd.s32 1, %s418_s15  }
  0xec   : > { %p11_p4 = scmp.ge.s32.totalorder %s14_s15, 4  }
  0xee   :  { %13 = sbr.rel (!%p11_p4) target bundleno = 1 (0x1), region = 66 }

// kernel: _lambda_.4
= control target key start
LH: loop header
LB: loop body
LE: loop exit
PB: predicated region body
PF: predicated region fallthrough
CT: control target
= control target key end

     0   :  { %s3150_s15 = smov 0   ;;  %s3725_s0 = inlined_call_operand.vmem [shape: bf16[2,122,16], index: 0, kind: input, shape index: {}]   ;;  %s3726_s1 = inlined_call_operand.vmem [shape: bf16[9,16,8], index: 1, kind: input, shape index: {}]   ;;  %s3727_s2 = inlined_call_operand.vmem [shape: f32[1,8], index: 2, kind: input, shape index: {}]   ;;  %s3728_s3 = inlined_call_operand.vmem [shape: f32[1,8], index: 3, kind: input, shape index: {}]   ;;  %s3729_s4 = inlined_call_operand.vmem [shape: bf16[2,100,8], index: 4, kind: output, shape index: {}]  }
   0x1 LB: > { %s2498_s16 = sadd.s32 4294967295, %s3121_s15   ;;  %p2502_p0 = scmp.ge.s32.totalorder %s3121_s15, 1  ;;  %s3121_s15 = sphi %s3150_s15, %s14_s15  }
   0x2   : > { %p162_p1 = scmp.lt.s32.totalorder %s3121_s15, 3 }
   0x4   : > { %p163_p2 = pnand %p2502_p0, %p162_p1 }
   0x5   : > { %p188_p3 = scmp.lt.s32.totalorder (!%p163_p2), %s2498_s16, 1 }
   0x6   : > { %166 = sbr.rel (%p163_p2) target bundleno = 477 (0x1dd), region = 36 }
   0xb   : > { %v3043_v0 = vld [vmem:[%s3726_s1] sm:$0xff]   ;;  %v3123_v1 = vmov 0.0   ;;  %vm3124_vm0 = vmmov 0   ;;  %s3731_s16 = smov (!%p188_p3, %s2498_s16), 1  ;;  %vm281_vm1 = vcmask 130048   ;;  %v3046_v2 = vld [vmem:[%s3726_s1 + $0x8] sm:$0xff]  }
   0xc   : > { %3030 = vmatprep.subr.bf16.mxu1 %v3123_v1  ;;  %2760 = vmatprep.subr.bf16.mxu0 %v3123_v1  ;;  %s2674_s19 = sshll.u32 %s3731_s16, 6  ;;  %v3047_v3 = vld [vmem:[%s3726_s1 + $0x10] sm:$0xff]   ;;  %vm479_vm2 = vsmask.f32 7424  ;;  %v3055_v20 = vld [vmem:[%s3726_s1 + $0x18] sm:$0xff]   ;;  %vm738_vm3 = vcmask 1046528  }
   0xd   : > { %3031 = vmatpush3.bf16.msra.mxu1 %v3043_v0  ;;  %2761 = vmatpush3.bf16.msra.mxu0 %v3043_v0  ;;  %s3175_s22 = scalar_lea.vmem %s3725_s0, %s2674_s19  ;;  %v3059_v31 = vld [vmem:[%s3726_s1 + $0x20] sm:$0xff]   ;;  %vm199_vm4 = vcmask 64512   ;;  %vm212_vm5 = vcmask 60416   ;;  %vm1171_vm6 = vsmask.f32 6400  ;;  %vm1437_vm7 = vcmask 1045504  }
   0xe   : > { %2762 = vmatprep.mubr.msk.bf16.mxu0 %vm3124_vm0, %v3123_v1  ;;  %2778 = vmatprep.mubr.msk.bf16.mxu1 %vm3124_vm0, %v3123_v1  ;;  %v3044_v4 = vld [vmem:[%s3175_s22] sm:$0xff]   ;;  %v3048_v6 = vld [vmem:[%s3175_s22 + $0x8] sm:$0xff]   ;;  %v3051_v11 = vld [vmem:[%s3175_s22 + $0x30] ss:$0 sps:$4 sm:$0x33]   ;;  %200 = vst.msk [vmem:[#allocation2] sm:$0xff] %vm199_vm4, %v3123_v1 }
   0xf   : > { %2790 = vmatprep.subr.bf16.mxu1 %v3123_v1  ;;  %2820 = vmatprep.subr.bf16.mxu0 %v3123_v1  ;;  %v3045_v5 = vld [vmem:[%s3175_s22 + $0x20] sm:$0xff]   ;;  %v3049_v7 = vld [vmem:[%s3175_s22 + $0x28] sm:$0xff]   ;;  %v3050_v12 = vld [vmem:[%s3175_s22 + $0x10] sm:$0xff]   ;;  %201 = vst.msk [vmem:[#allocation2 + $0x8] sm:$0xff] %vm199_vm4, %v3123_v1  ;;  %vm1873_vm8 = vsmask.f32 5376 }
  0x10   : > { %2763 = vmatmul.mubr.msk.bf16.vlgmr.msra.gmra.mxu0 %vm281_vm1, %v3044_v4  ;;  %2779 = vmatmul.mubr.msk.bf16.vlgmr.msra.gmra.mxu1 %vm281_vm1, %v3045_v5  ;;  %v3053_v8 = vld [vmem:[%s3175_s22] sm:$0xff]   ;;  %v3054_v9 = vld [vmem:[%s3175_s22 + $0x8] sm:$0xff]   ;;  %v3056_v18 = vld [vmem:[%s3175_s22 + $0x10] sm:$0xff]   ;;  %202 = vst.msk [vmem:[#allocation2 + $0x10] sm:$0xff] %vm199_vm4, %v3123_v1  ;;  %vm2142_vm9 = vcmask 1044480   ;;  %s3032_s19 = smul.u32 52, %s3731_s16 }
  0x11   : > { %2821 = vmatpush3.bf16.msra.mxu0 %v3047_v3  ;;  %2791 = vmatpush3.bf16.msra.mxu1 %v3046_v2  ;;  %v483_v10 = vshll.u32 %v3053_v8, 16  ;;  %v481_v13 = vshrl.u32 %v3053_v8, 16  ;;  %v488_v15 = vshll.u32 %v3054_v9, 16  ;;  %v3052_v19 = vld [vmem:[%s3175_s22 + $0x18] sm:$0xff]   ;;  %v3057_v21 = vld [vmem:[%s3175_s22] sm:$0xfe]  }
  0x12   : > { %2766 = vmatprep.mubr.msk.bf16.mxu0 %vm3124_vm0, %v3123_v1  ;;  %2782 = vmatprep.mubr.msk.bf16.mxu1 %vm3124_vm0, %v3123_v1  ;;  %v3058_v22 = vld [vmem:[%s3175_s22 + $0x8] sm:$0xff]   ;;  %v492_v24 = vshrl.u32 %v3054_v9, 16  ;;  %v496_v25 = vshll.u32 %v3056_v18, 16  ;;  %v739_v26 = vrot.slane %v3057_v21, 1  ;;  %v3060_v30 = vld [vmem:[%s3175_s22 + $0x18] sm:$0xff]   ;;  %v3061_v33 = vld [vmem:[%s3175_s22 + $0x10] sm:$0xff]   ;;  %s3654_s21 = scalar_lea.vmem %s3729_s4, %s3032_s19 }
  0x13   : > { %2850 = vmatprep.subr.bf16.mxu1 %v3123_v1  ;;  %2880 = vmatprep.subr.bf16.mxu0 %v3123_v1  ;;  %v485_v14 = vrot.slane %v483_v10, 1  ;;  %v490_v17 = vrot.slane %v488_v15, 1  ;;  %v740_v27 = vrot.slane %v3058_v22, 1  ;;  %v500_v35 = vshrl.u32 %v3056_v18, 16  ;;  %v3062_v40 = vld [vmem:[%s3175_s22 + $0x20] sm:$0xff]   ;;  %v3063_v42 = vld [vmem:[%s3175_s22 + $0x18] sm:$0xff]  }
  0x14   : > { %v498_v29 = vrot.slane %v496_v25, 1  ;;  %v504_v36 = vshll.u32 %v3060_v30, 16  ;;  %v742_v37 = vrot.slane %v3061_v33, 1  ;;  %v508_v44 = vshrl.u32 %v3060_v30, 16  ;;  %v3064_v49 = vld [vmem:[%s3175_s22 + $0x28] sm:$0xff]   ;;  %v3065_v51 = vld [vmem:[%s3175_s22 + $0x20] sm:$0xff]  }
  0x15   : > { %v486_v16 = vor.u32 %v485_v14, %v481_v13  ;;  %v494_v28 = vor.u32 %v492_v24, %v490_v17  ;;  %v741_v32 = vsel %vm738_vm3, %v739_v26, %v740_v27  ;;  %v512_v45 = vshll.u32 %v3062_v40, 16  ;;  %v3066_v55 = vld [vmem:[%s3175_s22 + $0x30] ss:$0 sps:$4 sm:$0x77]   ;;  %v3067_v60 = vld [vmem:[%s3175_s22 + $0x28] sm:$0xff]   ;;  %203 = vst.msk [vmem:[#allocation2 + $0x18] sm:$0xff] %vm199_vm4, %v3123_v1 }
  0x16   : > { %v502_v38 = vor.u32 %v500_v35, %v498_v29  ;;  %v506_v39 = vrot.slane %v504_v36, 1  ;;  %v743_v41 = vsel %vm738_vm3, %v740_v27, %v742_v37  ;;  %v744_v46 = vrot.slane %v3063_v42, 1  ;;  %204 = vst.msk [vmem:[#allocation2 + $0x20] sm:$0xff] %vm199_vm4, %v3123_v1  ;;  %205 = vst.msk [vmem:[#allocation2 + $0x28] sm:$0xff] %vm199_vm4, %v3123_v1  ;;  %v3070_v9 = vld [vmem:[%s3175_s22 + $0xc] sm:$0xff]   ;;  %v3077_v25 = vld [vmem:[%s3175_s22 + $0x14] sm:$0xff]  }
  0x17   : > { %v491_v23 = vsel %vm479_vm2, %v486_v16, %v490_v17  ;;  %v499_v34 = vsel %vm479_vm2, %v494_v28, %v498_v29  ;;  %v514_v48 = vrot.slane %v512_v45, 1  ;;  %v516_v53 = vshrl.u32 %v3062_v40, 16  ;;  %206 = vst.msk [vmem:[#allocation2 + $0x30] sm:$0xff] %vm199_vm4, %v3123_v1  ;;  %207 = vst.msk [vmem:[#allocation2 + $0x38] sm:$0xff] %vm199_vm4, %v3123_v1  ;;  %v3074_v10 = vld [vmem:[%s3175_s22 + $0xc] sm:$0xff]   ;;  %v3072_v28 = vld [vmem:[%s3175_s22 + $0x14] sm:$0xff]  }
  0x18   : > { %2767 = vmatmul.mubr.msk.bf16.gmra.mxu0 %vm281_vm1, %v3048_v6  ;;  %2783 = vmatmul.mubr.msk.bf16.gmra.mxu1 %vm281_vm1, %v3049_v7  ;;  %v507_v43 = vsel %vm479_vm2, %v502_v38, %v506_v39  ;;  %v510_v47 = vor.u32 %v508_v44, %v506_v39  ;;  %v745_v50 = vsel %vm738_vm3, %v742_v37, %v744_v46  ;;  %v520_v54 = vshll.u32 %v3064_v49, 16  ;;  %v3068_v4 = vld [vmem:[%s3175_s22 + $0x30] ss:$0 sps:$4 sm:$0x77]   ;;  %v3073_v13 = vld [vmem:[%s3175_s22 + $0x4] sm:$0xfe]  }
  0x19   : > { %2770 = vmatprep.mubr.msk.bf16.mxu0 %vm3124_vm0, %v3123_v1  ;;  %2786 = vmatprep.mubr.msk.bf16.mxu1 %vm3124_vm0, %v3123_v1  ;;  %v746_v56 = vrot.slane %v3065_v51, 1  ;;  %v518_v57 = vor.u32 %v516_v53, %v514_v48  ;;  %v524_v62 = vshrl.u32 %v3064_v49, 16  ;;  %v528_v63 = vshll.u32 %v3066_v55, 16  ;;  %208 = vst.msk [vmem:[#allocation2 + $0x40] sm:$0xff] %vm199_vm4, %v3123_v1  ;;  %209 = vst.msk [vmem:[#allocation2 + $0x48] sm:$0xff] %vm199_vm4, %v3123_v1  ;;  %v3071_v27 = vld [vmem:[%s3726_s1 + $0x28] sm:$0xff]  }
  0x1a   : > { %v515_v52 = vsel %vm479_vm2, %v510_v47, %v514_v48  ;;  %v522_v58 = vrot.slane %v520_v54, 1  ;;  %v748_v0 = vrot.slane %v3067_v60, 1  ;;  %210 = vst.msk [vmem:[#allocation2 + $0x50] sm:$0xff] %vm199_vm4, %v3123_v1  ;;  %211 = vst.msk [vmem:[#allocation2 + $0x58] sm:$0xff] %vm199_vm4, %v3123_v1  ;;  %v532_v7 = vshrl.u32 %v3066_v55, 16  ;;  %v3075_v35 = vld [vmem:[%s3726_s1 + $0x30] sm:$0xff]  }
  0x1b   : > { %v747_v59 = vsel %vm738_vm3, %v744_v46, %v746_v56  ;;  %v530_v3 = vrot.slane %v528_v63, 1  ;;  %v750_v8 = vrot.slane %v3068_v4, 1  ;;  %v3069_v14 = vld [vmem:[%s3175_s22 + $0x4] sm:$0xfe]   ;;  %v1181_v15 = vshrl.u32 %v3074_v10, 16  ;;  %v3079_v38 = vld [vmem:[%s3175_s22 + $0x1c] sm:$0xff]  }
  0x1c   : > { %v523_v61 = vsel %vm479_vm2, %v518_v57, %v522_v58  ;;  %v526_v2 = vor.u32 %v524_v62, %v522_v58  ;;  %v749_v5 = vsel %vm738_vm3, %v746_v56, %v748_v0  ;;  %v1173_v16 = vshrl.u32 %v3073_v13, 16  ;;  %213 = vst.msk [vmem:[#allocation2 + $0x60] sm:$0xf] %vm212_vm5, %v3123_v1  ;;  %v3076_v40 = vld [vmem:[%s3175_s22 + $0x1c] sm:$0xff]   ;;  %v3081_v48 = vld [vmem:[%s3175_s22 + $0x24] sm:$0xff]   ;;  %v3083_v58 = vld [vmem:[%s3175_s22 + $0x2c] sm:$0xff]  }
  0x1d   : > { %v1176_v17 = vshll.u32 %v3073_v13, 16  ;;  %v1184_v18 = vshll.u32 %v3074_v10, 16  ;;  %v958_v33 = vrot.slane %v3072_v28, 1  ;;  %v1199_v42 = vshrl.u32 %v3079_v38, 16  ;;  %v3080_v60 = vld [vmem:[%s3175_s22 + $0x2c] sm:$0xff]  }
  0x1e   : > { %v531_v6 = vsel %vm479_vm2, %v526_v2, %v530_v3  ;;  %v1175_v21 = vrot.slane %v1173_v16, 1  ;;  %v960_v44 = vrot.slane %v3076_v40, 1  ;;  %v1211_v53 = vshll.u32 %v3081_v48, 16  ;;  %v3094_v40 = vld [vmem:[%s3175_s22 + $0x24] sm:$0xff]  }
  0x1f   : > { %v1178_v22 = vrot.slane %v1176_v17, 2  ;;  %v1186_v24 = vrot.slane %v1184_v18, 2  ;;  %v1201_v46 = vrot.slane %v1199_v42, 1  ;;  %v1217_v62 = vshrl.u32 %v3083_v58, 16  ;;  %v3085_v18 = vld [vmem:[%s3175_s22 + $0x4] sm:$0xfc]  }
  0x20   : > { %2771 = vmatmul.mubr.msk.bf16.gmra.mxu0 %vm281_vm1, %v3050_v12  ;;  %2787 = vmatmul.mubr.msk.bf16.gmra.mxu1 %vm281_vm1, %v3051_v11  ;;  %v534_v11 = vor.u32 %v532_v7, %v530_v3  ;;  %v751_v12 = vsel %vm738_vm3, %v748_v0, %v750_v8  ;;  %v961_v49 = vsel %vm738_vm3, %v958_v33, %v960_v44  ;;  %v1213_v57 = vrot.slane %v1211_v53, 2  ;;  %v3082_v7 = vld [vmem:[%s3175_s22 + $0x34] ss:$0 sps:$4 sm:$0x77]  }
  0x21   : > { %2774 = vmatprep.mubr.msk.bf16.mxu0 %vm3124_vm0, %v3123_v1  ;;  %2792 = vmatprep.mubr.msk.bf16.mxu1 %vm3124_vm0, %v3123_v1  ;;  %v1179_v29 = vor.u32 %v1178_v22, %v1175_v21  ;;  %v1220_v63 = vshll.u32 %v3083_v58, 16  ;;  %v964_v0 = vrot.slane %v3080_v60, 1  ;;  %v1219_v3 = vrot.slane %v1217_v62, 1  ;;  %v3089_v22 = vld [vmem:[%s3175_s22 + $0x8] sm:$0xfc]  }
  0x22   : > { %v1445_v42 = vrot.slane %v3094_v40, 2  ;;  %v3101_v58 = vld [vmem:[%s3175_s22 + $0x8] sm:$0xfc]   ;;  %v216_v40 = vld [vmem:[#allocation2 + $0x10] sm:$0xff] }
  0x23   : > { %v1222_v4 = vrot.slane %v1220_v63, 2  ;;  %v1878_v62 = vshll.u32 %v3101_v58, 16 }
  0x28   : > { %2775 = vmatmul.mubr.msk.bf16.gmra.mxu0 %vm281_vm1, %v3052_v19  ;;  %2793 = vmatmul.mubr.msk.bf16.vlgmr.msra.gmra.mxu1 %vm281_vm1, %v491_v23  ;;  %v955_v19 = vrot.slane %v3069_v14, 1  ;;  %v1183_v23 = vrot.slane %v1181_v15, 1 }
  0x29   : > { %2822 = vmatprep.mubr.msk.bf16.mxu0 %vm3124_vm0, %v3123_v1  ;;  %2851 = vmatpush3.bf16.msra.mxu1 %v3055_v20  ;;  %v956_v20 = vrot.slane %v3070_v9, 1 }
  0x2a   : > { %2796 = vmatprep.mubr.msk.bf16.mxu1 %vm3124_vm0, %v3123_v1  ;;  %2910 = vmatprep.subr.bf16.mxu1 %v3123_v1  ;;  %v1187_v30 = vor.u32 %v1186_v24, %v1183_v23  ;;  %v3090_v23 = vld [vmem:[%s3175_s22 + $0x10] sm:$0xff]  }
  0x2b   : > { %v957_v26 = vsel %vm738_vm3, %v955_v19, %v956_v20  ;;  %v959_v39 = vsel %vm738_vm3, %v956_v20, %v958_v33  ;;  %v3086_v19 = vld [vmem:[%s3175_s22 + $0xc] sm:$0xff]   ;;  %v1438_v20 = vrot.slane %v3085_v18, 2  ;;  %v1655_v28 = vrot.slane %v3090_v23, 2  ;;  %v3106_v18 = vld [vmem:[%s3175_s22 + $0x20] sm:$0xff]  }
  0x2c   : > { %v1439_v21 = vrot.slane %v3086_v19, 2  ;;  %v222_v19 = vld [vmem:[#allocation2 + $0x40] sm:$0xff] }
  0x2e   : > { %v1440_v24 = vsel %vm1437_vm7, %v1438_v20, %v1439_v21 }
  0x30   : > { %2823 = vmatmul.mubr.msk.bf16.vlgmr.msra.gmra.mxu0 %vm281_vm1, %v741_v32  ;;  %2797 = vmatmul.mubr.msk.bf16.gmra.mxu1 %vm281_vm1, %v499_v34  ;;  %v1193_v32 = vshll.u32 %v3077_v25, 16  ;;  %v1188_v34 = vsel %vm1171_vm6, %v1179_v29, %v1187_v30 }
  0x31   : > { %2881 = vmatpush3.bf16.msra.mxu0 %v3059_v31  ;;  %2800 = vmatprep.mubr.msk.bf16.mxu1 %vm3124_vm0, %v3123_v1  ;;  %v1190_v31 = vshrl.u32 %v3077_v25, 16  ;;  %v3087_v25 = vld [vmem:[%s3726_s1 + $0x38] sm:$0xff]  }
  0x32   : > { %2826 = vmatprep.mubr.msk.bf16.mxu0 %vm3124_vm0, %v3123_v1  ;;  %2940 = vmatprep.subr.bf16.mxu0 %v3123_v1  ;;  %v1195_v37 = vrot.slane %v1193_v32, 2  ;;  %v3093_v32 = vld [vmem:[%s3175_s22 + $0x18] sm:$0xff]  }
  0x33   : > { %v1192_v36 = vrot.slane %v1190_v31, 1  ;;  %v3091_v31 = vld [vmem:[%s3726_s1 + $0x40] sm:$0xff]  }
  0x38   : > { %2827 = vmatmul.mubr.msk.bf16.gmra.mxu0 %vm281_vm1, %v743_v41  ;;  %2801 = vmatmul.mubr.msk.bf16.gmra.mxu1 %vm281_vm1, %v507_v43  ;;  %v1196_v41 = vor.u32 %v1195_v37, %v1192_v36  ;;  %v1202_v43 = vshll.u32 %v3079_v38, 16  ;;  %v3095_v38 = vld [vmem:[%s3175_s22 + $0x20] sm:$0xff]  }
  0x39   : > { %2830 = vmatprep.mubr.msk.bf16.mxu0 %vm3124_vm0, %v3123_v1  ;;  %2804 = vmatprep.mubr.msk.bf16.mxu1 %vm3124_vm0, %v3123_v1 }
  0x3a   : > { %v1197_v45 = vsel %vm1171_vm6, %v1187_v30, %v1196_v41  ;;  %v1204_v47 = vrot.slane %v1202_v43, 2 }
  0x3c   : > { %v1205_v51 = vor.u32 %v1204_v47, %v1201_v46  ;;  %v3096_v46 = vld [vmem:[%s3175_s22 + $0x2c] sm:$0xff]  }
  0x3e   : > { %v1206_v55 = vsel %vm1171_vm6, %v1196_v41, %v1205_v51  ;;  %v1659_v41 = vrot.slane %v3095_v38, 2 }
  0x40   : > { %2831 = vmatmul.mubr.msk.bf16.gmra.mxu0 %vm281_vm1, %v745_v50  ;;  %2805 = vmatmul.mubr.msk.bf16.gmra.mxu1 %vm281_vm1, %v515_v52  ;;  %v3078_v50 = vld [vmem:[%s3175_s22 + $0x24] sm:$0xff]   ;;  %v1208_v52 = vshrl.u32 %v3081_v48, 16  ;;  %v1447_v48 = vrot.slane %v3096_v46, 2  ;;  %v224_v46 = vld [vmem:[#allocation2 + $0x50] sm:$0xff] }
  0x41   : > { %2834 = vmatprep.mubr.msk.bf16.mxu0 %vm3124_vm0, %v3123_v1  ;;  %2808 = vmatprep.mubr.msk.bf16.mxu1 %vm3124_vm0, %v3123_v1  ;;  %v962_v54 = vrot.slane %v3078_v50, 1  ;;  %v3099_v50 = vld [vmem:[%s3175_s22 + $0x30] sm:$0xff]  }
  0x42   : > { %v1210_v56 = vrot.slane %v1208_v52, 1  ;;  %v3098_v52 = vld [vmem:[%s3175_s22 + $0x34] ss:$0 sps:$4 sm:$0xff]   ;;  %v1663_v53 = vrot.slane %v3099_v50, 2 }
  0x48   : > { %2835 = vmatmul.mubr.msk.bf16.gmra.mxu0 %vm281_vm1, %v747_v59  ;;  %2809 = vmatmul.mubr.msk.bf16.gmra.mxu1 %vm281_vm1, %v523_v61  ;;  %v963_v59 = vsel %vm738_vm3, %v960_v44, %v962_v54  ;;  %v1214_v61 = vor.u32 %v1213_v57, %v1210_v56  ;;  %v3097_v44 = vld [vmem:[%s3175_s22 + $0x28] sm:$0xff]   ;;  %v3100_v56 = vld [vmem:[%s3175_s22 + $0x38] ss:$0 sps:$4 sm:$0xff]  }
  0x49   : > { %2838 = vmatprep.mubr.msk.bf16.mxu0 %vm3124_vm0, %v3123_v1  ;;  %2812 = vmatprep.mubr.msk.bf16.mxu1 %vm3124_vm0, %v3123_v1  ;;  %v1661_v47 = vrot.slane %v3097_v44, 2  ;;  %v1665_v60 = vrot.slane %v3100_v56, 2  ;;  %v3108_v44 = vld [vmem:[%s3175_s22 + $0x28] sm:$0xff]  }
  0x4a   : > { %v1215_v2 = vsel %vm1171_vm6, %v1205_v51, %v1214_v61  ;;  %v1448_v51 = vsel %vm1437_vm7, %v1445_v42, %v1447_v48  ;;  %v1913_v56 = vshll.u32 %v3108_v44, 16 }
  0x50   : > { %2839 = vmatmul.mubr.msk.bf16.gmra.mxu0 %vm281_vm1, %v749_v5  ;;  %2813 = vmatmul.mubr.msk.bf16.gmra.mxu1 %vm281_vm1, %v531_v6  ;;  %v3084_v5 = vld [vmem:[%s3175_s22 + $0x34] ss:$0 sps:$4 sm:$0xff]   ;;  %v965_v6 = vsel %vm738_vm3, %v962_v54, %v964_v0  ;;  %v1449_v54 = vrot.slane %v3098_v52, 2 }
  0x51   : > { %2842 = vmatprep.mubr.msk.bf16.mxu0 %vm3124_vm0, %v3123_v1  ;;  %2816 = vmatprep.mubr.msk.bf16.mxu1 %vm3124_vm0, %v3123_v1  ;;  %v1226_v9 = vshrl.u32 %v3084_v5, 16  ;;  %v1229_v10 = vshll.u32 %v3084_v5, 16  ;;  %v1880_v5 = vrot.slane %v1878_v62, 3 }
  0x52   : > { %v1450_v57 = vsel %vm1437_vm7, %v1447_v48, %v1449_v54 }
  0x53   : > { %v1228_v13 = vrot.slane %v1226_v9, 1  ;;  %v1231_v14 = vrot.slane %v1229_v10, 2 }
  0x55   : > { %v1232_v16 = vor.u32 %v1231_v14, %v1228_v13  ;;  %v3104_v14 = vld [vmem:[%s3175_s22 + $0x8] sm:$0xf8]  }
  0x58   : > { %2843 = vmatmul.mubr.msk.bf16.gmra.mxu0 %vm281_vm1, %v751_v12  ;;  %2817 = vmatmul.mubr.msk.bf16.gmra.mxu1 %vm281_vm1, %v534_v11  ;;  %v966_v11 = vrot.slane %v3082_v7, 1 }
  0x59   : > { %2846 = vmatprep.mubr.msk.bf16.mxu0 %vm3124_vm0, %v3123_v1  ;;  %2852 = vmatprep.mubr.msk.bf16.mxu1 %vm3124_vm0, %v3123_v1 }
  0x5a   : > { %v967_v15 = vsel %vm738_vm3, %v964_v0, %v966_v11 }
  0x60   : > { %2847 = vmatmul.mubr.msk.bf16.gmra.mxu0 %vm281_vm1, %v750_v8  ;;  %2853 = vmatmul.mubr.msk.bf16.vlgmr.msra.gmra.mxu1 %vm281_vm1, %v957_v26  ;;  %v1223_v8 = vor.u32 %v1222_v4, %v1219_v3  ;;  %v3088_v26 = vld [vmem:[%s3175_s22 + $0x14] sm:$0xff]  }
  0x61   : > { %2882 = vmatprep.mubr.msk.bf16.mxu0 %vm3124_vm0, %v3123_v1  ;;  %2911 = vmatpush3.bf16.msra.mxu1 %v3071_v27  ;;  %v1654_v27 = vrot.slane %v3089_v22, 2  ;;  %v1441_v29 = vrot.slane %v3088_v26, 2  ;;  %v3103_v3 = vld [vmem:[%s3175_s22 + $0x18] sm:$0xff]  }
  0x62   : > { %2856 = vmatprep.mubr.msk.bf16.mxu1 %vm3124_vm0, %v3123_v1  ;;  %2970 = vmatprep.subr.bf16.mxu1 %v3123_v1  ;;  %v1224_v12 = vsel %vm1171_vm6, %v1214_v61, %v1223_v8  ;;  %v1233_v17 = vsel %vm1171_vm6, %v1223_v8, %v1232_v16  ;;  %v1875_v61 = vshrl.u32 %v3101_v58, 16  ;;  %v1892_v8 = vshrl.u32 %v3103_v3, 16  ;;  %v225_v58 = vld [vmem:[#allocation2 + $0x58] sm:$0xff] }
  0x63   : > { %v1656_v30 = vsel %vm1437_vm7, %v1654_v27, %v1655_v28  ;;  %v1442_v33 = vsel %vm1437_vm7, %v1439_v21, %v1441_v29  ;;  %v1895_v9 = vshll.u32 %v3103_v3, 16  ;;  %v218_v3 = vld [vmem:[#allocation2 + $0x20] sm:$0xff] }
  0x64   : > { %v1877_v4 = vrot.slane %v1875_v61, 2 }
  0x65   : > { %v1897_v13 = vrot.slane %v1895_v9, 3  ;;  %v226_v9 = vld [vmem:[#allocation2 + $0x60] sm:$0xf] }
  0x66   : > { %v1881_v10 = vor.u32 %v1880_v5, %v1877_v4 }
  0x68   : > { %2883 = vmatmul.mubr.msk.bf16.vlgmr.msra.gmra.mxu0 %vm281_vm1, %v1188_v34  ;;  %2857 = vmatmul.mubr.msk.bf16.gmra.mxu1 %vm281_vm1, %v959_v39  ;;  %v3092_v34 = vld [vmem:[%s3175_s22 + $0x1c] sm:$0xff]  }
  0x69   : > { %2941 = vmatpush3.bf16.msra.mxu0 %v3075_v35  ;;  %2860 = vmatprep.mubr.msk.bf16.mxu1 %vm3124_vm0, %v3123_v1  ;;  %v1657_v35 = vrot.slane %v3093_v32, 2  ;;  %v1443_v36 = vrot.slane %v3092_v34, 2  ;;  %v223_v32 = vld [vmem:[#allocation2 + $0x48] sm:$0xff] }
  0x6a   : > { %2886 = vmatprep.mubr.msk.bf16.mxu0 %vm3124_vm0, %v3123_v1  ;;  %3000 = vmatprep.subr.bf16.mxu0 %v3123_v1 }
  0x6b   : > { %v1658_v37 = vsel %vm1437_vm7, %v1655_v28, %v1657_v35  ;;  %v1444_v39 = vsel %vm1437_vm7, %v1441_v29, %v1443_v36  ;;  %v1660_v43 = vsel %vm1437_vm7, %v1657_v35, %v1659_v41  ;;  %v215_v28 = vld [vmem:[#allocation2 + $0x8] sm:$0xff]  ;;  %v1901_v29 = vshrl.u32 %v3106_v18, 16 }
  0x70   : > { %2887 = vmatmul.mubr.msk.bf16.gmra.mxu0 %vm281_vm1, %v1197_v45  ;;  %2861 = vmatmul.mubr.msk.bf16.gmra.mxu1 %vm281_vm1, %v961_v49  ;;  %v1446_v45 = vsel %vm1437_vm7, %v1443_v36, %v1445_v42  ;;  %v1662_v49 = vsel %vm1437_vm7, %v1659_v41, %v1661_v47  ;;  %v1903_v42 = vrot.slane %v1901_v29, 2 }
  0x71   : > { %2890 = vmatprep.mubr.msk.bf16.mxu0 %vm3124_vm0, %v3123_v1  ;;  %2864 = vmatprep.mubr.msk.bf16.mxu1 %vm3124_vm0, %v3123_v1 }
  0x78   : > { %2891 = vmatmul.mubr.msk.bf16.gmra.mxu0 %vm281_vm1, %v1206_v55  ;;  %2865 = vmatmul.mubr.msk.bf16.gmra.mxu1 %vm281_vm1, %v963_v59  ;;  %v1664_v55 = vsel %vm1437_vm7, %v1661_v47, %v1663_v53  ;;  %v3102_v59 = vld [vmem:[%s3175_s22 + $0x10] sm:$0xff]  }
  0x79   : > { %2894 = vmatprep.mubr.msk.bf16.mxu0 %vm3124_vm0, %v3123_v1  ;;  %2868 = vmatprep.mubr.msk.bf16.mxu1 %vm3124_vm0, %v3123_v1  ;;  %v1883_v63 = vshrl.u32 %v3102_v59, 16  ;;  %v1886_v0 = vshll.u32 %v3102_v59, 16 }
  0x7b   : > { %v1888_v7 = vrot.slane %v1886_v0, 3 }
  0x80   : > { %2895 = vmatmul.mubr.msk.bf16.gmra.mxu0 %vm281_vm1, %v1215_v2  ;;  %2869 = vmatmul.mubr.msk.bf16.gmra.mxu1 %vm281_vm1, %v965_v6  ;;  %v1666_v2 = vsel %vm1437_vm7, %v1663_v53, %v1665_v60  ;;  %v1885_v6 = vrot.slane %v1883_v63, 2  ;;  %v217_v53 = vld [vmem:[#allocation2 + $0x18] sm:$0xff]  ;;  %v3499_v63 = vld [vmem:[%s3175_s22 + $0x20] sm:$0xff]  }
  0x81   : > { %2898 = vmatprep.mubr.msk.bf16.mxu0 %vm3124_vm0, %v3123_v1  ;;  %2872 = vmatprep.mubr.msk.bf16.mxu1 %vm3124_vm0, %v3123_v1 }
  0x88   : > { %2899 = vmatmul.mubr.msk.bf16.gmra.mxu0 %vm281_vm1, %v1224_v12  ;;  %2873 = vmatmul.mubr.msk.bf16.gmra.mxu1 %vm281_vm1, %v967_v15  ;;  %v1894_v12 = vrot.slane %v1892_v8, 2  ;;  %v3467_v15 = vld [vmem:[%s3175_s22 + $0x10] sm:$0xff]  }
  0x89   : > { %2902 = vmatprep.mubr.msk.bf16.mxu0 %vm3124_vm0, %v3123_v1  ;;  %2876 = vmatprep.mubr.msk.bf16.mxu1 %vm3124_vm0, %v3123_v1 }
  0x8a   : > { %v1898_v23 = vor.u32 %v1897_v13, %v1894_v12  ;;  %v2148_v13 = vrot.slane %v3499_v63, 3 }
  0x90   : > { %2903 = vmatmul.mubr.msk.bf16.gmra.mxu0 %vm281_vm1, %v1233_v17  ;;  %2877 = vmatmul.mubr.msk.bf16.gmra.mxu1 %vm281_vm1, %v966_v11  ;;  %v1889_v11 = vor.u32 %v1888_v7, %v1885_v6  ;;  %v1915_v6 = vrot.slane %v1913_v56, 3  ;;  %v3110_v7 = vld [vmem:[%s3175_s22 + $0x30] sm:$0xff]  }
  0x91   : > { %2906 = vmatprep.mubr.msk.bf16.mxu0 %vm3124_vm0, %v3123_v1  ;;  %2912 = vmatprep.mubr.msk.bf16.mxu1 %vm3124_vm0, %v3123_v1 }
  0x92   : > { %v1890_v17 = vsel %vm1873_vm8, %v1881_v10, %v1889_v11  ;;  %v1899_v41 = vsel %vm1873_vm8, %v1889_v11, %v1898_v23 }
  0x98   : > { %2907 = vmatmul.mubr.msk.bf16.gmra.mxu0 %vm281_vm1, %v1232_v16  ;;  %2913 = vmatmul.mubr.msk.bf16.vlgmr.msra.gmra.mxu1 %vm281_vm1, %v1440_v24  ;;  %v214_v16 = vld [vmem:[#allocation2] sm:$0xff]  ;;  %v2143_v24 = vrot.slane %v3104_v14, 3 }
  0x99   : > { %2942 = vmatprep.mubr.msk.bf16.mxu0 %vm3124_vm0, %v3123_v1  ;;  %2971 = vmatpush3.bf16.msra.mxu1 %v3087_v25  ;;  %v2144_v25 = vrot.slane %v3467_v15, 3 }
  0x9a   : > { %2916 = vmatprep.mubr.msk.bf16.mxu1 %vm3124_vm0, %v3123_v1 }
  0x9b   : > { %v2145_v36 = vsel %vm2142_vm9, %v2143_v24, %v2144_v25 }
  0xa0   : > { %2943 = vmatmul.mubr.msk.bf16.vlgmr.msra.gmra.mxu0 %vm281_vm1, %v1656_v30  ;;  %2917 = vmatmul.mubr.msk.bf16.gmra.mxu1 %vm281_vm1, %v1442_v33  ;;  %v1904_v30 = vshll.u32 %v3106_v18, 16  ;;  %v1919_v18 = vshrl.u32 %v3110_v7, 16 }
  0xa1   : > { %3001 = vmatpush3.bf16.msra.mxu0 %v3091_v31  ;;  %2920 = vmatprep.mubr.msk.bf16.mxu1 %vm3124_vm0, %v3123_v1 }
  0xa2   : > { %2946 = vmatprep.mubr.msk.bf16.mxu0 %vm3124_vm0, %v3123_v1  ;;  %v1921_v29 = vrot.slane %v1919_v18, 2 }
  0xa8   : > { %2947 = vmatmul.mubr.msk.bf16.gmra.mxu0 %vm281_vm1, %v1658_v37  ;;  %2921 = vmatmul.mubr.msk.bf16.gmra.mxu1 %vm281_vm1, %v1444_v39  ;;  %v3482_v37 = vld [vmem:[%s3175_s22 + $0x18] sm:$0xff]  }
  0xa9   : > { %2950 = vmatprep.mubr.msk.bf16.mxu0 %vm3124_vm0, %v3123_v1  ;;  %2924 = vmatprep.mubr.msk.bf16.mxu1 %vm3124_vm0, %v3123_v1  ;;  %v2146_v50 = vrot.slane %v3482_v37, 3 }
  0xab   : > { %v2147_v62 = vsel %vm2142_vm9, %v2144_v25, %v2146_v50  ;;  %v2149_v24 = vsel %vm2142_vm9, %v2146_v50, %v2148_v13  ;;  %v3111_v25 = vld [vmem:[%s3175_s22 + $0x28] sm:$0xff]   ;;  %v3113_v50 = vld [vmem:[%s3175_s22 + $0x30] sm:$0xff]  }
  0xac   : > { %v2150_v37 = vrot.slane %v3111_v25, 3 }
  0xb0   : > { %2951 = vmatmul.mubr.msk.bf16.gmra.mxu0 %vm281_vm1, %v1660_v43  ;;  %2925 = vmatmul.mubr.msk.bf16.gmra.mxu1 %vm281_vm1, %v1446_v45  ;;  %v1906_v43 = vrot.slane %v1904_v30, 3 }
  0xb1   : > { %2954 = vmatprep.mubr.msk.bf16.mxu0 %vm3124_vm0, %v3123_v1  ;;  %2928 = vmatprep.mubr.msk.bf16.mxu1 %vm3124_vm0, %v3123_v1 }
  0xb8   : > { %2955 = vmatmul.mubr.msk.bf16.gmra.mxu0 %vm281_vm1, %v1662_v49  ;;  %2929 = vmatmul.mubr.msk.bf16.gmra.mxu1 %vm281_vm1, %v1448_v51 }
  0xb9   : > { %2958 = vmatprep.mubr.msk.bf16.mxu0 %vm3124_vm0, %v3123_v1  ;;  %2932 = vmatprep.mubr.msk.bf16.mxu1 %vm3124_vm0, %v3123_v1 }
  0xc0   : > { %2959 = vmatmul.mubr.msk.bf16.gmra.mxu0 %vm281_vm1, %v1664_v55  ;;  %2933 = vmatmul.mubr.msk.bf16.gmra.mxu1 %vm281_vm1, %v1450_v57  ;;  %v1910_v55 = vshrl.u32 %v3108_v44, 16 }
  0xc1   : > { %2962 = vmatprep.mubr.msk.bf16.mxu0 %vm3124_vm0, %v3123_v1  ;;  %2936 = vmatprep.mubr.msk.bf16.mxu1 %vm3124_vm0, %v3123_v1 }
  0xc2   : > { %v1912_v5 = vrot.slane %v1910_v55, 2 }
  0xc8   : > { %2963 = vmatmul.mubr.msk.bf16.gmra.mxu0 %vm281_vm1, %v1666_v2  ;;  %2937 = vmatmul.mubr.msk.bf16.gmra.mxu1 %vm281_vm1, %v1449_v54  ;;  %v1907_v54 = vor.u32 %v1906_v43, %v1903_v42 }
  0xc9   : > { %2966 = vmatprep.mubr.msk.bf16.mxu0 %vm3124_vm0, %v3123_v1  ;;  %2972 = vmatprep.mubr.msk.bf16.mxu1 %vm3124_vm0, %v3123_v1 }
  0xca   : > { %v1908_v4 = vsel %vm1873_vm8, %v1898_v23, %v1907_v54 }
  0xd0   : > { %v337_v20 = vpop.f32.mrf.mxu0  ;;  %2967 = vmatmul.mubr.msk.bf16.gmra.mxu0 %vm281_vm1, %v1665_v60  ;;  %v369_v22 = vpop.f32.mrf.mxu1  ;;  %2973 = vmatmul.mubr.msk.bf16.vlgmr.msra.gmra.mxu1 %vm281_vm1, %v1890_v17  ;;  %v1916_v17 = vor.u32 %v1915_v6, %v1912_v5 }
  0xd1   : > { %v391_v21 = vadd.f32 %v337_v20, %v214_v16  ;;  %3002 = vmatprep.mubr.msk.bf16.mxu0 %vm3124_vm0, %v3123_v1  ;;  %v399_v26 = vadd.f32 %v369_v22, %v222_v19  ;;  %2976 = vmatprep.mubr.msk.bf16.mxu1 %vm3124_vm0, %v3123_v1  ;;  %v219_v16 = vld [vmem:[#allocation2 + $0x28] sm:$0xff]  ;;  %v1922_v19 = vshll.u32 %v3110_v7, 16 }
  0xd2   : > { %v2764_v27 = vpop.f32.mrf.mxu0  ;;  %v2780_v31 = vpop.f32.mrf.mxu1 }
  0xd3   : > { %404 = vst.msk [vmem:[#allocation2] sm:$0xff] %vm199_vm4, %v391_v21  ;;  %412 = vst.msk [vmem:[#allocation2 + $0x40] sm:$0xff] %vm199_vm4, %v399_v26  ;;  %v220_v27 = vld [vmem:[#allocation2 + $0x30] sm:$0xff]  ;;  %v1924_v30 = vrot.slane %v1922_v19, 3  ;;  %v3112_v31 = vld [vmem:[%s3175_s22 + $0x38] sm:$0x1f]  }
  0xd4   : > { %v340_v33 = vpop.f32.mrf.mxu0  ;;  %v372_v35 = vpop.f32.mrf.mxu1  ;;  %v1928_v42 = vshrl.u32 %v3112_v31, 16  ;;  %v1931_v43 = vshll.u32 %v3112_v31, 16 }
  0xd5   : > { %v392_v34 = vadd.f32 %v340_v33, %v215_v28  ;;  %v400_v38 = vadd.f32 %v372_v35, %v223_v32  ;;  %v1917_v28 = vsel %vm1873_vm8, %v1907_v54, %v1916_v17 }
  0xd6   : > { %v2765_v39 = vpop.f32.mrf.mxu0  ;;  %v2781_v45 = vpop.f32.mrf.mxu1  ;;  %v1930_v54 = vrot.slane %v1928_v42, 2  ;;  %v1933_v55 = vrot.slane %v1931_v43, 3 }
  0xd7   : > { %405 = vst.msk [vmem:[#allocation2 + $0x8] sm:$0xff] %vm199_vm4, %v392_v34  ;;  %413 = vst.msk [vmem:[#allocation2 + $0x48] sm:$0xff] %vm199_vm4, %v400_v38 }
  0xd8   : > { %v345_v47 = vpop.f32.mrf.mxu0  ;;  %3003 = vmatmul.mubr.msk.bf16.vlgmr.msra.gmra.mxu0 %vm281_vm1, %v2145_v36  ;;  %v377_v49 = vpop.f32.mrf.mxu1  ;;  %2977 = vmatmul.mubr.msk.bf16.gmra.mxu1 %vm281_vm1, %v1899_v41  ;;  %v1925_v41 = vor.u32 %v1924_v30, %v1921_v29  ;;  %v1934_v63 = vor.u32 %v1933_v55, %v1930_v54 }
  0xd9   : > { %v393_v48 = vadd.f32 %v345_v47, %v216_v40  ;;  %3006 = vmatprep.mubr.msk.bf16.mxu0 %vm3124_vm0, %v3123_v1  ;;  %v401_v51 = vadd.f32 %v377_v49, %v224_v46  ;;  %2980 = vmatprep.mubr.msk.bf16.mxu1 %vm3124_vm0, %v3123_v1  ;;  %v221_v40 = vld [vmem:[#allocation2 + $0x38] sm:$0xff]  ;;  %v2151_v49 = vsel %vm2142_vm9, %v2148_v13, %v2150_v37 }
  0xda   : > { %v2768_v52 = vpop.f32.mrf.mxu0  ;;  %v2784_v57 = vpop.f32.mrf.mxu1  ;;  %v417_v35 = vld [vmem:[#allocation2] sm:$0xff] }
  0xdb   : > { %406 = vst.msk [vmem:[#allocation2 + $0x10] sm:$0xff] %vm199_vm4, %v393_v48  ;;  %414 = vst.msk [vmem:[#allocation2 + $0x50] sm:$0xff] %vm199_vm4, %v401_v51 }
  0xdc   : > { %v348_v59 = vpop.f32.mrf.mxu0  ;;  %v380_v61 = vpop.f32.mrf.mxu1 }
  0xdd   : > { %v394_v60 = vadd.f32 %v348_v59, %v217_v53  ;;  %v402_v0 = vadd.f32 %v380_v61, %v225_v58  ;;  %v1926_v53 = vsel %vm1873_vm8, %v1916_v17, %v1925_v41 }
  0xde   : > { %v2769_v2 = vpop.f32.mrf.mxu0  ;;  %v2785_v8 = vpop.f32.mrf.mxu1  ;;  %v418_v47 = vld [vmem:[#allocation2 + $0x8] sm:$0xff] }
  0xdf   : > { %407 = vst.msk [vmem:[#allocation2 + $0x18] sm:$0xff] %vm199_vm4, %v394_v60  ;;  %415 = vst.msk [vmem:[#allocation2 + $0x58] sm:$0xff] %vm199_vm4, %v402_v0  ;;  %v2152_v60 = vrot.slane %v3113_v50, 3  ;;  %v3114_v8 = vld [vmem:[%s3175_s22 + $0x38] sm:$0x1f]  }
  0xe0   : > { %v353_v10 = vpop.f32.mrf.mxu0  ;;  %3007 = vmatmul.mubr.msk.bf16.gmra.mxu0 %vm281_vm1, %v2147_v62  ;;  %v385_v12 = vpop.f32.mrf.mxu1  ;;  %2981 = vmatmul.mubr.msk.bf16.gmra.mxu1 %vm281_vm1, %v1908_v4  ;;  %v2154_v18 = vrot.slane %v3114_v8, 3 }
  0xe1   : > { %v395_v11 = vadd.f32 %v353_v10, %v218_v3  ;;  %3010 = vmatprep.mubr.msk.bf16.mxu0 %vm3124_vm0, %v3123_v1  ;;  %v403_v14 = vadd.f32 %v385_v12, %v226_v9  ;;  %2984 = vmatprep.mubr.msk.bf16.mxu1 %vm3124_vm0, %v3123_v1  ;;  %v2153_v7 = vsel %vm2142_vm9, %v2150_v37, %v2152_v60 }
  0xe2   : > { %v2772_v15 = vpop.f32.mrf.mxu0  ;;  %v2788_v20 = vpop.f32.mrf.mxu1  ;;  %v419_v58 = vld [vmem:[#allocation2 + $0x10] sm:$0xff] }
  0xe3   : > { %408 = vst.msk [vmem:[#allocation2 + $0x20] sm:$0xff] %vm199_vm4, %v395_v11  ;;  %v1935_v11 = vsel %vm1873_vm8, %v1925_v41, %v1934_v63  ;;  %vm2441_vm8 = vcmask 58368  }
  0xe4   : > { %416 = vst.msk [vmem:[#allocation2 + $0x60] sm:$0xf] %vm212_vm5, %v403_v14  ;;  %v356_v21 = vpop.f32.mrf.mxu0  ;;  %v388_v23 = vpop.f32.mrf.mxu1 }
  0xe5   : > { %v396_v22 = vadd.f32 %v356_v21, %v219_v16 }
  0xe6   : > { %v2773_v26 = vpop.f32.mrf.mxu0  ;;  %v2789_v32 = vpop.f32.mrf.mxu1  ;;  %v420_v5 = vld [vmem:[#allocation2 + $0x18] sm:$0xff] }
  0xe7   : > { %409 = vst.msk [vmem:[#allocation2 + $0x28] sm:$0xff] %vm199_vm4, %v396_v22 }
  0xe8   : > { %v361_v33 = vpop.f32.mrf.mxu0  ;;  %3011 = vmatmul.mubr.msk.bf16.gmra.mxu0 %vm281_vm1, %v2149_v24  ;;  %v596_v36 = vpop.f32.mrf.mxu1  ;;  %2985 = vmatmul.mubr.msk.bf16.gmra.mxu1 %vm281_vm1, %v1917_v28 }
  0xe9   : > { %v397_v34 = vadd.f32 %v361_v33, %v220_v27  ;;  %3014 = vmatprep.mubr.msk.bf16.mxu0 %vm3124_vm0, %v3123_v1  ;;  %v650_v38 = vadd.f32 %v596_v36, %v417_v35  ;;  %2988 = vmatprep.mubr.msk.bf16.mxu1 %vm3124_vm0, %v3123_v1  ;;  %v2155_v27 = vsel %vm2142_vm9, %v2152_v60, %v2154_v18 }
  0xea   : > { %v2776_v39 = vpop.f32.mrf.mxu0  ;;  %v2794_v44 = vpop.f32.mrf.mxu1  ;;  %v421_v16 = vld [vmem:[#allocation2 + $0x20] sm:$0xff] }
  0xeb   : > { %410 = vst.msk [vmem:[#allocation2 + $0x30] sm:$0xff] %vm199_vm4, %v397_v34  ;;  %663 = vst.msk [vmem:[#allocation2] sm:$0xff] %vm199_vm4, %v650_v38 }
  0xec   : > { %v364_v45 = vpop.f32.mrf.mxu0  ;;  %v599_v48 = vpop.f32.mrf.mxu1 }
  0xed   : > { %v398_v46 = vadd.f32 %v364_v45, %v221_v40  ;;  %v651_v51 = vadd.f32 %v599_v48, %v418_v47 }
  0xee   : > { %v2777_v52 = vpop.f32.mrf.mxu0  ;;  %v2795_v56 = vpop.f32.mrf.mxu1  ;;  %v422_v25 = vld [vmem:[#allocation2 + $0x28] sm:$0xff] }
  0xef   : > { %411 = vst.msk [vmem:[#allocation2 + $0x38] sm:$0xff] %vm199_vm4, %v398_v46  ;;  %664 = vst.msk [vmem:[#allocation2 + $0x8] sm:$0xff] %vm199_vm4, %v651_v51 }
  0xf0   : > { %v813_v57 = vpop.f32.mrf.mxu0  ;;  %3015 = vmatmul.mubr.msk.bf16.gmra.mxu0 %vm281_vm1, %v2151_v49  ;;  %v604_v59 = vpop.f32.mrf.mxu1  ;;  %2989 = vmatmul.mubr.msk.bf16.gmra.mxu1 %vm281_vm1, %v1926_v53  ;;  %v425_v49 = vld [vmem:[#allocation2 + $0x40] sm:$0xff] }
  0xf1   : > { %3018 = vmatprep.mubr.msk.bf16.mxu0 %vm3124_vm0, %v3123_v1  ;;  %v652_v61 = vadd.f32 %v604_v59, %v419_v58  ;;  %2992 = vmatprep.mubr.msk.bf16.mxu1 %vm3124_vm0, %v3123_v1 }
  0xf2   : > { %v2824_v62 = vpop.f32.mrf.mxu0  ;;  %v676_v0 = vld [vmem:[#allocation2] sm:$0xff]  ;;  %v2798_v2 = vpop.f32.mrf.mxu1  ;;  %v423_v34 = vld [vmem:[#allocation2 + $0x30] sm:$0xff] }
  0xf3   : > { %665 = vst.msk [vmem:[#allocation2 + $0x10] sm:$0xff] %vm199_vm4, %v652_v61  ;;  %v867_v3 = vadd.f32 %v813_v57, %v676_v0  ;;  %v426_v57 = vld [vmem:[#allocation2 + $0x48] sm:$0xff]  ;;  %v427_v2 = vld [vmem:[#allocation2 + $0x50] sm:$0xff] }
  0xf4   : > { %v816_v4 = vpop.f32.mrf.mxu0  ;;  %v607_v6 = vpop.f32.mrf.mxu1 }
  0xf5   : > { %880 = vst.msk [vmem:[#allocation2] sm:$0xff] %vm199_vm4, %v867_v3  ;;  %v653_v9 = vadd.f32 %v607_v6, %v420_v5 }
  0xf6   : > { %v2825_v10 = vpop.f32.mrf.mxu0  ;;  %v677_v12 = vld [vmem:[#allocation2 + $0x8] sm:$0xff]  ;;  %v2799_v13 = vpop.f32.mrf.mxu1  ;;  %v424_v42 = vld [vmem:[#allocation2 + $0x38] sm:$0xff] }
  0xf7   : > { %666 = vst.msk [vmem:[#allocation2 + $0x18] sm:$0xff] %vm199_vm4, %v653_v9  ;;  %v868_v14 = vadd.f32 %v816_v4, %v677_v12  ;;  %v428_v10 = vld [vmem:[#allocation2 + $0x58] sm:$0xff] }
  0xf8   : > { %v821_v15 = vpop.f32.mrf.mxu0  ;;  %3019 = vmatmul.mubr.msk.bf16.gmra.mxu0 %vm281_vm1, %v2153_v7  ;;  %v612_v17 = vpop.f32.mrf.mxu1  ;;  %2993 = vmatmul.mubr.msk.bf16.gmra.mxu1 %vm281_vm1, %v1935_v11 }
  0xf9   : > { %3022 = vmatprep.mubr.msk.bf16.mxu0 %vm3124_vm0, %v3123_v1  ;;  %881 = vst.msk [vmem:[#allocation2 + $0x8] sm:$0xff] %vm199_vm4, %v868_v14  ;;  %v654_v19 = vadd.f32 %v612_v17, %v421_v16  ;;  %2996 = vmatprep.mubr.msk.bf16.mxu1 %vm3124_vm0, %v3123_v1 }
  0xfa   : > { %v2828_v20 = vpop.f32.mrf.mxu0  ;;  %v678_v21 = vld [vmem:[#allocation2 + $0x10] sm:$0xff]  ;;  %v2802_v22 = vpop.f32.mrf.mxu1 }
  0xfb   : > { %667 = vst.msk [vmem:[#allocation2 + $0x20] sm:$0xff] %vm199_vm4, %v654_v19  ;;  %v869_v23 = vadd.f32 %v821_v15, %v678_v21 }
  0xfc   : > { %v824_v24 = vpop.f32.mrf.mxu0  ;;  %v615_v26 = vpop.f32.mrf.mxu1 }
  0xfd   : > { %882 = vst.msk [vmem:[#allocation2 + $0x10] sm:$0xff] %vm199_vm4, %v869_v23  ;;  %v655_v28 = vadd.f32 %v615_v26, %v422_v25 }
  0xfe   : > { %v2829_v29 = vpop.f32.mrf.mxu0  ;;  %v679_v30 = vld [vmem:[#allocation2 + $0x18] sm:$0xff]  ;;  %v2803_v31 = vpop.f32.mrf.mxu1 }
  0xff   : > { %668 = vst.msk [vmem:[#allocation2 + $0x28] sm:$0xff] %vm199_vm4, %v655_v28  ;;  %v870_v32 = vadd.f32 %v824_v24, %v679_v30 }
 0x100   : > { %v829_v33 = vpop.f32.mrf.mxu0  ;;  %3023 = vmatmul.mubr.msk.bf16.gmra.mxu0 %vm281_vm1, %v2155_v27  ;;  %v620_v35 = vpop.f32.mrf.mxu1  ;;  %2997 = vmatmul.mubr.msk.bf16.gmra.mxu1 %vm281_vm1, %v1934_v63 }
 0x101   : > { %3026 = vmatprep.mubr.msk.bf16.mxu0 %vm3124_vm0, %v3123_v1  ;;  %883 = vst.msk [vmem:[#allocation2 + $0x18] sm:$0xff] %vm199_vm4, %v870_v32  ;;  %v656_v36 = vadd.f32 %v620_v35, %v423_v34  ;;  %v893_v32 = vld [vmem:[#allocation2] sm:$0xff] }
 0x102   : > { %v2832_v37 = vpop.f32.mrf.mxu0  ;;  %v680_v38 = vld [vmem:[#allocation2 + $0x20] sm:$0xff]  ;;  %v2806_v39 = vpop.f32.mrf.mxu1 }
 0x103   : > { %669 = vst.msk [vmem:[#allocation2 + $0x30] sm:$0xff] %vm199_vm4, %v656_v36  ;;  %v871_v40 = vadd.f32 %v829_v33, %v680_v38 }
 0x104   : > { %v832_v41 = vpop.f32.mrf.mxu0  ;;  %v623_v43 = vpop.f32.mrf.mxu1 }
 0x105   : > { %884 = vst.msk [vmem:[#allocation2 + $0x20] sm:$0xff] %vm199_vm4, %v871_v40  ;;  %v657_v44 = vadd.f32 %v623_v43, %v424_v42  ;;  %v894_v40 = vld [vmem:[#allocation2 + $0x8] sm:$0xff] }
 0x106   : > { %v2833_v45 = vpop.f32.mrf.mxu0  ;;  %v681_v46 = vld [vmem:[#allocation2 + $0x28] sm:$0xff]  ;;  %v2807_v47 = vpop.f32.mrf.mxu1 }
 0x107   : > { %670 = vst.msk [vmem:[#allocation2 + $0x38] sm:$0xff] %vm199_vm4, %v657_v44  ;;  %v872_v1 = vadd.f32 %v832_v41, %v681_v46  ;;  %v895_v46 = vld [vmem:[#allocation2 + $0x10] sm:$0xff] }
 0x108   : > { %v837_v48 = vpop.f32.mrf.mxu0  ;;  %3027 = vmatmul.mubr.msk.bf16.gmra.mxu0 %vm281_vm1, %v2154_v18  ;;  %v628_v50 = vpop.f32.mrf.mxu1  ;;  %v429_v18 = vld [vmem:[#allocation2 + $0x60] sm:$0xf] }
 0x109   : > { %885 = vst.msk [vmem:[#allocation2 + $0x28] sm:$0xff] %vm199_vm4, %v872_v1  ;;  %v658_v51 = vadd.f32 %v628_v50, %v425_v49 }
 0x10a   : > { %v2836_v52 = vpop.f32.mrf.mxu0  ;;  %v682_v53 = vld [vmem:[#allocation2 + $0x30] sm:$0xff]  ;;  %v2810_v54 = vpop.f32.mrf.mxu1 }
 0x10b   : > { %671 = vst.msk [vmem:[#allocation2 + $0x40] sm:$0xff] %vm199_vm4, %v658_v51  ;;  %v873_v55 = vadd.f32 %v837_v48, %v682_v53  ;;  %v896_v53 = vld [vmem:[#allocation2 + $0x18] sm:$0xff] }
 0x10c   : > { %v840_v56 = vpop.f32.mrf.mxu0  ;;  %v631_v58 = vpop.f32.mrf.mxu1 }
 0x10d   : > { %886 = vst.msk [vmem:[#allocation2 + $0x30] sm:$0xff] %vm199_vm4, %v873_v55  ;;  %v659_v59 = vadd.f32 %v631_v58, %v426_v57 }
 0x10e   : > { %v2837_v60 = vpop.f32.mrf.mxu0  ;;  %v683_v61 = vld [vmem:[#allocation2 + $0x38] sm:$0xff]  ;;  %v2811_v62 = vpop.f32.mrf.mxu1 }
 0x10f   : > { %672 = vst.msk [vmem:[#allocation2 + $0x48] sm:$0xff] %vm199_vm4, %v659_v59  ;;  %v874_v63 = vadd.f32 %v840_v56, %v683_v61  ;;  %v897_v61 = vld [vmem:[#allocation2 + $0x20] sm:$0xff] }
 0x110   : > { %v845_v0 = vpop.f32.mrf.mxu0  ;;  %v636_v3 = vpop.f32.mrf.mxu1 }
 0x111   : > { %887 = vst.msk [vmem:[#allocation2 + $0x38] sm:$0xff] %vm199_vm4, %v874_v63  ;;  %v660_v4 = vadd.f32 %v636_v3, %v427_v2 }
 0x112   : > { %v2840_v5 = vpop.f32.mrf.mxu0  ;;  %v684_v6 = vld [vmem:[#allocation2 + $0x40] sm:$0xff]  ;;  %v2814_v7 = vpop.f32.mrf.mxu1 }
 0x113   : > { %673 = vst.msk [vmem:[#allocation2 + $0x50] sm:$0xff] %vm199_vm4, %v660_v4  ;;  %v875_v8 = vadd.f32 %v845_v0, %v684_v6  ;;  %v898_v6 = vld [vmem:[#allocation2 + $0x28] sm:$0xff] }
 0x114   : > { %v848_v9 = vpop.f32.mrf.mxu0  ;;  %v639_v11 = vpop.f32.mrf.mxu1 }
 0x115   : > { %888 = vst.msk [vmem:[#allocation2 + $0x40] sm:$0xff] %vm199_vm4, %v875_v8  ;;  %v661_v12 = vadd.f32 %v639_v11, %v428_v10 }
 0x116   : > { %v2841_v13 = vpop.f32.mrf.mxu0  ;;  %v685_v14 = vld [vmem:[#allocation2 + $0x48] sm:$0xff]  ;;  %v2815_v15 = vpop.f32.mrf.mxu1 }
 0x117   : > { %674 = vst.msk [vmem:[#allocation2 + $0x58] sm:$0xff] %vm199_vm4, %v661_v12  ;;  %v876_v16 = vadd.f32 %v848_v9, %v685_v14  ;;  %v899_v14 = vld [vmem:[#allocation2 + $0x30] sm:$0xff] }
 0x118   : > { %v853_v17 = vpop.f32.mrf.mxu0  ;;  %v644_v19 = vpop.f32.mrf.mxu1 }
 0x119   : > { %889 = vst.msk [vmem:[#allocation2 + $0x48] sm:$0xff] %vm199_vm4, %v876_v16  ;;  %v662_v20 = vadd.f32 %v644_v19, %v429_v18 }
 0x11a   : > { %v2844_v21 = vpop.f32.mrf.mxu0  ;;  %v686_v22 = vld [vmem:[#allocation2 + $0x50] sm:$0xff]  ;;  %v2818_v23 = vpop.f32.mrf.mxu1 }
 0x11b   : > { %675 = vst.msk [vmem:[#allocation2 + $0x60] sm:$0xf] %vm212_vm5, %v662_v20  ;;  %v877_v24 = vadd.f32 %v853_v17, %v686_v22  ;;  %v900_v22 = vld [vmem:[#allocation2 + $0x38] sm:$0xff] }
 0x11c   : > { %v856_v25 = vpop.f32.mrf.mxu0  ;;  %v647_v26 = vpop.f32.mrf.mxu1 }
 0x11d   : > { %890 = vst.msk [vmem:[#allocation2 + $0x50] sm:$0xff] %vm199_vm4, %v877_v24 }
 0x11e   : > { %v2845_v27 = vpop.f32.mrf.mxu0  ;;  %v687_v28 = vld [vmem:[#allocation2 + $0x58] sm:$0xff]  ;;  %v2819_v29 = vpop.f32.mrf.mxu1 }
 0x11f   : > { %v878_v30 = vadd.f32 %v856_v25, %v687_v28 }
 0x120   : > { %v861_v31 = vpop.f32.mrf.mxu0  ;;  %v1029_v33 = vpop.f32.mrf.mxu1 }
 0x121   : > { %891 = vst.msk [vmem:[#allocation2 + $0x58] sm:$0xff] %vm199_vm4, %v878_v30  ;;  %v1083_v34 = vadd.f32 %v1029_v33, %v893_v32  ;;  %v901_v30 = vld [vmem:[#allocation2 + $0x40] sm:$0xff] }
 0x122   : > { %v2848_v35 = vpop.f32.mrf.mxu0  ;;  %v688_v36 = vld [vmem:[#allocation2 + $0x60] sm:$0xf]  ;;  %v2854_v37 = vpop.f32.mrf.mxu1 }
 0x123   : > { %v879_v38 = vadd.f32 %v861_v31, %v688_v36  ;;  %1096 = vst.msk [vmem:[#allocation2] sm:$0xff] %vm199_vm4, %v1083_v34 }
 0x124   : > { %v864_v39 = vpop.f32.mrf.mxu0  ;;  %v1032_v41 = vpop.f32.mrf.mxu1 }
 0x125   : > { %892 = vst.msk [vmem:[#allocation2 + $0x60] sm:$0xf] %vm212_vm5, %v879_v38  ;;  %v1084_v42 = vadd.f32 %v1032_v41, %v894_v40  ;;  %v902_v38 = vld [vmem:[#allocation2 + $0x48] sm:$0xff] }
 0x126   : > { %v2849_v43 = vpop.f32.mrf.mxu0  ;;  %v2855_v44 = vpop.f32.mrf.mxu1 }
 0x127   : > { %1097 = vst.msk [vmem:[#allocation2 + $0x8] sm:$0xff] %vm199_vm4, %v1084_v42 }
 0x128   : > { %v1295_v45 = vpop.f32.mrf.mxu0  ;;  %v1037_v47 = vpop.f32.mrf.mxu1 }
 0x129   : > { %v1085_v1 = vadd.f32 %v1037_v47, %v895_v46  ;;  %v903_v46 = vld [vmem:[#allocation2 + $0x50] sm:$0xff] }
 0x12a   : > { %v2884_v48 = vpop.f32.mrf.mxu0  ;;  %v1109_v49 = vld [vmem:[#allocation2] sm:$0xff]  ;;  %v2858_v50 = vpop.f32.mrf.mxu1 }
 0x12b   : > { %1098 = vst.msk [vmem:[#allocation2 + $0x10] sm:$0xff] %vm199_vm4, %v1085_v1  ;;  %v1349_v51 = vadd.f32 %v1295_v45, %v1109_v49 }
 0x12c   : > { %v1298_v52 = vpop.f32.mrf.mxu0  ;;  %v1040_v54 = vpop.f32.mrf.mxu1 }
 0x12d   : > { %1362 = vst.msk [vmem:[#allocation2] sm:$0xff] %vm199_vm4, %v1349_v51  ;;  %v1086_v55 = vadd.f32 %v1040_v54, %v896_v53  ;;  %v904_v53 = vld [vmem:[#allocation2 + $0x58] sm:$0xff] }
 0x12e   : > { %v2885_v56 = vpop.f32.mrf.mxu0  ;;  %v1110_v57 = vld [vmem:[#allocation2 + $0x8] sm:$0xff]  ;;  %v2859_v58 = vpop.f32.mrf.mxu1 }
 0x12f   : > { %1099 = vst.msk [vmem:[#allocation2 + $0x18] sm:$0xff] %vm199_vm4, %v1086_v55  ;;  %v1350_v59 = vadd.f32 %v1298_v52, %v1110_v57 }
 0x130   : > { %v1303_v60 = vpop.f32.mrf.mxu0  ;;  %v1045_v62 = vpop.f32.mrf.mxu1 }
 0x131   : > { %1363 = vst.msk [vmem:[#allocation2 + $0x8] sm:$0xff] %vm199_vm4, %v1350_v59  ;;  %v1087_v63 = vadd.f32 %v1045_v62, %v897_v61  ;;  %v905_v61 = vld [vmem:[#allocation2 + $0x60] sm:$0xf] }
 0x132   : > { %v2888_v0 = vpop.f32.mrf.mxu0  ;;  %v1111_v2 = vld [vmem:[#allocation2 + $0x10] sm:$0xff]  ;;  %v2862_v3 = vpop.f32.mrf.mxu1 }
 0x133   : > { %1100 = vst.msk [vmem:[#allocation2 + $0x20] sm:$0xff] %vm199_vm4, %v1087_v63  ;;  %v1351_v4 = vadd.f32 %v1303_v60, %v1111_v2 }
 0x134   : > { %v1306_v5 = vpop.f32.mrf.mxu0  ;;  %v1048_v7 = vpop.f32.mrf.mxu1 }
 0x135   : > { %1364 = vst.msk [vmem:[#allocation2 + $0x10] sm:$0xff] %vm199_vm4, %v1351_v4  ;;  %v1088_v8 = vadd.f32 %v1048_v7, %v898_v6 }
 0x136   : > { %v2889_v9 = vpop.f32.mrf.mxu0  ;;  %v1112_v10 = vld [vmem:[#allocation2 + $0x18] sm:$0xff]  ;;  %v2863_v11 = vpop.f32.mrf.mxu1 }
 0x137   : > { %1101 = vst.msk [vmem:[#allocation2 + $0x28] sm:$0xff] %vm199_vm4, %v1088_v8  ;;  %v1352_v12 = vadd.f32 %v1306_v5, %v1112_v10 }
 0x138   : > { %v1311_v13 = vpop.f32.mrf.mxu0  ;;  %v1053_v15 = vpop.f32.mrf.mxu1 }
 0x139   : > { %1365 = vst.msk [vmem:[#allocation2 + $0x18] sm:$0xff] %vm199_vm4, %v1352_v12  ;;  %v1089_v16 = vadd.f32 %v1053_v15, %v899_v14  ;;  %v1375_v12 = vld [vmem:[#allocation2] sm:$0xff] }
 0x13a   : > { %v2892_v17 = vpop.f32.mrf.mxu0  ;;  %v1113_v18 = vld [vmem:[#allocation2 + $0x20] sm:$0xff]  ;;  %v2866_v19 = vpop.f32.mrf.mxu1 }
 0x13b   : > { %1102 = vst.msk [vmem:[#allocation2 + $0x30] sm:$0xff] %vm199_vm4, %v1089_v16  ;;  %v1353_v20 = vadd.f32 %v1311_v13, %v1113_v18 }
 0x13c   : > { %v1314_v21 = vpop.f32.mrf.mxu0  ;;  %v1056_v23 = vpop.f32.mrf.mxu1 }
 0x13d   : > { %1366 = vst.msk [vmem:[#allocation2 + $0x20] sm:$0xff] %vm199_vm4, %v1353_v20  ;;  %v1090_v24 = vadd.f32 %v1056_v23, %v900_v22  ;;  %v1376_v20 = vld [vmem:[#allocation2 + $0x8] sm:$0xff] }
 0x13e   : > { %v2893_v25 = vpop.f32.mrf.mxu0  ;;  %v1114_v26 = vld [vmem:[#allocation2 + $0x28] sm:$0xff]  ;;  %v2867_v27 = vpop.f32.mrf.mxu1 }
 0x13f   : > { %1103 = vst.msk [vmem:[#allocation2 + $0x38] sm:$0xff] %vm199_vm4, %v1090_v24  ;;  %v1354_v28 = vadd.f32 %v1314_v21, %v1114_v26  ;;  %v1377_v26 = vld [vmem:[#allocation2 + $0x10] sm:$0xff] }
 0x140   : > { %v1319_v29 = vpop.f32.mrf.mxu0  ;;  %v1061_v31 = vpop.f32.mrf.mxu1 }
 0x141   : > { %1367 = vst.msk [vmem:[#allocation2 + $0x28] sm:$0xff] %vm199_vm4, %v1354_v28  ;;  %v1091_v32 = vadd.f32 %v1061_v31, %v901_v30 }
 0x142   : > { %v2896_v33 = vpop.f32.mrf.mxu0  ;;  %v1115_v34 = vld [vmem:[#allocation2 + $0x30] sm:$0xff]  ;;  %v2870_v35 = vpop.f32.mrf.mxu1 }
 0x143   : > { %1104 = vst.msk [vmem:[#allocation2 + $0x40] sm:$0xff] %vm199_vm4, %v1091_v32  ;;  %v1355_v36 = vadd.f32 %v1319_v29, %v1115_v34  ;;  %v1378_v34 = vld [vmem:[#allocation2 + $0x18] sm:$0xff] }
 0x144   : > { %v1322_v37 = vpop.f32.mrf.mxu0  ;;  %v1064_v39 = vpop.f32.mrf.mxu1 }
 0x145   : > { %1368 = vst.msk [vmem:[#allocation2 + $0x30] sm:$0xff] %vm199_vm4, %v1355_v36  ;;  %v1092_v40 = vadd.f32 %v1064_v39, %v902_v38 }
 0x146   : > { %v2897_v41 = vpop.f32.mrf.mxu0  ;;  %v1116_v42 = vld [vmem:[#allocation2 + $0x38] sm:$0xff]  ;;  %v2871_v43 = vpop.f32.mrf.mxu1 }
 0x147   : > { %1105 = vst.msk [vmem:[#allocation2 + $0x48] sm:$0xff] %vm199_vm4, %v1092_v40  ;;  %v1356_v44 = vadd.f32 %v1322_v37, %v1116_v42  ;;  %v1379_v42 = vld [vmem:[#allocation2 + $0x20] sm:$0xff] }
 0x148   : > { %v1327_v45 = vpop.f32.mrf.mxu0  ;;  %v1069_v47 = vpop.f32.mrf.mxu1 }
 0x149   : > { %1369 = vst.msk [vmem:[#allocation2 + $0x38] sm:$0xff] %vm199_vm4, %v1356_v44  ;;  %v1093_v1 = vadd.f32 %v1069_v47, %v903_v46 }
 0x14a   : > { %v2900_v48 = vpop.f32.mrf.mxu0  ;;  %v1117_v49 = vld [vmem:[#allocation2 + $0x40] sm:$0xff]  ;;  %v2874_v50 = vpop.f32.mrf.mxu1 }
 0x14b   : > { %1106 = vst.msk [vmem:[#allocation2 + $0x50] sm:$0xff] %vm199_vm4, %v1093_v1  ;;  %v1357_v51 = vadd.f32 %v1327_v45, %v1117_v49  ;;  %v1380_v49 = vld [vmem:[#allocation2 + $0x28] sm:$0xff] }
 0x14c   : > { %v1330_v52 = vpop.f32.mrf.mxu0  ;;  %v1072_v54 = vpop.f32.mrf.mxu1 }
 0x14d   : > { %1370 = vst.msk [vmem:[#allocation2 + $0x40] sm:$0xff] %vm199_vm4, %v1357_v51  ;;  %v1094_v55 = vadd.f32 %v1072_v54, %v904_v53 }
 0x14e   : > { %v2901_v56 = vpop.f32.mrf.mxu0  ;;  %v1118_v57 = vld [vmem:[#allocation2 + $0x48] sm:$0xff]  ;;  %v2875_v58 = vpop.f32.mrf.mxu1 }
 0x14f   : > { %1107 = vst.msk [vmem:[#allocation2 + $0x58] sm:$0xff] %vm199_vm4, %v1094_v55  ;;  %v1358_v59 = vadd.f32 %v1330_v52, %v1118_v57  ;;  %v1381_v57 = vld [vmem:[#allocation2 + $0x30] sm:$0xff] }
 0x150   : > { %v1335_v60 = vpop.f32.mrf.mxu0  ;;  %v1077_v62 = vpop.f32.mrf.mxu1 }
 0x151   : > { %1371 = vst.msk [vmem:[#allocation2 + $0x48] sm:$0xff] %vm199_vm4, %v1358_v59  ;;  %v1095_v63 = vadd.f32 %v1077_v62, %v905_v61 }
 0x152   : > { %v2904_v0 = vpop.f32.mrf.mxu0  ;;  %v1119_v2 = vld [vmem:[#allocation2 + $0x50] sm:$0xff]  ;;  %v2878_v3 = vpop.f32.mrf.mxu1 }
 0x153   : > { %1108 = vst.msk [vmem:[#allocation2 + $0x60] sm:$0xf] %vm212_vm5, %v1095_v63  ;;  %v1359_v4 = vadd.f32 %v1335_v60, %v1119_v2  ;;  %v1382_v2 = vld [vmem:[#allocation2 + $0x38] sm:$0xff] }
 0x154   : > { %v1338_v5 = vpop.f32.mrf.mxu0  ;;  %v1080_v6 = vpop.f32.mrf.mxu1 }
 0x155   : > { %1372 = vst.msk [vmem:[#allocation2 + $0x50] sm:$0xff] %vm199_vm4, %v1359_v4 }
 0x156   : > { %v2905_v7 = vpop.f32.mrf.mxu0  ;;  %v1120_v8 = vld [vmem:[#allocation2 + $0x58] sm:$0xff]  ;;  %v2879_v9 = vpop.f32.mrf.mxu1 }
 0x157   : > { %v1360_v10 = vadd.f32 %v1338_v5, %v1120_v8 }
 0x158   : > { %v1343_v11 = vpop.f32.mrf.mxu0  ;;  %v1512_v13 = vpop.f32.mrf.mxu1 }
 0x159   : > { %1373 = vst.msk [vmem:[#allocation2 + $0x58] sm:$0xff] %vm199_vm4, %v1360_v10  ;;  %v1566_v14 = vadd.f32 %v1512_v13, %v1375_v12  ;;  %v1383_v10 = vld [vmem:[#allocation2 + $0x40] sm:$0xff] }
 0x15a   : > { %v2908_v15 = vpop.f32.mrf.mxu0  ;;  %v1121_v16 = vld [vmem:[#allocation2 + $0x60] sm:$0xf]  ;;  %v2914_v17 = vpop.f32.mrf.mxu1 }
 0x15b   : > { %v1361_v18 = vadd.f32 %v1343_v11, %v1121_v16  ;;  %1579 = vst.msk [vmem:[#allocation2] sm:$0xff] %vm199_vm4, %v1566_v14 }
 0x15c   : > { %v1346_v19 = vpop.f32.mrf.mxu0  ;;  %v1515_v21 = vpop.f32.mrf.mxu1 }
 0x15d   : > { %1374 = vst.msk [vmem:[#allocation2 + $0x60] sm:$0xf] %vm212_vm5, %v1361_v18  ;;  %v1567_v22 = vadd.f32 %v1515_v21, %v1376_v20  ;;  %v1384_v18 = vld [vmem:[#allocation2 + $0x48] sm:$0xff] }
 0x15e   : > { %v2909_v23 = vpop.f32.mrf.mxu0  ;;  %v2915_v24 = vpop.f32.mrf.mxu1 }
 0x15f   : > { %1580 = vst.msk [vmem:[#allocation2 + $0x8] sm:$0xff] %vm199_vm4, %v1567_v22 }
 0x160   : > { %v1728_v25 = vpop.f32.mrf.mxu0  ;;  %v1520_v27 = vpop.f32.mrf.mxu1 }
 0x161   : > { %v1568_v28 = vadd.f32 %v1520_v27, %v1377_v26  ;;  %v1385_v26 = vld [vmem:[#allocation2 + $0x50] sm:$0xff] }
 0x162   : > { %v2944_v29 = vpop.f32.mrf.mxu0  ;;  %v1592_v30 = vld [vmem:[#allocation2] sm:$0xff]  ;;  %v2918_v31 = vpop.f32.mrf.mxu1 }
 0x163   : > { %1581 = vst.msk [vmem:[#allocation2 + $0x10] sm:$0xff] %vm199_vm4, %v1568_v28  ;;  %v1782_v32 = vadd.f32 %v1728_v25, %v1592_v30 }
 0x164   : > { %v1731_v33 = vpop.f32.mrf.mxu0  ;;  %v1523_v35 = vpop.f32.mrf.mxu1 }
 0x165   : > { %1795 = vst.msk [vmem:[#allocation2] sm:$0xff] %vm199_vm4, %v1782_v32  ;;  %v1569_v36 = vadd.f32 %v1523_v35, %v1378_v34  ;;  %v1386_v34 = vld [vmem:[#allocation2 + $0x58] sm:$0xff] }
 0x166   : > { %v2945_v37 = vpop.f32.mrf.mxu0  ;;  %v1593_v38 = vld [vmem:[#allocation2 + $0x8] sm:$0xff]  ;;  %v2919_v39 = vpop.f32.mrf.mxu1 }
 0x167   : > { %1582 = vst.msk [vmem:[#allocation2 + $0x18] sm:$0xff] %vm199_vm4, %v1569_v36  ;;  %v1783_v40 = vadd.f32 %v1731_v33, %v1593_v38 }
 0x168   : > { %v1736_v41 = vpop.f32.mrf.mxu0  ;;  %v1528_v43 = vpop.f32.mrf.mxu1 }
 0x169   : > { %1796 = vst.msk [vmem:[#allocation2 + $0x8] sm:$0xff] %vm199_vm4, %v1783_v40  ;;  %v1570_v44 = vadd.f32 %v1528_v43, %v1379_v42  ;;  %v1387_v42 = vld [vmem:[#allocation2 + $0x60] sm:$0xf] }
 0x16a   : > { %v2948_v45 = vpop.f32.mrf.mxu0  ;;  %v1594_v46 = vld [vmem:[#allocation2 + $0x10] sm:$0xff]  ;;  %v2922_v47 = vpop.f32.mrf.mxu1 }
 0x16b   : > { %1583 = vst.msk [vmem:[#allocation2 + $0x20] sm:$0xff] %vm199_vm4, %v1570_v44  ;;  %v1784_v1 = vadd.f32 %v1736_v41, %v1594_v46 }
 0x16c   : > { %v1739_v48 = vpop.f32.mrf.mxu0  ;;  %v1531_v50 = vpop.f32.mrf.mxu1 }
 0x16d   : > { %1797 = vst.msk [vmem:[#allocation2 + $0x10] sm:$0xff] %vm199_vm4, %v1784_v1  ;;  %v1571_v51 = vadd.f32 %v1531_v50, %v1380_v49 }
 0x16e   : > { %v2949_v52 = vpop.f32.mrf.mxu0  ;;  %v1595_v53 = vld [vmem:[#allocation2 + $0x18] sm:$0xff]  ;;  %v2923_v54 = vpop.f32.mrf.mxu1 }
 0x16f   : > { %1584 = vst.msk [vmem:[#allocation2 + $0x28] sm:$0xff] %vm199_vm4, %v1571_v51  ;;  %v1785_v55 = vadd.f32 %v1739_v48, %v1595_v53 }
 0x170   : > { %v1744_v56 = vpop.f32.mrf.mxu0  ;;  %v1536_v58 = vpop.f32.mrf.mxu1 }
 0x171   : > { %1798 = vst.msk [vmem:[#allocation2 + $0x18] sm:$0xff] %vm199_vm4, %v1785_v55  ;;  %v1572_v59 = vadd.f32 %v1536_v58, %v1381_v57  ;;  %v1808_v55 = vld [vmem:[#allocation2] sm:$0xff] }
 0x172   : > { %v2952_v60 = vpop.f32.mrf.mxu0  ;;  %v1596_v61 = vld [vmem:[#allocation2 + $0x20] sm:$0xff]  ;;  %v2926_v62 = vpop.f32.mrf.mxu1 }
 0x173   : > { %1585 = vst.msk [vmem:[#allocation2 + $0x30] sm:$0xff] %vm199_vm4, %v1572_v59  ;;  %v1786_v63 = vadd.f32 %v1744_v56, %v1596_v61 }
 0x174   : > { %v1747_v0 = vpop.f32.mrf.mxu0  ;;  %v1539_v3 = vpop.f32.mrf.mxu1 }
 0x175   : > { %1799 = vst.msk [vmem:[#allocation2 + $0x20] sm:$0xff] %vm199_vm4, %v1786_v63  ;;  %v1573_v4 = vadd.f32 %v1539_v3, %v1382_v2  ;;  %v1809_v63 = vld [vmem:[#allocation2 + $0x8] sm:$0xff] }
 0x176   : > { %v2953_v5 = vpop.f32.mrf.mxu0  ;;  %v1597_v6 = vld [vmem:[#allocation2 + $0x28] sm:$0xff]  ;;  %v2927_v7 = vpop.f32.mrf.mxu1 }
 0x177   : > { %1586 = vst.msk [vmem:[#allocation2 + $0x38] sm:$0xff] %vm199_vm4, %v1573_v4  ;;  %v1787_v8 = vadd.f32 %v1747_v0, %v1597_v6  ;;  %v1810_v6 = vld [vmem:[#allocation2 + $0x10] sm:$0xff] }
 0x178   : > { %v1752_v9 = vpop.f32.mrf.mxu0  ;;  %v1544_v11 = vpop.f32.mrf.mxu1 }
 0x179   : > { %1800 = vst.msk [vmem:[#allocation2 + $0x28] sm:$0xff] %vm199_vm4, %v1787_v8  ;;  %v1574_v12 = vadd.f32 %v1544_v11, %v1383_v10 }
 0x17a   : > { %v2956_v13 = vpop.f32.mrf.mxu0  ;;  %v1598_v14 = vld [vmem:[#allocation2 + $0x30] sm:$0xff]  ;;  %v2930_v15 = vpop.f32.mrf.mxu1 }
 0x17b   : > { %1587 = vst.msk [vmem:[#allocation2 + $0x40] sm:$0xff] %vm199_vm4, %v1574_v12  ;;  %v1788_v16 = vadd.f32 %v1752_v9, %v1598_v14  ;;  %v1811_v14 = vld [vmem:[#allocation2 + $0x18] sm:$0xff] }
 0x17c   : > { %v1755_v17 = vpop.f32.mrf.mxu0  ;;  %v1547_v19 = vpop.f32.mrf.mxu1 }
 0x17d   : > { %1801 = vst.msk [vmem:[#allocation2 + $0x30] sm:$0xff] %vm199_vm4, %v1788_v16  ;;  %v1575_v20 = vadd.f32 %v1547_v19, %v1384_v18 }
 0x17e   : > { %v2957_v21 = vpop.f32.mrf.mxu0  ;;  %v1599_v22 = vld [vmem:[#allocation2 + $0x38] sm:$0xff]  ;;  %v2931_v23 = vpop.f32.mrf.mxu1 }
 0x17f   : > { %1588 = vst.msk [vmem:[#allocation2 + $0x48] sm:$0xff] %vm199_vm4, %v1575_v20  ;;  %v1789_v24 = vadd.f32 %v1755_v17, %v1599_v22  ;;  %v1812_v22 = vld [vmem:[#allocation2 + $0x20] sm:$0xff] }
 0x180   : > { %v1760_v25 = vpop.f32.mrf.mxu0  ;;  %v1552_v27 = vpop.f32.mrf.mxu1 }
 0x181   : > { %1802 = vst.msk [vmem:[#allocation2 + $0x38] sm:$0xff] %vm199_vm4, %v1789_v24  ;;  %v1576_v28 = vadd.f32 %v1552_v27, %v1385_v26  ;;  %v3638_v26 = vld [vmem:[%s3727_s2] ss:$0 sm:$0xff] }
 0x182   : > { %v2960_v29 = vpop.f32.mrf.mxu0  ;;  %v1600_v30 = vld [vmem:[#allocation2 + $0x40] sm:$0xff]  ;;  %v2934_v31 = vpop.f32.mrf.mxu1 }
 0x183   : > { %1589 = vst.msk [vmem:[#allocation2 + $0x50] sm:$0xff] %vm199_vm4, %v1576_v28  ;;  %v1790_v32 = vadd.f32 %v1760_v25, %v1600_v30 }
 0x184   : > { %v1763_v33 = vpop.f32.mrf.mxu0  ;;  %v1555_v35 = vpop.f32.mrf.mxu1 }
 0x185   : > { %1803 = vst.msk [vmem:[#allocation2 + $0x40] sm:$0xff] %vm199_vm4, %v1790_v32  ;;  %v1577_v36 = vadd.f32 %v1555_v35, %v1386_v34  ;;  %v3644_v32 = vld [vmem:[%s3728_s3] ss:$0 sm:$0xff] }
 0x186   : > { %v2961_v37 = vpop.f32.mrf.mxu0  ;;  %v1601_v38 = vld [vmem:[#allocation2 + $0x48] sm:$0xff]  ;;  %v2935_v39 = vpop.f32.mrf.mxu1 }
 0x187   : > { %1590 = vst.msk [vmem:[#allocation2 + $0x58] sm:$0xff] %vm199_vm4, %v1577_v36  ;;  %v1791_v40 = vadd.f32 %v1763_v33, %v1601_v38  ;;  %v1813_v33 = vld [vmem:[#allocation2 + $0x28] sm:$0xff] }
 0x188   : > { %v1768_v41 = vpop.f32.mrf.mxu0  ;;  %v1560_v43 = vpop.f32.mrf.mxu1 }
 0x189   : > { %1804 = vst.msk [vmem:[#allocation2 + $0x48] sm:$0xff] %vm199_vm4, %v1791_v40  ;;  %v1578_v44 = vadd.f32 %v1560_v43, %v1387_v42 }
 0x18a   : > { %v2964_v45 = vpop.f32.mrf.mxu0  ;;  %v1602_v46 = vld [vmem:[#allocation2 + $0x50] sm:$0xff]  ;;  %v2938_v47 = vpop.f32.mrf.mxu1 }
 0x18b   : > { %1591 = vst.msk [vmem:[#allocation2 + $0x60] sm:$0xf] %vm212_vm5, %v1578_v44  ;;  %v1792_v1 = vadd.f32 %v1768_v41, %v1602_v46  ;;  %v1814_v44 = vld [vmem:[#allocation2 + $0x30] sm:$0xff] }
 0x18c   : > { %v1771_v48 = vpop.f32.mrf.mxu0  ;;  %v1563_v49 = vpop.f32.mrf.mxu1 }
 0x18d   : > { %1805 = vst.msk [vmem:[#allocation2 + $0x50] sm:$0xff] %vm199_vm4, %v1792_v1 }
 0x18e   : > { %v2965_v50 = vpop.f32.mrf.mxu0  ;;  %v1603_v51 = vld [vmem:[#allocation2 + $0x58] sm:$0xff]  ;;  %v2939_v52 = vpop.f32.mrf.mxu1 }
 0x18f   : > { %v1793_v53 = vadd.f32 %v1771_v48, %v1603_v51 }
 0x190   : > { %v1776_v54 = vpop.f32.mrf.mxu0  ;;  %v1997_v56 = vpop.f32.mrf.mxu1 }
 0x191   : > { %1806 = vst.msk [vmem:[#allocation2 + $0x58] sm:$0xff] %vm199_vm4, %v1793_v53  ;;  %v2051_v57 = vadd.f32 %v1997_v56, %v1808_v55  ;;  %v1815_v56 = vld [vmem:[#allocation2 + $0x38] sm:$0xff] }
 0x192   : > { %v2968_v58 = vpop.f32.mrf.mxu0  ;;  %v1604_v59 = vld [vmem:[#allocation2 + $0x60] sm:$0xf]  ;;  %v2974_v60 = vpop.f32.mrf.mxu1 }
 0x193   : > { %v1794_v61 = vadd.f32 %v1776_v54, %v1604_v59  ;;  %2064 = vst.msk [vmem:[#allocation2] sm:$0xff] %vm199_vm4, %v2051_v57 }
 0x194   : > { %v1779_v62 = vpop.f32.mrf.mxu0  ;;  %v2000_v0 = vpop.f32.mrf.mxu1 }
 0x195   : > { %1807 = vst.msk [vmem:[#allocation2 + $0x60] sm:$0xf] %vm212_vm5, %v1794_v61  ;;  %v2052_v2 = vadd.f32 %v2000_v0, %v1809_v63 }
 0x196   : > { %v2969_v3 = vpop.f32.mrf.mxu0  ;;  %v2975_v4 = vpop.f32.mrf.mxu1 }
 0x197   : > { %2065 = vst.msk [vmem:[#allocation2 + $0x8] sm:$0xff] %vm199_vm4, %v2052_v2 }
 0x198   : > { %v2217_v5 = vpop.f32.mrf.mxu0  ;;  %v2005_v7 = vpop.f32.mrf.mxu1 }
 0x199   : > { %v2053_v8 = vadd.f32 %v2005_v7, %v1810_v6  ;;  %v1816_v6 = vld [vmem:[#allocation2 + $0x40] sm:$0xff] }
 0x19a   : > { %v3004_v9 = vpop.f32.mrf.mxu0  ;;  %v2077_v10 = vld [vmem:[#allocation2] sm:$0xff]  ;;  %v2978_v11 = vpop.f32.mrf.mxu1 }
 0x19b   : > { %2066 = vst.msk [vmem:[#allocation2 + $0x10] sm:$0xff] %vm199_vm4, %v2053_v8  ;;  %v2271_v12 = vadd.f32 %v2217_v5, %v2077_v10 }
 0x19c   : > { %v2220_v13 = vpop.f32.mrf.mxu0  ;;  %v2008_v15 = vpop.f32.mrf.mxu1 }
 0x19d   : > { %2284 = vst.msk [vmem:[#allocation2] sm:$0xff] %vm199_vm4, %v2271_v12  ;;  %v2054_v16 = vadd.f32 %v2008_v15, %v1811_v14 }
 0x19e   : > { %v3005_v17 = vpop.f32.mrf.mxu0  ;;  %v2078_v18 = vld [vmem:[#allocation2 + $0x8] sm:$0xff]  ;;  %v2979_v19 = vpop.f32.mrf.mxu1 }
 0x19f   : > { %2067 = vst.msk [vmem:[#allocation2 + $0x18] sm:$0xff] %vm199_vm4, %v2054_v16  ;;  %v2272_v20 = vadd.f32 %v2220_v13, %v2078_v18  ;;  %v1817_v19 = vld [vmem:[#allocation2 + $0x48] sm:$0xff] }
 0x1a0   : > { %v2225_v21 = vpop.f32.mrf.mxu0  ;;  %v2013_v23 = vpop.f32.mrf.mxu1 }
 0x1a1   : > { %2285 = vst.msk [vmem:[#allocation2 + $0x8] sm:$0xff] %vm199_vm4, %v2272_v20  ;;  %v2055_v24 = vadd.f32 %v2013_v23, %v1812_v22 }
 0x1a2   : > { %v3008_v25 = vpop.f32.mrf.mxu0  ;;  %v2079_v27 = vld [vmem:[#allocation2 + $0x10] sm:$0xff]  ;;  %v2982_v28 = vpop.f32.mrf.mxu1 }
 0x1a3   : > { %2068 = vst.msk [vmem:[#allocation2 + $0x20] sm:$0xff] %vm199_vm4, %v2055_v24  ;;  %v2273_v29 = vadd.f32 %v2225_v21, %v2079_v27 }
 0x1a4   : > { %v2228_v30 = vpop.f32.mrf.mxu0  ;;  %v2297_v31 = vld [vmem:[#allocation2] sm:$0xff]  ;;  %v2016_v34 = vpop.f32.mrf.mxu1 }
 0x1a5   : > { %v2317_v35 = vadd.f32 %v3638_v26, %v2297_v31  ;;  %2286 = vst.msk [vmem:[#allocation2 + $0x10] sm:$0xff] %vm199_vm4, %v2273_v29  ;;  %v2056_v36 = vadd.f32 %v2016_v34, %v1813_v33  ;;  %v1818_v34 = vld [vmem:[#allocation2 + $0x50] sm:$0xff] }
 0x1a6   : > { %v3009_v37 = vpop.f32.mrf.mxu0  ;;  %v2080_v38 = vld [vmem:[#allocation2 + $0x18] sm:$0xff]  ;;  %v2983_v39 = vpop.f32.mrf.mxu1 }
 0x1a7   : > { %vm2330_vm10 = vcmp.ge.f32.partialorder %v2317_v35, 0.0  ;;  %v2350_v40 = vmul.f32 %v3644_v32, %v2317_v35  ;;  %2069 = vst.msk [vmem:[#allocation2 + $0x28] sm:$0xff] %vm199_vm4, %v2056_v36  ;;  %v2274_v41 = vadd.f32 %v2228_v30, %v2080_v38 }
 0x1a8   : > { %v2233_v42 = vpop.f32.mrf.mxu0  ;;  %v2298_v43 = vld [vmem:[#allocation2 + $0x8] sm:$0xff]  ;;  %v2021_v45 = vpop.f32.mrf.mxu1 }
 0x1a9   : > { %v2363_v46 = vsel %vm2330_vm10, %v2317_v35, %v2350_v40  ;;  %v2318_v47 = vadd.f32 %v3638_v26, %v2298_v43  ;;  %2287 = vst.msk [vmem:[#allocation2 + $0x18] sm:$0xff] %vm199_vm4, %v2274_v41  ;;  %v2057_v1 = vadd.f32 %v2021_v45, %v1814_v44 }
 0x1aa   : > { %v3012_v48 = vpop.f32.mrf.mxu0  ;;  %v2675_v49 = vpack.c.bf16 %v2363_v46, %v2363_v46  ;;  %v2081_v50 = vld [vmem:[#allocation2 + $0x20] sm:$0xff]  ;;  %v2986_v51 = vpop.f32.mrf.mxu1 }
 0x1ab   : > { %vm2331_vm11 = vcmp.ge.f32.partialorder %v2318_v47, 0.0  ;;  %v2351_v52 = vmul.f32 %v3644_v32, %v2318_v47  ;;  %2070 = vst.msk [vmem:[#allocation2 + $0x30] sm:$0xff] %vm199_vm4, %v2057_v1  ;;  %v2275_v53 = vadd.f32 %v2233_v42, %v2081_v50 }
 0x1ac   : > { %v2236_v54 = vpop.f32.mrf.mxu0  ;;  %2429 = vst.msk [vmem:[%s3654_s21] sm:$0xf] %vm212_vm5, %v2675_v49  ;;  %v2299_v55 = vld [vmem:[#allocation2 + $0x10] sm:$0xff]  ;;  %v2024_v57 = vpop.f32.mrf.mxu1 }
 0x1ad   : > { %v2364_v58 = vsel %vm2331_vm11, %v2318_v47, %v2351_v52  ;;  %v2319_v59 = vadd.f32 %v3638_v26, %v2299_v55  ;;  %2288 = vst.msk [vmem:[#allocation2 + $0x20] sm:$0xff] %vm199_vm4, %v2275_v53  ;;  %v2058_v60 = vadd.f32 %v2024_v57, %v1815_v56  ;;  %v1819_v47 = vld [vmem:[#allocation2 + $0x58] sm:$0xff] }
 0x1ae   : > { %v3013_v61 = vpop.f32.mrf.mxu0  ;;  %v2676_v62 = vpack.c.bf16 %v2364_v58, %v2364_v58  ;;  %v2082_v63 = vld [vmem:[#allocation2 + $0x28] sm:$0xff]  ;;  %v2987_v0 = vpop.f32.mrf.mxu1 }
 0x1af   : > { %vm2332_vm12 = vcmp.ge.f32.partialorder %v2319_v59, 0.0  ;;  %v2352_v2 = vmul.f32 %v3644_v32, %v2319_v59  ;;  %2071 = vst.msk [vmem:[#allocation2 + $0x38] sm:$0xff] %vm199_vm4, %v2058_v60  ;;  %v2276_v3 = vadd.f32 %v2236_v54, %v2082_v63 }
 0x1b0   : > { %v2241_v4 = vpop.f32.mrf.mxu0  ;;  %2430 = vst.msk [vmem:[%s3654_s21 + $0x4] sm:$0xf] %vm212_vm5, %v2676_v62  ;;  %v2300_v5 = vld [vmem:[#allocation2 + $0x18] sm:$0xff]  ;;  %v2029_v7 = vpop.f32.mrf.mxu1 }
 0x1b1   : > { %v2365_v8 = vsel %vm2332_vm12, %v2319_v59, %v2352_v2  ;;  %v2320_v9 = vadd.f32 %v3638_v26, %v2300_v5  ;;  %2289 = vst.msk [vmem:[#allocation2 + $0x28] sm:$0xff] %vm199_vm4, %v2276_v3  ;;  %v2059_v10 = vadd.f32 %v2029_v7, %v1816_v6  ;;  %v1820_v59 = vld [vmem:[#allocation2 + $0x60] sm:$0xf] }
 0x1b2   : > { %v3016_v11 = vpop.f32.mrf.mxu0  ;;  %v2677_v12 = vpack.c.bf16 %v2365_v8, %v2365_v8  ;;  %v2083_v13 = vld [vmem:[#allocation2 + $0x30] sm:$0xff]  ;;  %v2990_v14 = vpop.f32.mrf.mxu1 }
 0x1b3   : > { %vm2333_vm13 = vcmp.ge.f32.partialorder %v2320_v9, 0.0  ;;  %v2353_v15 = vmul.f32 %v3644_v32, %v2320_v9  ;;  %2072 = vst.msk [vmem:[#allocation2 + $0x40] sm:$0xff] %vm199_vm4, %v2059_v10  ;;  %v2277_v16 = vadd.f32 %v2241_v4, %v2083_v13 }
 0x1b4   : > { %v2244_v17 = vpop.f32.mrf.mxu0  ;;  %2431 = vst.msk [vmem:[%s3654_s21 + $0x8] sm:$0xf] %vm212_vm5, %v2677_v12  ;;  %v2301_v18 = vld [vmem:[#allocation2 + $0x20] sm:$0xff]  ;;  %v2032_v20 = vpop.f32.mrf.mxu1 }
 0x1b5   : > { %v2366_v21 = vsel %vm2333_vm13, %v2320_v9, %v2353_v15  ;;  %v2321_v22 = vadd.f32 %v3638_v26, %v2301_v18  ;;  %2290 = vst.msk [vmem:[#allocation2 + $0x30] sm:$0xff] %vm199_vm4, %v2277_v16  ;;  %v2060_v23 = vadd.f32 %v2032_v20, %v1817_v19 }
 0x1b6   : > { %v3017_v24 = vpop.f32.mrf.mxu0  ;;  %v2678_v25 = vpack.c.bf16 %v2366_v21, %v2366_v21  ;;  %v2084_v27 = vld [vmem:[#allocation2 + $0x38] sm:$0xff]  ;;  %v2991_v28 = vpop.f32.mrf.mxu1 }
 0x1b7   : > { %vm2334_vm14 = vcmp.ge.f32.partialorder %v2321_v22, 0.0  ;;  %v2354_v29 = vmul.f32 %v3644_v32, %v2321_v22  ;;  %2073 = vst.msk [vmem:[#allocation2 + $0x48] sm:$0xff] %vm199_vm4, %v2060_v23  ;;  %v2278_v30 = vadd.f32 %v2244_v17, %v2084_v27 }
 0x1b8   : > { %v2249_v31 = vpop.f32.mrf.mxu0  ;;  %2432 = vst.msk [vmem:[%s3654_s21 + $0xc] sm:$0xf] %vm212_vm5, %v2678_v25  ;;  %v2302_v33 = vld [vmem:[#allocation2 + $0x28] sm:$0xff]  ;;  %v2037_v35 = vpop.f32.mrf.mxu1 }
 0x1b9   : > { %v2367_v36 = vsel %vm2334_vm14, %v2321_v22, %v2354_v29  ;;  %v2322_v37 = vadd.f32 %v3638_v26, %v2302_v33  ;;  %2291 = vst.msk [vmem:[#allocation2 + $0x38] sm:$0xff] %vm199_vm4, %v2278_v30  ;;  %v2061_v38 = vadd.f32 %v2037_v35, %v1818_v34 }
 0x1ba   : > { %v3020_v39 = vpop.f32.mrf.mxu0  ;;  %v2679_v40 = vpack.c.bf16 %v2367_v36, %v2367_v36  ;;  %v2085_v41 = vld [vmem:[#allocation2 + $0x40] sm:$0xff]  ;;  %v2994_v42 = vpop.f32.mrf.mxu1 }
 0x1bb   : > { %vm2335_vm15 = vcmp.ge.f32.partialorder %v2322_v37, 0.0  ;;  %v2355_v43 = vmul.f32 %v3644_v32, %v2322_v37  ;;  %2074 = vst.msk [vmem:[#allocation2 + $0x50] sm:$0xff] %vm199_vm4, %v2061_v38  ;;  %v2279_v44 = vadd.f32 %v2249_v31, %v2085_v41 }
 0x1bc   : > { %v2252_v45 = vpop.f32.mrf.mxu0  ;;  %2433 = vst.msk [vmem:[%s3654_s21 + $0x10] sm:$0xf] %vm212_vm5, %v2679_v40  ;;  %v2303_v46 = vld [vmem:[#allocation2 + $0x30] sm:$0xff]  ;;  %v2040_v1 = vpop.f32.mrf.mxu1 }
 0x1bd   : > { %v2368_v48 = vsel %vm2335_vm15, %v2322_v37, %v2355_v43  ;;  %v2323_v49 = vadd.f32 %v3638_v26, %v2303_v46  ;;  %2292 = vst.msk [vmem:[#allocation2 + $0x40] sm:$0xff] %vm199_vm4, %v2279_v44  ;;  %v2062_v50 = vadd.f32 %v2040_v1, %v1819_v47 }
 0x1be   : > { %v3021_v51 = vpop.f32.mrf.mxu0  ;;  %v2680_v52 = vpack.c.bf16 %v2368_v48, %v2368_v48  ;;  %v2086_v53 = vld [vmem:[#allocation2 + $0x48] sm:$0xff]  ;;  %v2995_v54 = vpop.f32.mrf.mxu1 }
 0x1bf   : > { %vm2336_vm0 = vcmp.ge.f32.partialorder %v2323_v49, 0.0  ;;  %v2356_v55 = vmul.f32 %v3644_v32, %v2323_v49  ;;  %2075 = vst.msk [vmem:[#allocation2 + $0x58] sm:$0xff] %vm199_vm4, %v2062_v50  ;;  %v2280_v56 = vadd.f32 %v2252_v45, %v2086_v53 }
 0x1c0   : > { %v2257_v57 = vpop.f32.mrf.mxu0  ;;  %2434 = vst.msk [vmem:[%s3654_s21 + $0x14] sm:$0xf] %vm212_vm5, %v2680_v52  ;;  %v2304_v58 = vld [vmem:[#allocation2 + $0x38] sm:$0xff]  ;;  %v2045_v60 = vpop.f32.mrf.mxu1 }
 0x1c1   : > { %v2369_v61 = vsel %vm2336_vm0, %v2323_v49, %v2356_v55  ;;  %v2324_v62 = vadd.f32 %v3638_v26, %v2304_v58  ;;  %2293 = vst.msk [vmem:[#allocation2 + $0x48] sm:$0xff] %vm199_vm4, %v2280_v56  ;;  %v2063_v63 = vadd.f32 %v2045_v60, %v1820_v59 }
 0x1c2   : > { %v3024_v0 = vpop.f32.mrf.mxu0  ;;  %v2681_v2 = vpack.c.bf16 %v2369_v61, %v2369_v61  ;;  %v2087_v3 = vld [vmem:[#allocation2 + $0x50] sm:$0xff]  ;;  %v2998_v4 = vpop.f32.mrf.mxu1 }
 0x1c3   : > { %vm2337_vm1 = vcmp.ge.f32.partialorder %v2324_v62, 0.0  ;;  %v2357_v5 = vmul.f32 %v3644_v32, %v2324_v62  ;;  %2076 = vst.msk [vmem:[#allocation2 + $0x60] sm:$0xf] %vm212_vm5, %v2063_v63  ;;  %v2281_v6 = vadd.f32 %v2257_v57, %v2087_v3 }
 0x1c4   : > { %v2260_v7 = vpop.f32.mrf.mxu0  ;;  %2435 = vst.msk [vmem:[%s3654_s21 + $0x18] sm:$0xf] %vm212_vm5, %v2681_v2  ;;  %v2305_v8 = vld [vmem:[#allocation2 + $0x40] sm:$0xff]  ;;  %v2048_v9 = vpop.f32.mrf.mxu1 }
 0x1c5   : > { %v2370_v10 = vsel %vm2337_vm1, %v2324_v62, %v2357_v5  ;;  %v2325_v11 = vadd.f32 %v3638_v26, %v2305_v8  ;;  %2294 = vst.msk [vmem:[#allocation2 + $0x50] sm:$0xff] %vm199_vm4, %v2281_v6 }
 0x1c6   : > { %v3025_v12 = vpop.f32.mrf.mxu0  ;;  %v2682_v13 = vpack.c.bf16 %v2370_v10, %v2370_v10  ;;  %v2088_v14 = vld [vmem:[#allocation2 + $0x58] sm:$0xff]  ;;  %v2999_v15 = vpop.f32.mrf.mxu1 }
 0x1c7   : > { %vm2338_vm2 = vcmp.ge.f32.partialorder %v2325_v11, 0.0  ;;  %v2358_v16 = vmul.f32 %v3644_v32, %v2325_v11  ;;  %v2282_v17 = vadd.f32 %v2260_v7, %v2088_v14 }
 0x1c8   : > { %v2265_v18 = vpop.f32.mrf.mxu0  ;;  %2436 = vst.msk [vmem:[%s3654_s21 + $0x1c] sm:$0xf] %vm212_vm5, %v2682_v13  ;;  %v2306_v19 = vld [vmem:[#allocation2 + $0x48] sm:$0xff] }
 0x1c9   : > { %v2371_v20 = vsel %vm2338_vm2, %v2325_v11, %v2358_v16  ;;  %v2326_v21 = vadd.f32 %v3638_v26, %v2306_v19  ;;  %2295 = vst.msk [vmem:[#allocation2 + $0x58] sm:$0xff] %vm199_vm4, %v2282_v17 }
 0x1ca   : > { %v3028_v22 = vpop.f32.mrf.mxu0  ;;  %v2683_v23 = vpack.c.bf16 %v2371_v20, %v2371_v20  ;;  %v2089_v24 = vld [vmem:[#allocation2 + $0x60] sm:$0xf] }
 0x1cb   : > { %vm2339_vm3 = vcmp.ge.f32.partialorder %v2326_v21, 0.0  ;;  %v2359_v25 = vmul.f32 %v3644_v32, %v2326_v21  ;;  %v2283_v27 = vadd.f32 %v2265_v18, %v2089_v24 }
 0x1cc   : > { %v2268_v28 = vpop.f32.mrf.mxu0  ;;  %2437 = vst.msk [vmem:[%s3654_s21 + $0x20] sm:$0xf] %vm212_vm5, %v2683_v23  ;;  %v2307_v29 = vld [vmem:[#allocation2 + $0x50] sm:$0xff] }
 0x1cd   : > { %v2372_v30 = vsel %vm2339_vm3, %v2326_v21, %v2359_v25  ;;  %v2327_v31 = vadd.f32 %v3638_v26, %v2307_v29  ;;  %2296 = vst.msk [vmem:[#allocation2 + $0x60] sm:$0xf] %vm212_vm5, %v2283_v27 }
 0x1ce   : > { %v3029_v33 = vpop.f32.mrf.mxu0  ;;  %v2684_v34 = vpack.c.bf16 %v2372_v30, %v2372_v30 }
 0x1cf   : > { %vm2340_vm4 = vcmp.ge.f32.partialorder %v2327_v31, 0.0  ;;  %v2360_v35 = vmul.f32 %v3644_v32, %v2327_v31 }
 0x1d0   : > { %2438 = vst.msk [vmem:[%s3654_s21 + $0x24] sm:$0xf] %vm212_vm5, %v2684_v34  ;;  %v2308_v36 = vld [vmem:[#allocation2 + $0x58] sm:$0xff] }
 0x1d1   : > { %v2373_v37 = vsel %vm2340_vm4, %v2327_v31, %v2360_v35  ;;  %v2328_v38 = vadd.f32 %v3638_v26, %v2308_v36 }
 0x1d2   : > { %v2685_v39 = vpack.c.bf16 %v2373_v37, %v2373_v37 }
 0x1d3   : > { %vm2341_vm6 = vcmp.ge.f32.partialorder %v2328_v38, 0.0  ;;  %v2361_v40 = vmul.f32 %v3644_v32, %v2328_v38 }
 0x1d4   : > { %2439 = vst.msk [vmem:[%s3654_s21 + $0x28] sm:$0xf] %vm212_vm5, %v2685_v39  ;;  %v2309_v41 = vld [vmem:[#allocation2 + $0x60] sm:$0xf] }
 0x1d5   : > { %v2374_v42 = vsel %vm2341_vm6, %v2328_v38, %v2361_v40  ;;  %v2329_v43 = vadd.f32 %v3638_v26, %v2309_v41 }
 0x1d6   : > { %v2686_v44 = vpack.c.bf16 %v2374_v42, %v2374_v42 }
 0x1d7   : > { %vm2342_vm7 = vcmp.ge.f32.partialorder %v2329_v43, 0.0  ;;  %v2362_v45 = vmul.f32 %v3644_v32, %v2329_v43 }
 0x1d8   : > { %2440 = vst.msk [vmem:[%s3654_s21 + $0x2c] sm:$0xf] %vm212_vm5, %v2686_v44 }
 0x1d9   : > { %v2375_v46 = vsel %vm2342_vm7, %v2329_v43, %v2362_v45 }
 0x1da   : > { %v2687_v47 = vpack.c.bf16 %v2375_v46, %v2375_v46 }
 0x1dc   : > { %2442 = vst.msk [vmem:[%s3654_s21 + $0x30] sm:$0x3] %vm2441_vm8, %v2687_v47 }
 0x1dd PF: > { %s14_s15 = sadd.s32 1, %s3121_s15  }
 0x1de   : > { %p11_p4 = scmp.ge.s32.totalorder %s14_s15, 4  }
 0x1e0   :  { %13 = sbr.rel (!%p11_p4) target bundleno = 1 (0x1), region = 74 }

// kernel: _lambda_.7
= control target key start
LH: loop header
LB: loop body
LE: loop exit
PB: predicated region body
PF: predicated region fallthrough
CT: control target
= control target key end

     0   :  { %v86_v8 = vlaneseq  ;;  %v525_v15 = vmov 1966171168   ;;  %s664_s0 = inlined_call_operand.vmem [shape: bf16[2,256], index: 0, kind: input, shape index: {}]   ;;  %s665_s1 = inlined_call_operand.vmem [shape: bf16[256,32], index: 1, kind: input, shape index: {}]   ;;  %s666_s2 = inlined_call_operand.vmem [shape: f32[1,32], index: 2, kind: input, shape index: {}]   ;;  %s667_s3 = inlined_call_operand.vmem [shape: f32[1,32], index: 3, kind: input, shape index: {}]   ;;  %s668_s4 = inlined_call_operand.vmem [shape: bf16[1,32,32], index: 4, kind: input, shape index: {}]   ;;  %s669_s5 = inlined_call_operand.vmem [shape: f32[1,1,32], index: 5, kind: input, shape index: {}]   ;;  %s670_s6 = inlined_call_operand.vmem [shape: f32[1,1,32], index: 6, kind: input, shape index: {}]   ;;  %s671_s7 = inlined_call_operand.vmem [shape: bf16[1,32,32], index: 7, kind: input, shape index: {}]   ;;  %s672_s8 = inlined_call_operand.vmem [shape: f32[1,1,32], index: 8, kind: input, shape index: {}]   ;;  %s673_s9 = inlined_call_operand.hbm [shape: f32[2,32], index: 9, kind: output, shape index: {}]  }
   0x1   :  { %v483_v0 = vld [vmem:[%s665_s1 + $0x78] sm:$0xff]   ;;  %v485_v2 = vld [vmem:[%s665_s1 + $0x70] sm:$0xff]   ;;  %v487_v4 = vld [vmem:[%s665_s1 + $0x68] sm:$0xff]   ;;  %v84_v16 = vunpack.c.l.s4 %v525_v15 }
   0x2   :  { %v484_v1 = vld [vmem:[%s665_s1 + $0x38] sm:$0xff]   ;;  %435 = vmatprep.subr.bf16.mxu0 %v483_v0  ;;  %v486_v3 = vld [vmem:[%s665_s1 + $0x30] sm:$0xff]   ;;  %v488_v5 = vld [vmem:[%s665_s1 + $0x28] sm:$0xff]   ;;  %v87_v12 = vshrl.u32 %v86_v8, 7 }
   0x3   :  { %436 = vmatpush3.bf16.msra.mxu0 %v484_v1  ;;  %v489_v6 = vld [vmem:[%s665_s1 + $0x60] sm:$0xff]   ;;  %v491_v9 = vld [vmem:[%s665_s1 + $0x58] sm:$0xff]   ;;  %v493_v11 = vld [vmem:[%s665_s1 + $0x50] sm:$0xff]   ;;  %v85_v18 = vunpack.c.0.s8 %v84_v16 }
   0x4   :  { %437 = vmatprep.subr.bf16.mxu0 %v485_v2  ;;  %v490_v7 = vld [vmem:[%s665_s1 + $0x20] sm:$0xff]   ;;  %v492_v10 = vld [vmem:[%s665_s1 + $0x18] sm:$0xff]   ;;  %v494_v14 = vld [vmem:[%s665_s1 + $0x10] sm:$0xff]  }
   0x5   :  { %v408_v13 = vld.sshfl [vmem:[%s664_s0] sm:$0x11 pattern:$0x75316420] }
   0x6   :  { %v82_v17 = vcombine.high %v408_v13, %v408_v13 }
   0x7   :  { %438 = vmatpush3.bf16.msra.mxu0 %v486_v3 }
   0x8   :  { %439 = vmatprep.subr.bf16.mxu0 %v487_v4 }
   0xb   :  { %440 = vmatpush3.bf16.msra.mxu0 %v488_v5 }
   0xc   :  { %441 = vmatprep.subr.bf16.mxu0 %v489_v6 }
   0xf   :  { %442 = vmatpush3.bf16.msra.mxu0 %v490_v7 }
  0x10   :  { %443 = vmatprep.subr.bf16.mxu0 %v491_v9 }
  0x13   :  { %444 = vmatpush3.bf16.msra.mxu0 %v492_v10 }
  0x14   :  { %14 = vsyncpa [#allocation3], 0  ;;  %445 = vmatprep.subr.bf16.mxu0 %v493_v11  ;;  %v495_v19 = vld [vmem:[%s665_s1 + $0x48] sm:$0xff]   ;;  %v88_v20 = vsub.s32 %v85_v18, %v87_v12  ;;  %v497_v23 = vld [vmem:[%s665_s1 + $0x40] sm:$0xff]   ;;  %v526_v27 = vmov 0.0   ;;  %vm527_vm0 = vmmov 0  }
  0x15   :  { %v496_v21 = vld [vmem:[%s665_s1 + $0x8] sm:$0xff]   ;;  %v498_v24 = vld [vmem:[%s665_s1] sm:$0xff]   ;;  %463 = vmatprep.subr.bf16.mxu1 %v526_v27  ;;  %467 = vmatprep.mubr.msk.bf16.mxu1 %vm527_vm0, %v526_v27  ;;  %vm269_vm2 = vcmask 261120   ;;  %vm391_vm4 = vcmask 254976  }
  0x16   :  { %v96_v22 = vrot.slane %v82_v17, %v88_v20  ;;  %v89_v25 = vrot.slane %v408_v13, %v88_v20  ;;  %v499_v26 = vld [vmem:[%s668_s4 + $0x8] sm:$0xff]   ;;  %v500_v28 = vld [vmem:[%s668_s4] sm:$0xff]  }
  0x17   :  { %446 = vmatpush3.bf16.msra.mxu0 %v494_v14  ;;  %464 = vmatpush3.bf16.msra.mxu1 %v499_v26  ;;  %v407_v30 = vld [vmem:[%s666_s2] ss:$0 sm:$0xff]  ;;  %v501_v40 = vld [vmem:[%s671_s7 + $0x8] sm:$0xff]  }
  0x18   :  { %447 = vmatprep.subr.bf16.mxu0 %v495_v19  ;;  %227 = vmatprep.mubr.bf16.mxu0 %v96_v22  ;;  %v425_v33 = vld [vmem:[%s667_s3] ss:$0 sm:$0xff] }
  0x19   :  { %465 = vmatprep.subr.bf16.mxu1 %v526_v27  ;;  %v502_v41 = vld [vmem:[%s671_s7] sm:$0xff]  }
  0x1a   :  { %v426_v42 = vld [vmem:[%s669_s5] ss:$0 sm:$0xff]  ;;  %s528_s5 = smov [#allocation2]  }
  0x1b   :  { %448 = vmatpush3.bf16.msra.mxu0 %v496_v21  ;;  %466 = vmatpush3.bf16.msra.mxu1 %v500_v28  ;;  %v430_v44 = vld [vmem:[%s670_s6] ss:$0 sm:$0xff]  ;;  %s399_s13 = sshll.u32 %s528_s5, 4  ;;  %s400_s13 = int_to_ptr.vmem [resolvable:$true] %s399_s13 }
  0x1c   :  { %449 = vmatprep.subr.bf16.mxu0 %v497_v23  ;;  %471 = vmatprep.subr.bf16.mxu1 %v526_v27  ;;  %v431_v52 = vld [vmem:[%s672_s8] ss:$0 sm:$0xff]  ;;  %s503_s6 = scalar_lea.vmem %s400_s13, 32  ;;  %p508_p1 = scmp.lt.s32.totalorder %s400_s13, %s400_s13 }
  0x1d   :  { %p504_p0 = scmp.ne.s32.totalorder %s400_s13, %s503_s6  ;;  %p509_p2 = scmp.lt.s32.totalorder %s503_s6, %s503_s6 }
  0x1f   :  { %450 = vmatpush3.bf16.msra.mxu0 %v498_v24  ;;  %p510_p3 = por %p509_p2, %p508_p1 }
  0x21   :  { %p511_p4 = pnand %p510_p3, %p504_p0 }
  0x22   :  { %228 = vmatmul.mubr.bf16.vlgmr.msra.gmra.mxu0 %v89_v25 }
  0xe2   :  { %v451_v29 = vpop.f32.mrf.mxu0 }
  0xe4   :  { %v452_v31 = vpop.f32.mrf.mxu0 }
  0xe5   :  { %v453_v32 = vadd.f32 %v452_v31, %v451_v29 }
  0xe6   :  { %v454_v34 = vpop.f32.mrf.mxu0 }
  0xe7   :  { %v230_v35 = vadd.f32 %v453_v32, %v407_v30 }
  0xe8   :  { %v455_v36 = vpop.f32.mrf.mxu0 }
  0xe9   :  { %vm235_vm1 = vcmp.ge.f32.partialorder %v230_v35, 0.0  ;;  %v243_v37 = vmul.f32 %v425_v33, %v230_v35 }
  0xeb   :  { %v244_v38 = vsel %vm235_vm1, %v230_v35, %v243_v37 }
  0xec   :  { %v245_v39 = vpack.c.bf16 %v244_v38, %v244_v38 }
  0xee   :  { %468 = vmatmul.mubr.msk.bf16.vlgmr.msra.gmra.mxu1 %vm269_vm2, %v245_v39 }
  0xef   :  { %475 = vmatprep.mubr.msk.bf16.mxu1 %vm527_vm0, %v526_v27  ;;  %472 = vmatpush3.bf16.msra.mxu1 %v501_v40 }
  0xf0   :  { %473 = vmatprep.subr.bf16.mxu1 %v526_v27 }
  0xf3   :  { %474 = vmatpush3.bf16.msra.mxu1 %v502_v41 }
 0x1ae   :  { %v307_v43 = vpop.f32.mrf.mxu1 }
 0x1af   :  { %v308_v45 = vadd.f32 %v426_v42, %v307_v43 }
 0x1b0   :  { %v469_v46 = vpop.f32.mrf.mxu1 }
 0x1b1   :  { %vm313_vm3 = vcmp.ge.f32.partialorder %v308_v45, 0.0  ;;  %v321_v47 = vmul.f32 %v430_v44, %v308_v45 }
 0x1b2   :  { %v310_v48 = vpop.f32.mrf.mxu1 }
 0x1b3   :  { %v322_v49 = vsel %vm313_vm3, %v308_v45, %v321_v47 }
 0x1b4   :  { %v323_v50 = vpack.c.bf16 %v322_v49, %v322_v49  ;;  %v470_v51 = vpop.f32.mrf.mxu1 }
 0x1b6   :  { %476 = vmatmul.mubr.msk.bf16.vlgmr.msra.gmra.mxu1 %vm269_vm2, %v323_v50 }
 0x276   :  { %v384_v53 = vpop.f32.mrf.mxu1 }
 0x277   :  { %v385_v54 = vadd.f32 %v431_v52, %v384_v53 }
 0x278   :  { %v477_v55 = vpop.f32.mrf.mxu1 }
 0x279   :  { %v390_v56 = vadd.f32 %v385_v54, %v244_v38 }
 0x27a   :  { %v387_v57 = vpop.f32.mrf.mxu1 }
 0x27b   :  { %392 = vst.msk [vmem:[#allocation2] sm:$0x3] %vm391_vm4, %v390_v56 }
 0x27c   :  { %v478_v58 = vpop.f32.mrf.mxu1 }
 0x27d   :  { %514 = shalt.err (!%p511_p4)
}
 0x27e   :  { %402 = dma.vmem_to_hbm [thread:$0]  %s400_s13, 32, %s673_s9, [#allocation3]  }
 0x27f   :  { %523 = dma.done.wait [#allocation3], 32  }
 0x280   :  { %524 = vsyncadd [#allocation3], 4294967264 }
 0x281   :  { %406 = vsyncpa [#allocation3], 1 }

// kernel: _lambda_.6
= control target key start
LH: loop header
LB: loop body
LE: loop exit
PB: predicated region body
PF: predicated region fallthrough
CT: control target
= control target key end

     0   :  { %s1843_s18 = smov 0   ;;  %s2105_s0 = inlined_call_operand.vmem [shape: bf16[2,50,16], index: 0, kind: input, shape index: {}]   ;;  %s2106_s1 = inlined_call_operand.vmem [shape: bf16[9,16,16], index: 1, kind: input, shape index: {}]   ;;  %s2107_s2 = inlined_call_operand.vmem [shape: f32[1,16], index: 2, kind: input, shape index: {}]   ;;  %s2108_s3 = inlined_call_operand.vmem [shape: f32[1,16], index: 3, kind: input, shape index: {}]   ;;  %s2109_s4 = inlined_call_operand.vmem [shape: bf16[2,36,16], index: 4, kind: input, shape index: {}]   ;;  %s2110_s5 = inlined_call_operand.vmem [shape: bf16[2,36,16], index: 5, kind: output, shape index: {}]  }
   0x1 LB: > { %s1481_s19 = sadd.s32 4294967295, %s1809_s18   ;;  %p1485_p0 = scmp.ge.s32.totalorder %s1809_s18, 1  ;;  %s1809_s18 = sphi %s1843_s18, %s15_s18  }
   0x2   : > { %p197_p1 = scmp.lt.s32.totalorder %s1809_s18, 3 }
   0x4   : > { %p198_p2 = pnand %p1485_p0, %p197_p1 }
   0x5   : > { %p230_p3 = scmp.lt.s32.totalorder (!%p198_p2), %s1481_s19, 1 }
   0x6   : > { %201 = sbr.rel (%p198_p2) target bundleno = 345 (0x159), region = 40 }
   0xb   : > { %v1767_v0 = vld [vmem:[%s2106_s1] sm:$0xff]   ;;  %v1811_v1 = vmov 0.0   ;;  %vm246_vm0 = vcmask 130048   ;;  %vm1812_vm1 = vmmov 0   ;;  %s2112_s19 = smov (!%p230_p3, %s1481_s19), 1  ;;  %v1769_v2 = vld [vmem:[%s2106_s1 + $0x8] sm:$0xff]  }
   0xc   : > { %1753 = vmatprep.subr.bf16.mxu1 %v1811_v1  ;;  %1627 = vmatprep.subr.bf16.mxu0 %v1811_v1  ;;  %247 = vst.msk [vmem:[#allocation2] sm:$0xff] %vm246_vm0, %v1811_v1  ;;  %248 = vst.msk [vmem:[#allocation2 + $0x8] sm:$0xff] %vm246_vm0, %v1811_v1  ;;  %s1755_s22 = smul.u32 28, %s2112_s19  ;;  %v1775_v3 = vld [vmem:[%s2106_s1 + $0x10] sm:$0xff]   ;;  %vm516_vm2 = vcmask 1046528   ;;  %v1779_v17 = vld [vmem:[%s2106_s1 + $0x20] sm:$0xff]  }
   0xd   : > { %1754 = vmatpush3.bf16.msra.mxu1 %v1767_v0  ;;  %1633 = vmatprep.mubr.msk.bf16.mxu1 %vm1812_vm1, %v1811_v1  ;;  %249 = vst.msk [vmem:[#allocation2 + $0x10] sm:$0xff] %vm246_vm0, %v1811_v1  ;;  %250 = vst.msk [vmem:[#allocation2 + $0x18] sm:$0xff] %vm246_vm0, %v1811_v1  ;;  %vm385_vm3 = vsmask.f32 7424  ;;  %v1774_v24 = vld [vmem:[%s2106_s1 + $0x18] sm:$0xff]   ;;  %v1787_v52 = vld [vmem:[%s2106_s1 + $0x30] sm:$0xff]  }
   0xe   : > { %1641 = vmatprep.subr.bf16.mxu1 %v1811_v1  ;;  %1628 = vmatpush3.bf16.msra.mxu0 %v1767_v0  ;;  %s1879_s27 = scalar_lea.vmem %s2105_s0, %s1755_s22  ;;  %vm748_vm4 = vsmask.f32 4352  ;;  %vm632_vm5 = vcmask 1044480   ;;  %v1783_v59 = vld [vmem:[%s2106_s1 + $0x28] sm:$0xff]   ;;  %vm989_vm6 = vcmask 1045504   ;;  %vm251_vm7 = vcmask 125952  }
   0xf   : > { %1629 = vmatprep.mubr.msk.bf16.mxu0 %vm1812_vm1, %v1811_v1  ;;  %1655 = vmatprep.subr.bf16.mxu0 %v1811_v1  ;;  %v1768_v4 = vld [vmem:[%s1879_s27 + $0x8] sm:$0xff]   ;;  %v1770_v5 = vld [vmem:[%s1879_s27] sm:$0xff]   ;;  %v1771_v7 = vld [vmem:[%s1879_s27 + $0x10] ss:$0 sps:$4 sm:$0x33]   ;;  %s1756_s17 = smul.u32 20, %s2112_s19 }
  0x10   : > { %1634 = vmatmul.mubr.msk.bf16.vlgmr.msra.gmra.mxu1 %vm246_vm0, %v1768_v4  ;;  %v1772_v6 = vld [vmem:[%s1879_s27] sm:$0xff]   ;;  %v1773_v8 = vld [vmem:[%s1879_s27 + $0x8] sm:$0xff]   ;;  %v1778_v18 = vld [vmem:[%s1879_s27 + $0x10] ss:$0 sps:$4 sm:$0x77]   ;;  %vm1412_vm14 = vcmask 123904  }
  0x11   : > { %1642 = vmatpush3.bf16.msra.mxu1 %v1769_v2  ;;  %1630 = vmatmul.mubr.msk.bf16.vlgmr.msra.gmra.mxu0 %vm246_vm0, %v1770_v5  ;;  %v389_v9 = vshll.u32 %v1772_v6, 16  ;;  %v1777_v10 = vld [vmem:[%s1879_s27 + $0x8] sm:$0xff]   ;;  %v1776_v11 = vld [vmem:[%s1879_s27] sm:$0xfe]   ;;  %v387_v12 = vshrl.u32 %v1772_v6, 16  ;;  %v394_v14 = vshll.u32 %v1773_v8, 16  ;;  %s2071_s22 = scalar_lea.vmem %s2109_s4, %s1756_s17  ;;  %s2088_s29 = scalar_lea.vmem %s2110_s5, %s1756_s17 }
  0x12   : > { %1637 = vmatprep.mubr.msk.bf16.mxu1 %vm1812_vm1, %v1811_v1  ;;  %1669 = vmatprep.subr.bf16.mxu1 %v1811_v1  ;;  %v518_v15 = vrot.slane %v1777_v10, 1  ;;  %v517_v16 = vrot.slane %v1776_v11, 1  ;;  %v1780_v19 = vld [vmem:[%s1879_s27 + $0x10] ss:$0 sps:$4 sm:$0x77]   ;;  %v402_v25 = vshll.u32 %v1778_v18, 16 }
  0x13   : > { %1656 = vmatpush3.bf16.msra.mxu0 %v1775_v3  ;;  %1657 = vmatprep.mubr.msk.bf16.mxu0 %vm1812_vm1, %v1811_v1  ;;  %v391_v13 = vrot.slane %v389_v9, 1  ;;  %v396_v22 = vrot.slane %v394_v14, 1  ;;  %v520_v23 = vrot.slane %v1780_v19, 1  ;;  %v398_v27 = vshrl.u32 %v1773_v8, 16  ;;  %v1785_v28 = vld [vmem:[%s1879_s27 + $0x8] sm:$0xff]   ;;  %v1794_v6 = vld [vmem:[%s2106_s1 + $0x40] sm:$0xff]  }
  0x14   : > { %1683 = vmatprep.subr.bf16.mxu0 %v1811_v1  ;;  %v519_v20 = vsel %vm516_vm2, %v517_v16, %v518_v15  ;;  %v1784_v30 = vld [vmem:[%s1879_s27] sm:$0xf8]   ;;  %v404_v31 = vrot.slane %v402_v25, 1  ;;  %v758_v33 = vshrl.u32 %v1785_v28, 16  ;;  %v761_v34 = vshll.u32 %v1785_v28, 16  ;;  %v1782_v50 = vld [vmem:[%s1879_s27 + $0x8] sm:$0xff]  }
  0x15   : > { %v392_v21 = vor.u32 %v391_v13, %v387_v12  ;;  %v521_v29 = vsel %vm516_vm2, %v518_v15, %v520_v23  ;;  %v400_v32 = vor.u32 %v398_v27, %v396_v22  ;;  %v750_v35 = vshrl.u32 %v1784_v30, 16  ;;  %v1788_v42 = vld [vmem:[%s1879_s27 + $0x10] sm:$0x3f]   ;;  %v1781_v49 = vld [vmem:[%s1879_s27] sm:$0xf8]   ;;  %v1790_v10 = vld [vmem:[%s2106_s1 + $0x38] sm:$0xff]  }
  0x16   : > { %v753_v36 = vshll.u32 %v1784_v30, 16  ;;  %v760_v38 = vrot.slane %v758_v33, 3  ;;  %v763_v39 = vrot.slane %v761_v34, 4  ;;  %v406_v43 = vshrl.u32 %v1778_v18, 16  ;;  %v1786_v60 = vld [vmem:[%s1879_s27 + $0x10] sm:$0x1f]  }
  0x17   : > { %v397_v26 = vsel %vm385_vm3, %v392_v21, %v396_v22  ;;  %v405_v37 = vsel %vm385_vm3, %v400_v32, %v404_v31  ;;  %v752_v40 = vrot.slane %v750_v35, 3  ;;  %v767_v46 = vshrl.u32 %v1788_v42, 16  ;;  %v1791_v0 = vld [vmem:[%s1879_s27 + $0x4] sm:$0xfc]   ;;  %v1792_v2 = vld [vmem:[%s1879_s27 + $0xc] sm:$0xff]  }
  0x18   : > { %1638 = vmatmul.mubr.msk.bf16.gmra.mxu1 %vm246_vm0, %v1771_v7  ;;  %v755_v41 = vrot.slane %v753_v36, 4  ;;  %v764_v45 = vor.u32 %v763_v39, %v760_v38  ;;  %v770_v47 = vshll.u32 %v1788_v42, 16  ;;  %v408_v48 = vor.u32 %v406_v43, %v404_v31  ;;  %v1795_v7 = vld [vmem:[%s1879_s27 + $0x14] ss:$0 sps:$4 sm:$0xff]   ;;  %v1789_v9 = vld [vmem:[%s1879_s27 + $0x4] sm:$0xff]   ;;  %v1793_v12 = vld [vmem:[%s1879_s27 + $0xc] sm:$0xff]  }
  0x19   : > { %1643 = vmatprep.mubr.msk.bf16.mxu1 %vm1812_vm1, %v1811_v1  ;;  %1658 = vmatmul.mubr.msk.bf16.vlgmr.msra.gmra.mxu0 %vm246_vm0, %v519_v20  ;;  %v769_v53 = vrot.slane %v767_v46, 3  ;;  %v633_v55 = vrot.slane %v1781_v49, 3  ;;  %v634_v56 = vrot.slane %v1782_v50, 3  ;;  %v636_v62 = vrot.slane %v1786_v60, 3  ;;  %252 = vst.msk [vmem:[#allocation2 + $0x20] sm:$0xf] %vm251_vm7, %v1811_v1 }
  0x1a   : > { %1684 = vmatpush3.bf16.msra.mxu0 %v1779_v17  ;;  %1661 = vmatprep.mubr.msk.bf16.mxu0 %vm1812_vm1, %v1811_v1  ;;  %v756_v44 = vor.u32 %v755_v41, %v752_v40  ;;  %v772_v54 = vrot.slane %v770_v47, 4  ;;  %v990_v3 = vrot.slane %v1791_v0, 2  ;;  %v991_v4 = vrot.slane %v1792_v2, 2  ;;  %v1797_v13 = vld [vmem:[%s1879_s27 + $0x4] sm:$0xfc]   ;;  %v1798_v14 = vld [vmem:[%s1879_s27 + $0xc] sm:$0xff]  }
  0x1b   : > { %1711 = vmatprep.subr.bf16.mxu0 %v1811_v1  ;;  %v635_v58 = vsel %vm632_vm5, %v633_v55, %v634_v56  ;;  %v637_v63 = vsel %vm632_vm5, %v634_v56, %v636_v62  ;;  %v993_v8 = vrot.slane %v1795_v7, 2  ;;  %v1799_v15 = vld [vmem:[%s1879_s27 + $0x4] sm:$0xf8]   ;;  %v1800_v16 = vld [vmem:[%s1879_s27 + $0xc] sm:$0xff]   ;;  %v1107_v17 = vshrl.u32 %v1797_v13, 16 }
  0x1c   : > { %v765_v51 = vsel %vm748_vm4, %v756_v44, %v764_v45  ;;  %v773_v57 = vor.u32 %v772_v54, %v769_v53  ;;  %v992_v5 = vsel %vm989_vm6, %v990_v3, %v991_v4  ;;  %v1110_v18 = vshll.u32 %v1797_v13, 16  ;;  %v1801_v28 = vld [vmem:[%s1879_s27 + $0x14] sm:$0x1f]   ;;  %v253_v43 = vld [vmem:[#allocation2] sm:$0xff] }
  0x1d   : > { %v994_v11 = vsel %vm989_vm6, %v991_v4, %v993_v8  ;;  %v1115_v19 = vshrl.u32 %v1798_v14, 16  ;;  %v1118_v20 = vshll.u32 %v1798_v14, 16  ;;  %v1242_v21 = vrot.slane %v1799_v15, 3  ;;  %v1802_v30 = vld [vmem:[%s1879_s27 + $0x14] sm:$0x1f]  }
  0x1e   : > { %v774_v61 = vsel %vm748_vm4, %v764_v45, %v773_v57  ;;  %v1243_v22 = vrot.slane %v1800_v16, 3  ;;  %v1112_v25 = vrot.slane %v1110_v18, 3  ;;  %v1124_v33 = vshrl.u32 %v1801_v28, 16  ;;  %v255_v42 = vld [vmem:[#allocation2 + $0x10] sm:$0xff] }
  0x1f   : > { %v1120_v27 = vrot.slane %v1118_v20, 3  ;;  %v1127_v34 = vshll.u32 %v1801_v28, 16  ;;  %vm1105_vm8 = vsmask.f32 5376  ;;  %v1245_v35 = vrot.slane %v1802_v30, 3 }
  0x20   : > { %1644 = vmatmul.mubr.msk.bf16.vlgmr.msra.gmra.mxu1 %vm246_vm0, %v397_v26  ;;  %v1117_v26 = vrot.slane %v1115_v19, 2  ;;  %v257_v55 = vld [vmem:[#allocation2 + $0x20] sm:$0xf] }
  0x21   : > { %1670 = vmatpush3.bf16.msra.mxu1 %v1774_v24  ;;  %1647 = vmatprep.mubr.msk.bf16.mxu1 %vm1812_vm1, %v1811_v1  ;;  %v1109_v24 = vrot.slane %v1107_v17, 2  ;;  %v1129_v38 = vrot.slane %v1127_v34, 3  ;;  %v1246_v39 = vsel %vm632_vm5, %v1243_v22, %v1245_v35 }
  0x22   : > { %1662 = vmatmul.mubr.msk.bf16.gmra.mxu0 %vm246_vm0, %v521_v29  ;;  %1697 = vmatprep.subr.bf16.mxu1 %v1811_v1  ;;  %v1244_v29 = vsel %vm632_vm5, %v1242_v21, %v1243_v22  ;;  %v1121_v32 = vor.u32 %v1120_v27, %v1117_v26 }
  0x23   : > { %1665 = vmatprep.mubr.msk.bf16.mxu0 %vm1812_vm1, %v1811_v1  ;;  %v1113_v31 = vor.u32 %v1112_v25, %v1109_v24 }
  0x25   : > { %v1122_v36 = vsel %vm1105_vm8, %v1113_v31, %v1121_v32 }
  0x28   : > { %1648 = vmatmul.mubr.msk.bf16.gmra.mxu1 %vm246_vm0, %v405_v37  ;;  %v1126_v37 = vrot.slane %v1124_v33, 2 }
  0x29   : > { %1651 = vmatprep.mubr.msk.bf16.mxu1 %vm1812_vm1, %v1811_v1 }
  0x2a   : > { %1666 = vmatmul.mubr.msk.bf16.gmra.mxu0 %vm246_vm0, %v520_v23  ;;  %v1796_v23 = vld [vmem:[%s1879_s27 + $0x14] ss:$0 sps:$4 sm:$0x33]   ;;  %v1130_v40 = vor.u32 %v1129_v38, %v1126_v37 }
  0x2b   : > { %1685 = vmatprep.mubr.msk.bf16.mxu0 %vm1812_vm1, %v1811_v1 }
  0x2c   : > { %v1131_v41 = vsel %vm1105_vm8, %v1121_v32, %v1130_v40 }
  0x30   : > { %1652 = vmatmul.mubr.msk.bf16.gmra.mxu1 %vm246_vm0, %v408_v48  ;;  %v256_v48 = vld [vmem:[#allocation2 + $0x18] sm:$0xff] }
  0x31   : > { %1671 = vmatprep.mubr.msk.bf16.mxu1 %vm1812_vm1, %v1811_v1 }
  0x32   : > { %1686 = vmatmul.mubr.msk.bf16.vlgmr.msra.gmra.mxu0 %vm246_vm0, %v765_v51  ;;  %v254_v51 = vld [vmem:[#allocation2 + $0x8] sm:$0xff] }
  0x33   : > { %1712 = vmatpush3.bf16.msra.mxu0 %v1787_v52  ;;  %1689 = vmatprep.mubr.msk.bf16.mxu0 %vm1812_vm1, %v1811_v1 }
  0x34   : > { %1739 = vmatprep.subr.bf16.mxu0 %v1811_v1 }
  0x38   : > { %1672 = vmatmul.mubr.msk.bf16.vlgmr.msra.gmra.mxu1 %vm246_vm0, %v635_v58 }
  0x39   : > { %1698 = vmatpush3.bf16.msra.mxu1 %v1783_v59  ;;  %1675 = vmatprep.mubr.msk.bf16.mxu1 %vm1812_vm1, %v1811_v1 }
  0x3a   : > { %1690 = vmatmul.mubr.msk.bf16.gmra.mxu0 %vm246_vm0, %v774_v61  ;;  %1725 = vmatprep.subr.bf16.mxu1 %v1811_v1 }
  0x3b   : > { %1693 = vmatprep.mubr.msk.bf16.mxu0 %vm1812_vm1, %v1811_v1 }
  0x40   : > { %1676 = vmatmul.mubr.msk.bf16.gmra.mxu1 %vm246_vm0, %v637_v63 }
  0x41   : > { %1679 = vmatprep.mubr.msk.bf16.mxu1 %vm1812_vm1, %v1811_v1 }
  0x42   : > { %1694 = vmatmul.mubr.msk.bf16.gmra.mxu0 %vm246_vm0, %v773_v57 }
  0x43   : > { %1713 = vmatprep.mubr.msk.bf16.mxu0 %vm1812_vm1, %v1811_v1 }
  0x48   : > { %1680 = vmatmul.mubr.msk.bf16.gmra.mxu1 %vm246_vm0, %v636_v62 }
  0x49   : > { %1699 = vmatprep.mubr.msk.bf16.mxu1 %vm1812_vm1, %v1811_v1 }
  0x4a   : > { %1714 = vmatmul.mubr.msk.bf16.vlgmr.msra.gmra.mxu0 %vm246_vm0, %v992_v5 }
  0x4b   : > { %1740 = vmatpush3.bf16.msra.mxu0 %v1794_v6  ;;  %1717 = vmatprep.mubr.msk.bf16.mxu0 %vm1812_vm1, %v1811_v1 }
  0x50   : > { %1700 = vmatmul.mubr.msk.bf16.vlgmr.msra.gmra.mxu1 %vm246_vm0, %v1789_v9 }
  0x51   : > { %1726 = vmatpush3.bf16.msra.mxu1 %v1790_v10  ;;  %1703 = vmatprep.mubr.msk.bf16.mxu1 %vm1812_vm1, %v1811_v1 }
  0x52   : > { %1718 = vmatmul.mubr.msk.bf16.gmra.mxu0 %vm246_vm0, %v994_v11 }
  0x53   : > { %1721 = vmatprep.mubr.msk.bf16.mxu0 %vm1812_vm1, %v1811_v1 }
  0x58   : > { %1704 = vmatmul.mubr.msk.bf16.gmra.mxu1 %vm246_vm0, %v1793_v12 }
  0x59   : > { %1707 = vmatprep.mubr.msk.bf16.mxu1 %vm1812_vm1, %v1811_v1 }
  0x5a   : > { %1722 = vmatmul.mubr.msk.bf16.gmra.mxu0 %vm246_vm0, %v993_v8 }
  0x5b   : > { %1741 = vmatprep.mubr.msk.bf16.mxu0 %vm1812_vm1, %v1811_v1 }
  0x60   : > { %1708 = vmatmul.mubr.msk.bf16.gmra.mxu1 %vm246_vm0, %v1796_v23 }
  0x61   : > { %1727 = vmatprep.mubr.msk.bf16.mxu1 %vm1812_vm1, %v1811_v1 }
  0x62   : > { %1742 = vmatmul.mubr.msk.bf16.vlgmr.msra.gmra.mxu0 %vm246_vm0, %v1244_v29 }
  0x63   : > { %1745 = vmatprep.mubr.msk.bf16.mxu0 %vm1812_vm1, %v1811_v1 }
  0x68   : > { %1728 = vmatmul.mubr.msk.bf16.vlgmr.msra.gmra.mxu1 %vm246_vm0, %v1122_v36 }
  0x69   : > { %1731 = vmatprep.mubr.msk.bf16.mxu1 %vm1812_vm1, %v1811_v1 }
  0x6a   : > { %1746 = vmatmul.mubr.msk.bf16.gmra.mxu0 %vm246_vm0, %v1246_v39 }
  0x6b   : > { %1749 = vmatprep.mubr.msk.bf16.mxu0 %vm1812_vm1, %v1811_v1 }
  0x70   : > { %1732 = vmatmul.mubr.msk.bf16.gmra.mxu1 %vm246_vm0, %v1131_v41 }
  0x71   : > { %1735 = vmatprep.mubr.msk.bf16.mxu1 %vm1812_vm1, %v1811_v1 }
  0x72   : > { %1750 = vmatmul.mubr.msk.bf16.gmra.mxu0 %vm246_vm0, %v1245_v35 }
  0x78   : > { %1736 = vmatmul.mubr.msk.bf16.gmra.mxu1 %vm246_vm0, %v1130_v40 }
  0xd0   : > { %v335_v44 = vpop.f32.mrf.mxu1 }
  0xd1   : > { %v351_v45 = vadd.f32 %v335_v44, %v255_v42  ;;  %v327_v46 = vpop.f32.mrf.mxu0 }
  0xd2   : > { %v1635_v47 = vpop.f32.mrf.mxu1  ;;  %v349_v49 = vadd.f32 %v327_v46, %v253_v43 }
  0xd3   : > { %356 = vst.msk [vmem:[#allocation2 + $0x10] sm:$0xff] %vm246_vm0, %v351_v45  ;;  %v1631_v50 = vpop.f32.mrf.mxu0 }
  0xd4   : > { %v338_v52 = vpop.f32.mrf.mxu1  ;;  %354 = vst.msk [vmem:[#allocation2] sm:$0xff] %vm246_vm0, %v349_v49 }
  0xd5   : > { %v352_v1 = vadd.f32 %v338_v52, %v256_v48  ;;  %v330_v53 = vpop.f32.mrf.mxu0 }
  0xd6   : > { %v1636_v54 = vpop.f32.mrf.mxu1  ;;  %v350_v56 = vadd.f32 %v330_v53, %v254_v51 }
  0xd7   : > { %357 = vst.msk [vmem:[#allocation2 + $0x18] sm:$0xff] %vm246_vm0, %v352_v1  ;;  %v1632_v57 = vpop.f32.mrf.mxu0 }
  0xd8   : > { %v343_v58 = vpop.f32.mrf.mxu1  ;;  %355 = vst.msk [vmem:[#allocation2 + $0x8] sm:$0xff] %vm246_vm0, %v350_v56 }
  0xd9   : > { %v353_v59 = vadd.f32 %v343_v58, %v257_v55  ;;  %v571_v60 = vpop.f32.mrf.mxu0 }
  0xda   : > { %v1639_v61 = vpop.f32.mrf.mxu1  ;;  %v361_v15 = vld [vmem:[#allocation2 + $0x10] sm:$0xff] }
  0xdb   : > { %358 = vst.msk [vmem:[#allocation2 + $0x20] sm:$0xf] %vm251_vm7, %v353_v59  ;;  %v1659_v62 = vpop.f32.mrf.mxu0  ;;  %v359_v3 = vld [vmem:[#allocation2] sm:$0xff] }
  0xdc   : > { %v346_v63 = vpop.f32.mrf.mxu1 }
  0xdd   : > { %v574_v0 = vpop.f32.mrf.mxu0 }
  0xde   : > { %v1640_v2 = vpop.f32.mrf.mxu1  ;;  %v362_v23 = vld [vmem:[#allocation2 + $0x18] sm:$0xff] }
  0xdf   : > { %v1660_v4 = vpop.f32.mrf.mxu0  ;;  %v360_v8 = vld [vmem:[#allocation2 + $0x8] sm:$0xff] }
  0xe0   : > { %v458_v5 = vpop.f32.mrf.mxu1 }
  0xe1   : > { %v480_v6 = vadd.f32 %v458_v5, %v359_v3 }
  0xe2   : > { %v1645_v7 = vpop.f32.mrf.mxu1  ;;  %v579_v9 = vpop.f32.mrf.mxu0  ;;  %v363_v31 = vld [vmem:[#allocation2 + $0x20] sm:$0xf] }
  0xe3   : > { %485 = vst.msk [vmem:[#allocation2] sm:$0xff] %vm246_vm0, %v480_v6 }
  0xe4   : > { %v461_v10 = vpop.f32.mrf.mxu1  ;;  %v1663_v11 = vpop.f32.mrf.mxu0 }
  0xe5   : > { %v481_v12 = vadd.f32 %v461_v10, %v360_v8 }
  0xe6   : > { %v1646_v13 = vpop.f32.mrf.mxu1  ;;  %v582_v14 = vpop.f32.mrf.mxu0 }
  0xe7   : > { %486 = vst.msk [vmem:[#allocation2 + $0x8] sm:$0xff] %vm246_vm0, %v481_v12 }
  0xe8   : > { %v466_v16 = vpop.f32.mrf.mxu1  ;;  %v1664_v17 = vpop.f32.mrf.mxu0 }
  0xe9   : > { %v482_v18 = vadd.f32 %v466_v16, %v361_v15 }
  0xea   : > { %v490_v19 = vld [vmem:[#allocation2] sm:$0xff]  ;;  %v1649_v20 = vpop.f32.mrf.mxu1  ;;  %v587_v21 = vpop.f32.mrf.mxu0 }
  0xeb   : > { %v593_v22 = vadd.f32 %v571_v60, %v490_v19  ;;  %487 = vst.msk [vmem:[#allocation2 + $0x10] sm:$0xff] %vm246_vm0, %v482_v18 }
  0xec   : > { %v469_v24 = vpop.f32.mrf.mxu1  ;;  %v1667_v25 = vpop.f32.mrf.mxu0 }
  0xed   : > { %598 = vst.msk [vmem:[#allocation2] sm:$0xff] %vm246_vm0, %v593_v22  ;;  %v483_v26 = vadd.f32 %v469_v24, %v362_v23 }
  0xee   : > { %v491_v27 = vld [vmem:[#allocation2 + $0x8] sm:$0xff]  ;;  %v1650_v28 = vpop.f32.mrf.mxu1  ;;  %v590_v29 = vpop.f32.mrf.mxu0 }
  0xef   : > { %v594_v30 = vadd.f32 %v574_v0, %v491_v27  ;;  %488 = vst.msk [vmem:[#allocation2 + $0x18] sm:$0xff] %vm246_vm0, %v483_v26 }
  0xf0   : > { %v474_v32 = vpop.f32.mrf.mxu1  ;;  %v1668_v33 = vpop.f32.mrf.mxu0 }
  0xf1   : > { %599 = vst.msk [vmem:[#allocation2 + $0x8] sm:$0xff] %vm246_vm0, %v594_v30  ;;  %v484_v34 = vadd.f32 %v474_v32, %v363_v31 }
  0xf2   : > { %v492_v35 = vld [vmem:[#allocation2 + $0x10] sm:$0xff]  ;;  %v1653_v36 = vpop.f32.mrf.mxu1  ;;  %v824_v37 = vpop.f32.mrf.mxu0 }
  0xf3   : > { %v595_v38 = vadd.f32 %v579_v9, %v492_v35  ;;  %489 = vst.msk [vmem:[#allocation2 + $0x20] sm:$0xf] %vm251_vm7, %v484_v34 }
  0xf4   : > { %v477_v39 = vpop.f32.mrf.mxu1  ;;  %v1687_v40 = vpop.f32.mrf.mxu0  ;;  %v603_v45 = vld [vmem:[#allocation2] sm:$0xff] }
  0xf5   : > { %600 = vst.msk [vmem:[#allocation2 + $0x10] sm:$0xff] %vm246_vm0, %v595_v38 }
  0xf6   : > { %v493_v41 = vld [vmem:[#allocation2 + $0x18] sm:$0xff]  ;;  %v1654_v42 = vpop.f32.mrf.mxu1  ;;  %v827_v43 = vpop.f32.mrf.mxu0 }
  0xf7   : > { %v596_v44 = vadd.f32 %v582_v14, %v493_v41 }
  0xf8   : > { %v687_v46 = vpop.f32.mrf.mxu1  ;;  %v1688_v47 = vpop.f32.mrf.mxu0  ;;  %v604_v1 = vld [vmem:[#allocation2 + $0x8] sm:$0xff] }
  0xf9   : > { %601 = vst.msk [vmem:[#allocation2 + $0x18] sm:$0xff] %vm246_vm0, %v596_v44  ;;  %v709_v48 = vadd.f32 %v687_v46, %v603_v45 }
  0xfa   : > { %v494_v49 = vld [vmem:[#allocation2 + $0x20] sm:$0xf]  ;;  %v1673_v50 = vpop.f32.mrf.mxu1  ;;  %v832_v51 = vpop.f32.mrf.mxu0 }
  0xfb   : > { %v597_v52 = vadd.f32 %v587_v21, %v494_v49  ;;  %714 = vst.msk [vmem:[#allocation2] sm:$0xff] %vm246_vm0, %v709_v48 }
  0xfc   : > { %v690_v53 = vpop.f32.mrf.mxu1  ;;  %v1691_v54 = vpop.f32.mrf.mxu0  ;;  %v605_v58 = vld [vmem:[#allocation2 + $0x10] sm:$0xff] }
  0xfd   : > { %602 = vst.msk [vmem:[#allocation2 + $0x20] sm:$0xf] %vm251_vm7, %v597_v52  ;;  %v710_v55 = vadd.f32 %v690_v53, %v604_v1 }
  0xfe   : > { %v1674_v56 = vpop.f32.mrf.mxu1  ;;  %v835_v57 = vpop.f32.mrf.mxu0 }
  0xff   : > { %715 = vst.msk [vmem:[#allocation2 + $0x8] sm:$0xff] %vm246_vm0, %v710_v55 }
 0x100   : > { %v695_v59 = vpop.f32.mrf.mxu1  ;;  %v1692_v60 = vpop.f32.mrf.mxu0  ;;  %v606_v3 = vld [vmem:[#allocation2 + $0x18] sm:$0xff] }
 0x101   : > { %v711_v61 = vadd.f32 %v695_v59, %v605_v58 }
 0x102   : > { %v719_v62 = vld [vmem:[#allocation2] sm:$0xff]  ;;  %v1677_v63 = vpop.f32.mrf.mxu1  ;;  %v840_v0 = vpop.f32.mrf.mxu0 }
 0x103   : > { %v846_v2 = vadd.f32 %v824_v37, %v719_v62  ;;  %716 = vst.msk [vmem:[#allocation2 + $0x10] sm:$0xff] %vm246_vm0, %v711_v61 }
 0x104   : > { %v698_v4 = vpop.f32.mrf.mxu1  ;;  %v1695_v5 = vpop.f32.mrf.mxu0  ;;  %v607_v11 = vld [vmem:[#allocation2 + $0x20] sm:$0xf] }
 0x105   : > { %851 = vst.msk [vmem:[#allocation2] sm:$0xff] %vm246_vm0, %v846_v2  ;;  %v712_v6 = vadd.f32 %v698_v4, %v606_v3 }
 0x106   : > { %v720_v7 = vld [vmem:[#allocation2 + $0x8] sm:$0xff]  ;;  %v1678_v8 = vpop.f32.mrf.mxu1  ;;  %v843_v9 = vpop.f32.mrf.mxu0 }
 0x107   : > { %v847_v10 = vadd.f32 %v827_v43, %v720_v7  ;;  %717 = vst.msk [vmem:[#allocation2 + $0x18] sm:$0xff] %vm246_vm0, %v712_v6 }
 0x108   : > { %v703_v12 = vpop.f32.mrf.mxu1  ;;  %v1696_v13 = vpop.f32.mrf.mxu0 }
 0x109   : > { %852 = vst.msk [vmem:[#allocation2 + $0x8] sm:$0xff] %vm246_vm0, %v847_v10  ;;  %v713_v14 = vadd.f32 %v703_v12, %v607_v11 }
 0x10a   : > { %v721_v15 = vld [vmem:[#allocation2 + $0x10] sm:$0xff]  ;;  %v1681_v16 = vpop.f32.mrf.mxu1  ;;  %v1044_v17 = vpop.f32.mrf.mxu0 }
 0x10b   : > { %v848_v18 = vadd.f32 %v832_v51, %v721_v15  ;;  %718 = vst.msk [vmem:[#allocation2 + $0x20] sm:$0xf] %vm251_vm7, %v713_v14 }
 0x10c   : > { %v706_v19 = vpop.f32.mrf.mxu1  ;;  %v1715_v20 = vpop.f32.mrf.mxu0  ;;  %v856_v25 = vld [vmem:[#allocation2] sm:$0xff] }
 0x10d   : > { %853 = vst.msk [vmem:[#allocation2 + $0x10] sm:$0xff] %vm246_vm0, %v848_v18 }
 0x10e   : > { %v722_v21 = vld [vmem:[#allocation2 + $0x18] sm:$0xff]  ;;  %v1682_v22 = vpop.f32.mrf.mxu1  ;;  %v1047_v23 = vpop.f32.mrf.mxu0 }
 0x10f   : > { %v849_v24 = vadd.f32 %v835_v57, %v722_v21 }
 0x110   : > { %v931_v26 = vpop.f32.mrf.mxu1  ;;  %v1716_v27 = vpop.f32.mrf.mxu0  ;;  %v857_v33 = vld [vmem:[#allocation2 + $0x8] sm:$0xff] }
 0x111   : > { %854 = vst.msk [vmem:[#allocation2 + $0x18] sm:$0xff] %vm246_vm0, %v849_v24  ;;  %v953_v28 = vadd.f32 %v931_v26, %v856_v25 }
 0x112   : > { %v723_v29 = vld [vmem:[#allocation2 + $0x20] sm:$0xf]  ;;  %v1701_v30 = vpop.f32.mrf.mxu1  ;;  %v1052_v31 = vpop.f32.mrf.mxu0 }
 0x113   : > { %v850_v32 = vadd.f32 %v840_v0, %v723_v29  ;;  %958 = vst.msk [vmem:[#allocation2] sm:$0xff] %vm246_vm0, %v953_v28 }
 0x114   : > { %v934_v34 = vpop.f32.mrf.mxu1  ;;  %v1719_v35 = vpop.f32.mrf.mxu0  ;;  %v858_v39 = vld [vmem:[#allocation2 + $0x10] sm:$0xff] }
 0x115   : > { %855 = vst.msk [vmem:[#allocation2 + $0x20] sm:$0xf] %vm251_vm7, %v850_v32  ;;  %v954_v36 = vadd.f32 %v934_v34, %v857_v33 }
 0x116   : > { %v1702_v37 = vpop.f32.mrf.mxu1  ;;  %v1055_v38 = vpop.f32.mrf.mxu0 }
 0x117   : > { %959 = vst.msk [vmem:[#allocation2 + $0x8] sm:$0xff] %vm246_vm0, %v954_v36 }
 0x118   : > { %v939_v40 = vpop.f32.mrf.mxu1  ;;  %v1720_v41 = vpop.f32.mrf.mxu0  ;;  %v859_v47 = vld [vmem:[#allocation2 + $0x18] sm:$0xff] }
 0x119   : > { %v955_v42 = vadd.f32 %v939_v40, %v858_v39  ;;  %v1568_v39 = vld [vmem:[%s2107_s2] ss:$0 sm:$0xff] }
 0x11a   : > { %v963_v43 = vld [vmem:[#allocation2] sm:$0xff]  ;;  %v1705_v44 = vpop.f32.mrf.mxu1  ;;  %v1060_v45 = vpop.f32.mrf.mxu0 }
 0x11b   : > { %v1066_v46 = vadd.f32 %v1044_v17, %v963_v43  ;;  %960 = vst.msk [vmem:[#allocation2 + $0x10] sm:$0xff] %vm246_vm0, %v955_v42  ;;  %v1569_v44 = vld [vmem:[%s2108_s3] ss:$0 sm:$0xff] }
 0x11c   : > { %v942_v48 = vpop.f32.mrf.mxu1  ;;  %v1723_v49 = vpop.f32.mrf.mxu0  ;;  %v860_v54 = vld [vmem:[#allocation2 + $0x20] sm:$0xf] }
 0x11d   : > { %1071 = vst.msk [vmem:[#allocation2] sm:$0xff] %vm246_vm0, %v1066_v46  ;;  %v956_v50 = vadd.f32 %v942_v48, %v859_v47  ;;  %v1583_v47 = vld [vmem:[%s2071_s22] sm:$0xff]  }
 0x11e   : > { %v964_v51 = vld [vmem:[#allocation2 + $0x8] sm:$0xff]  ;;  %v1706_v52 = vpop.f32.mrf.mxu1  ;;  %v1063_v1 = vpop.f32.mrf.mxu0 }
 0x11f   : > { %v1067_v53 = vadd.f32 %v1047_v23, %v964_v51  ;;  %961 = vst.msk [vmem:[#allocation2 + $0x18] sm:$0xff] %vm246_vm0, %v956_v50  ;;  %v1584_v52 = vunpack.c.l.bf16 %v1583_v47 }
 0x120   : > { %v947_v55 = vpop.f32.mrf.mxu1  ;;  %v1724_v56 = vpop.f32.mrf.mxu0 }
 0x121   : > { %1072 = vst.msk [vmem:[#allocation2 + $0x8] sm:$0xff] %vm246_vm0, %v1067_v53  ;;  %v957_v57 = vadd.f32 %v947_v55, %v860_v54 }
 0x122   : > { %v965_v58 = vld [vmem:[#allocation2 + $0x10] sm:$0xff]  ;;  %v1709_v59 = vpop.f32.mrf.mxu1  ;;  %v1296_v60 = vpop.f32.mrf.mxu0 }
 0x123   : > { %v1068_v61 = vadd.f32 %v1052_v31, %v965_v58  ;;  %962 = vst.msk [vmem:[#allocation2 + $0x20] sm:$0xf] %vm251_vm7, %v957_v57 }
 0x124   : > { %v950_v62 = vpop.f32.mrf.mxu1  ;;  %v1743_v63 = vpop.f32.mrf.mxu0  ;;  %v1076_v5 = vld [vmem:[#allocation2] sm:$0xff] }
 0x125   : > { %1073 = vst.msk [vmem:[#allocation2 + $0x10] sm:$0xff] %vm246_vm0, %v1068_v61 }
 0x126   : > { %v966_v0 = vld [vmem:[#allocation2 + $0x18] sm:$0xff]  ;;  %v1710_v2 = vpop.f32.mrf.mxu1  ;;  %v1299_v3 = vpop.f32.mrf.mxu0 }
 0x127   : > { %v1069_v4 = vadd.f32 %v1055_v38, %v966_v0  ;;  %v1590_v0 = vld [vmem:[%s2071_s22 + $0x8] sm:$0xff]  }
 0x128   : > { %v1181_v6 = vpop.f32.mrf.mxu1  ;;  %v1744_v7 = vpop.f32.mrf.mxu0  ;;  %v1077_v13 = vld [vmem:[#allocation2 + $0x8] sm:$0xff] }
 0x129   : > { %1074 = vst.msk [vmem:[#allocation2 + $0x18] sm:$0xff] %vm246_vm0, %v1069_v4  ;;  %v1203_v8 = vadd.f32 %v1181_v6, %v1076_v5  ;;  %v1588_v6 = vunpack.c.l.bf16 %v1590_v0 }
 0x12a   : > { %v967_v9 = vld [vmem:[#allocation2 + $0x20] sm:$0xf]  ;;  %v1729_v10 = vpop.f32.mrf.mxu1  ;;  %v1304_v11 = vpop.f32.mrf.mxu0 }
 0x12b   : > { %v1070_v12 = vadd.f32 %v1060_v45, %v967_v9  ;;  %1208 = vst.msk [vmem:[#allocation2] sm:$0xff] %vm246_vm0, %v1203_v8 }
 0x12c   : > { %v1184_v14 = vpop.f32.mrf.mxu1  ;;  %v1747_v15 = vpop.f32.mrf.mxu0  ;;  %v1078_v19 = vld [vmem:[#allocation2 + $0x10] sm:$0xff] }
 0x12d   : > { %1075 = vst.msk [vmem:[#allocation2 + $0x20] sm:$0xf] %vm251_vm7, %v1070_v12  ;;  %v1204_v16 = vadd.f32 %v1184_v14, %v1077_v13  ;;  %v1589_v14 = vunpack.c.h.bf16 %v1590_v0 }
 0x12e   : > { %v1730_v17 = vpop.f32.mrf.mxu1  ;;  %v1307_v18 = vpop.f32.mrf.mxu0 }
 0x12f   : > { %1209 = vst.msk [vmem:[#allocation2 + $0x8] sm:$0xff] %vm246_vm0, %v1204_v16  ;;  %v1371_v16 = vld [vmem:[%s2071_s22 + $0x10] sm:$0x3] }
 0x130   : > { %v1189_v20 = vpop.f32.mrf.mxu1  ;;  %v1748_v21 = vpop.f32.mrf.mxu0  ;;  %v1079_v27 = vld [vmem:[#allocation2 + $0x18] sm:$0xff] }
 0x131   : > { %v1205_v22 = vadd.f32 %v1189_v20, %v1078_v19 }
 0x132   : > { %v1213_v23 = vld [vmem:[#allocation2] sm:$0xff]  ;;  %v1733_v24 = vpop.f32.mrf.mxu1  ;;  %v1312_v25 = vpop.f32.mrf.mxu0 }
 0x133   : > { %v1318_v26 = vadd.f32 %v1296_v60, %v1213_v23  ;;  %1210 = vst.msk [vmem:[#allocation2 + $0x10] sm:$0xff] %vm246_vm0, %v1205_v22  ;;  %v1585_v60 = vunpack.c.h.bf16 %v1583_v47  ;;  %v1376_v22 = vunpack.c.l.bf16 %v1371_v16 }
 0x134   : > { %v1192_v28 = vpop.f32.mrf.mxu1  ;;  %v1751_v29 = vpop.f32.mrf.mxu0  ;;  %v1080_v35 = vld [vmem:[#allocation2 + $0x20] sm:$0xf] }
 0x135   : > { %1323 = vst.msk [vmem:[#allocation2] sm:$0xff] %vm246_vm0, %v1318_v26  ;;  %v1206_v30 = vadd.f32 %v1192_v28, %v1079_v27 }
 0x136   : > { %v1214_v31 = vld [vmem:[#allocation2 + $0x8] sm:$0xff]  ;;  %v1734_v32 = vpop.f32.mrf.mxu1  ;;  %v1315_v33 = vpop.f32.mrf.mxu0 }
 0x137   : > { %v1319_v34 = vadd.f32 %v1299_v3, %v1214_v31  ;;  %1211 = vst.msk [vmem:[#allocation2 + $0x18] sm:$0xff] %vm246_vm0, %v1206_v30 }
 0x138   : > { %v1197_v36 = vpop.f32.mrf.mxu1  ;;  %v1752_v37 = vpop.f32.mrf.mxu0 }
 0x139   : > { %1324 = vst.msk [vmem:[#allocation2 + $0x8] sm:$0xff] %vm246_vm0, %v1319_v34  ;;  %v1207_v38 = vadd.f32 %v1197_v36, %v1080_v35 }
 0x13a   : > { %v1215_v40 = vld [vmem:[#allocation2 + $0x10] sm:$0xff]  ;;  %v1737_v41 = vpop.f32.mrf.mxu1 }
 0x13b   : > { %v1320_v42 = vadd.f32 %v1304_v11, %v1215_v40  ;;  %1212 = vst.msk [vmem:[#allocation2 + $0x20] sm:$0xf] %vm251_vm7, %v1207_v38 }
 0x13c   : > { %v1328_v43 = vld [vmem:[#allocation2] sm:$0xff]  ;;  %v1200_v45 = vpop.f32.mrf.mxu1 }
 0x13d   : > { %v1340_v46 = vadd.f32 %v1568_v39, %v1328_v43  ;;  %1325 = vst.msk [vmem:[#allocation2 + $0x10] sm:$0xff] %vm246_vm0, %v1320_v42 }
 0x13e   : > { %v1216_v48 = vld [vmem:[#allocation2 + $0x18] sm:$0xff]  ;;  %v1738_v49 = vpop.f32.mrf.mxu1 }
 0x13f   : > { %vm1345_vm9 = vcmp.ge.f32.partialorder %v1340_v46, 0.0  ;;  %v1357_v50 = vmul.f32 %v1569_v44, %v1340_v46  ;;  %v1321_v51 = vadd.f32 %v1307_v18, %v1216_v48 }
 0x140   : > { %v1329_v1 = vld [vmem:[#allocation2 + $0x8] sm:$0xff] }
 0x141   : > { %v1362_v53 = vsel %vm1345_vm9, %v1340_v46, %v1357_v50  ;;  %v1341_v54 = vadd.f32 %v1568_v39, %v1329_v1  ;;  %1326 = vst.msk [vmem:[#allocation2 + $0x18] sm:$0xff] %vm246_vm0, %v1321_v51 }
 0x142   : > { %v1377_v55 = vmul.f32 0.5, %v1362_v53  ;;  %v1217_v56 = vld [vmem:[#allocation2 + $0x20] sm:$0xf] }
 0x143   : > { %vm1346_vm10 = vcmp.ge.f32.partialorder %v1341_v54, 0.0  ;;  %v1358_v57 = vmul.f32 %v1569_v44, %v1341_v54  ;;  %v1322_v58 = vadd.f32 %v1312_v25, %v1217_v56 }
 0x144   : > { %v1382_v59 = vadd.f32 %v1584_v52, %v1377_v55  ;;  %v1330_v61 = vld [vmem:[#allocation2 + $0x10] sm:$0xff] }
 0x145   : > { %v1363_v62 = vsel %vm1346_vm10, %v1341_v54, %v1358_v57  ;;  %v1342_v63 = vadd.f32 %v1568_v39, %v1330_v61  ;;  %1327 = vst.msk [vmem:[#allocation2 + $0x20] sm:$0xf] %vm251_vm7, %v1322_v58 }
 0x146   : > { %v1577_v2 = vpack.c.bf16 %v1382_v59, %v1382_v59  ;;  %v1378_v3 = vmul.f32 0.5, %v1363_v62 }
 0x147   : > { %vm1347_vm11 = vcmp.ge.f32.partialorder %v1342_v63, 0.0  ;;  %v1359_v4 = vmul.f32 %v1569_v44, %v1342_v63 }
 0x148   : > { %1408 = vst.msk [vmem:[%s2088_s29] sm:$0xf] %vm251_vm7, %v1577_v2  ;;  %v1383_v5 = vadd.f32 %v1585_v60, %v1378_v3  ;;  %v1331_v7 = vld [vmem:[#allocation2 + $0x18] sm:$0xff] }
 0x149   : > { %v1364_v8 = vsel %vm1347_vm11, %v1342_v63, %v1359_v4  ;;  %v1343_v9 = vadd.f32 %v1568_v39, %v1331_v7 }
 0x14a   : > { %v1578_v10 = vpack.c.bf16 %v1383_v5, %v1383_v5  ;;  %v1379_v11 = vmul.f32 0.5, %v1364_v8 }
 0x14b   : > { %vm1348_vm12 = vcmp.ge.f32.partialorder %v1343_v9, 0.0  ;;  %v1360_v12 = vmul.f32 %v1569_v44, %v1343_v9 }
 0x14c   : > { %1409 = vst.msk [vmem:[%s2088_s29 + $0x4] sm:$0xf] %vm251_vm7, %v1578_v10  ;;  %v1384_v13 = vadd.f32 %v1588_v6, %v1379_v11  ;;  %v1332_v15 = vld [vmem:[#allocation2 + $0x20] sm:$0xf] }
 0x14d   : > { %v1365_v17 = vsel %vm1348_vm12, %v1343_v9, %v1360_v12  ;;  %v1344_v18 = vadd.f32 %v1568_v39, %v1332_v15 }
 0x14e   : > { %v1579_v19 = vpack.c.bf16 %v1384_v13, %v1384_v13  ;;  %v1380_v20 = vmul.f32 0.5, %v1365_v17 }
 0x14f   : > { %vm1349_vm13 = vcmp.ge.f32.partialorder %v1344_v18, 0.0  ;;  %v1361_v21 = vmul.f32 %v1569_v44, %v1344_v18 }
 0x150   : > { %1410 = vst.msk [vmem:[%s2088_s29 + $0x8] sm:$0xf] %vm251_vm7, %v1579_v19  ;;  %v1385_v23 = vadd.f32 %v1589_v14, %v1380_v20 }
 0x151   : > { %v1366_v24 = vsel %vm1349_vm13, %v1344_v18, %v1361_v21 }
 0x152   : > { %v1580_v25 = vpack.c.bf16 %v1385_v23, %v1385_v23  ;;  %v1381_v26 = vmul.f32 0.5, %v1366_v24 }
 0x154   : > { %1411 = vst.msk [vmem:[%s2088_s29 + $0xc] sm:$0xf] %vm251_vm7, %v1580_v25  ;;  %v1386_v27 = vadd.f32 %v1381_v26, %v1376_v22 }
 0x156   : > { %v1581_v28 = vpack.c.bf16 %v1386_v27, %v1386_v27 }
 0x158   : > { %1413 = vst.msk [vmem:[%s2088_s29 + $0x10] sm:$0x3] %vm1412_vm14, %v1581_v28 }
 0x159 PF: > { %s15_s18 = sadd.s32 1, %s1809_s18  }
 0x15a   : > { %p12_p4 = scmp.ge.s32.totalorder %s15_s18, 4  }
 0x15c   :  { %14 = sbr.rel (!%p12_p4) target bundleno = 1 (0x1), region = 81 }

</bundles_post_ra>
